<compile_context>
chip_gen: v7x
topology: tpu7x:2x2x1
jax: 0.10.0
libtpu: 0.0.40
codegen_flags: <defaults>
</compile_context>

<pallas_src>
import jax
import jax.numpy as jnp
from jax.experimental import pallas as pl
from jax.experimental.pallas import tpu as pltpu


_PAD_OFF = 8  # conv1 output is stored at this (sublane-aligned) column offset


# ---------------------------------------------------------------------------
# Kernel 1: fused conv3x3+BN+ReLU -> nearest x2 -> conv3x3+BN+ReLU -> 1x1 proj
# One grid step = one image; output = (Ncls, 4*H*W) phase logits, where the
# flat minor index is ((a*2+b)*H + u)*W + v  (phase p = 2a+b holds the conv2
# output at rows 2u+a, cols 2v+b of the virtual 2x map).
# ---------------------------------------------------------------------------
def _head_conv_kernel(xp_ref, w1_ref, s1_ref, t1_ref, wp_ref, s2_ref, t2_ref,
                      wot_ref, bo_ref, o_ref, f1pad_ref):
    # xp_ref : (1, H+2, W+2, Cin)   zero-padded NHWC input tile (f32)
    # w1_ref : (9*Cin, Cmid)        im2col conv1 weight, row=(ky*3+kx)*Cin+ci (bf16)
    # s1/t1  : (1, Cmid)            folded BN1 scale / shift (f32)
    # wp_ref : (4, 4*Cmid, Cmid2)   per-phase collapsed conv2 weights (bf16),
    #                               row within phase = (dy*2+dx)*Cmid + ch
    # s2/t2  : (1, Cmid2)           folded BN2 scale / shift (f32)
    # wot_ref: (Ncls, Cmid2)        1x1 projection weight, transposed (bf16)
    # bo_ref : (Ncls, 1)            projection bias (f32)
    # o_ref  : (1, Ncls, 4*H*W)     phase logits, lane-dense store (f32)
    # f1pad  : (H+2, W+16, Cmid)    VMEM scratch: conv1 output with zero halo
    H = xp_ref.shape[1] - 2
    W = xp_ref.shape[2] - 2
    Cin = xp_ref.shape[3]
    Cmid = s1_ref.shape[1]

    # ---- conv1: single im2col matmul (K = 9*Cin) + folded BN + ReLU --------
    xp = xp_ref[0]                                        # (H+2, W+2, Cin)
    patches = [xp[ky:ky + H, kx:kx + W, :].reshape(H * W, Cin)
               for ky in range(3) for kx in range(3)]
    col1 = jnp.concatenate(patches, axis=-1).astype(jnp.bfloat16)  # (H*W, 9*Cin)
    acc1 = jnp.dot(col1, w1_ref[...], preferred_element_type=jnp.float32)
    feat1 = jnp.maximum(acc1 * s1_ref[...] + t1_ref[...], 0.0)     # (H*W, Cmid)

    # ---- place conv1 output inside a 1-px zero halo kept in VMEM -----------
    # Only the ring that conv2 actually reads is zeroed; the interior is
    # fully overwritten every grid step.
    zrow = jnp.zeros((1, f1pad_ref.shape[1], Cmid), jnp.float32)
    f1pad_ref[0:1, :, :] = zrow
    f1pad_ref[H + 1:H + 2, :, :] = zrow
    zcol = jnp.zeros((H, 1, Cmid), jnp.float32)
    f1pad_ref[1:H + 1, _PAD_OFF - 1:_PAD_OFF, :] = zcol
    f1pad_ref[1:H + 1, _PAD_OFF + W:_PAD_OFF + W + 1, :] = zcol
    f1pad_ref[1:H + 1, _PAD_OFF:_PAD_OFF + W, :] = feat1.reshape(H, W, Cmid)
    f1p = f1pad_ref[...]                                  # (H+2, W+16, Cmid)

    # ---- conv2 on the virtual nearest-x2 upsample, phase-decomposed --------
    # Build the 9 distinct shifted windows ONCE (dedup), then each phase is a
    # single K = 4*Cmid matmul on the channel-concatenated taps.
    wins = [[f1p[r:r + H, _PAD_OFF - 1 + c:_PAD_OFF - 1 + c + W, :]
             .reshape(H * W, Cmid) for c in range(3)] for r in range(3)]

    s2 = s2_ref[...]
    t2 = t2_ref[...]
    feats = []
    for a in range(2):
        for b in range(2):
            col2 = jnp.concatenate(
                [wins[a][b], wins[a][b + 1], wins[a + 1][b], wins[a + 1][b + 1]],
                axis=-1).astype(jnp.bfloat16)             # (H*W, 4*Cmid)
            acc2 = jnp.dot(col2, wp_ref[a * 2 + b],
                           preferred_element_type=jnp.float32)     # (H*W, Cmid2)
            feats.append(jnp.maximum(acc2 * s2 + t2, 0.0))

    # ---- 1x1 class projection: all 4 phases batched, computed transposed ---
    feat2_all = jnp.concatenate(feats, axis=0)            # (4*H*W, Cmid2) f32
    feat2_t = feat2_all.T.astype(jnp.bfloat16)            # (Cmid2, 4*H*W)
    logits_t = jnp.dot(wot_ref[...], feat2_t,
                       preferred_element_type=jnp.float32) + bo_ref[...]
    o_ref[0] = logits_t                                   # lane-dense store


def head_conv_stage(xp, w1i, s1, t1, wp, s2, t2, wot, bo):
    N = xp.shape[0]
    H, W, Cin = xp.shape[1] - 2, xp.shape[2] - 2, xp.shape[3]
    Cmid = w1i.shape[1]
    Cmid2 = wp.shape[2]
    Ncls = wot.shape[0]
    return pl.pallas_call(
        _head_conv_kernel,
        out_shape=jax.ShapeDtypeStruct((N, Ncls, 4 * H * W), jnp.float32),
        grid=(N,),
        in_specs=[
            pl.BlockSpec((1, H + 2, W + 2, Cin), lambda n: (n, 0, 0, 0)),
            pl.BlockSpec((9 * Cin, Cmid), lambda n: (0, 0)),
            pl.BlockSpec((1, Cmid), lambda n: (0, 0)),
            pl.BlockSpec((1, Cmid), lambda n: (0, 0)),
            pl.BlockSpec((4, 4 * Cmid, Cmid2), lambda n: (0, 0, 0)),
            pl.BlockSpec((1, Cmid2), lambda n: (0, 0)),
            pl.BlockSpec((1, Cmid2), lambda n: (0, 0)),
            pl.BlockSpec((Ncls, Cmid2), lambda n: (0, 0)),
            pl.BlockSpec((Ncls, 1), lambda n: (0, 0)),
        ],
        out_specs=pl.BlockSpec((1, Ncls, 4 * H * W), lambda n: (n, 0, 0)),
        scratch_shapes=[pltpu.VMEM((H + 2, W + 16, Cmid), jnp.float32)],
        compiler_params=pltpu.CompilerParams(
            dimension_semantics=("parallel",),
            vmem_limit_bytes=32 * 1024 * 1024),
    )(xp, w1i, s1, t1, wp, s2, t2, wot, bo)


# ---------------------------------------------------------------------------
# Kernel 2: bilinear x(up_factor/2) upsample (align_corners=False), classes
# batched in the body, grid over (image, output row band).  NCHW output so the
# large final store is lane-dense (Wo lanes).
# ---------------------------------------------------------------------------
def _bilinear_kernel(ph_ref, ahc_ref, awtc_ref, o_ref):
    # ph_ref  : (1, Ncls*2H, 2W)  block-layout phase logits, rows=(c,a,u),
    #                             cols=(b*W+v) (f32)
    # ahc_ref : (band, 2H)        row-interp matrix band, cols=(a*H+u) (bf16)
    # awtc_ref: (2W, Wo)          col-interp matrix^T, rows=(b*W+v) (bf16)
    # o_ref   : (1, Ncls, band, Wo) NCHW output tile (f32)
    n_cls = o_ref.shape[1]
    h2 = ahc_ref.shape[1]                                 # 2*H
    p = ph_ref[0].astype(jnp.bfloat16)                    # (Ncls*2H, 2W)
    t = jnp.dot(p, awtc_ref[...], preferred_element_type=jnp.float32)
    t3 = t.reshape(n_cls, h2, t.shape[-1]).astype(jnp.bfloat16)  # (Ncls, 2H, Wo)
    ah = ahc_ref[...]                                     # (band, 2H)
    for c in range(n_cls):
        o_ref[0, c] = jnp.dot(ah, t3[c], preferred_element_type=jnp.float32)


def bilinear_phase_upsample(ph, ahc, awtc):
    N = ph.shape[0]
    H2 = ahc.shape[1]
    W2 = awtc.shape[0]
    Ho = ahc.shape[0]
    Wo = awtc.shape[1]
    Ncls = ph.shape[1] // H2
    n_bands = 2 if (Ho % 2 == 0 and (Ho // 2) % 8 == 0) else 1
    band = Ho // n_bands
    return pl.pallas_call(
        _bilinear_kernel,
        out_shape=jax.ShapeDtypeStruct((N, Ncls, Ho, Wo), jnp.float32),
        grid=(N, n_bands),
        in_specs=[
            pl.BlockSpec((1, Ncls * H2, W2), lambda n, h: (n, 0, 0)),
            pl.BlockSpec((band, H2), lambda n, h: (h, 0)),
            pl.BlockSpec((W2, Wo), lambda n, h: (0, 0)),
        ],
        out_specs=pl.BlockSpec((1, Ncls, band, Wo), lambda n, h: (n, 0, h, 0)),
        compiler_params=pltpu.CompilerParams(
            dimension_semantics=("parallel", "parallel"),
            vmem_limit_bytes=32 * 1024 * 1024),
    )(ph, ahc, awtc)


# ---------------------------------------------------------------------------
# Host-side prep: BN folding, phase-collapsed conv2 weights, interp matrices
# ---------------------------------------------------------------------------
def fold_bn(gamma, beta, mean, var, eps=1e-5):
    scale = gamma / jnp.sqrt(var + eps)
    shift = beta - mean * scale
    return (scale[None, :].astype(jnp.float32),
            shift[None, :].astype(jnp.float32))


def bilinear_matrix(in_size, out_size):
    # Matches torch.nn.Upsample(mode='bilinear', align_corners=False).
    scale = in_size / out_size
    dst = jnp.arange(out_size, dtype=jnp.float32)
    src = jnp.maximum((dst + 0.5) * scale - 0.5, 0.0)
    i0 = jnp.clip(jnp.floor(src).astype(jnp.int32), 0, in_size - 1)
    i1 = jnp.minimum(i0 + 1, in_size - 1)
    frac = src - i0.astype(jnp.float32)
    return (jax.nn.one_hot(i0, in_size, dtype=jnp.float32) * (1.0 - frac)[:, None]
            + jax.nn.one_hot(i1, in_size, dtype=jnp.float32) * frac[:, None])


def collapse_conv2_weights(w2):
    # conv3x3 applied to a nearest-x2 upsample == four 2x2 "phase" convs on the
    # original map.  groups[a][dy] lists the 3x3 row-taps ky that collapse onto
    # window offset dy for output row parity a (identical for columns b/dx).
    groups = (((0,), (1, 2)), ((0, 1), (2,)))
    taps = []
    for a in range(2):
        for b in range(2):
            for dy in range(2):
                for dx in range(2):
                    acc = jnp.zeros(w2.shape[2:], w2.dtype)
                    for ky in groups[a][dy]:
                        for kx in groups[b][dx]:
                            acc = acc + w2[ky, kx]
                    taps.append(acc)
    return jnp.stack(taps)  # (16, Cmid, Cmid2), flat idx = ((a*2+b)*2+dy)*2+dx


def init_params(key, in_chan, mid_chan, n_classes, up_factor=8):
    mid_chan2 = up_factor * up_factor  # aux=True branch
    ks = jax.random.split(key, 12)
    p = {}
    p['w1'] = 0.1 * jax.random.normal(ks[0], (3, 3, in_chan, mid_chan), jnp.float32)
    p['bn1_gamma'] = 1.0 + 0.05 * jax.random.normal(ks[1], (mid_chan,), jnp.float32)
    p['bn1_beta'] = 0.05 * jax.random.normal(ks[2], (mid_chan,), jnp.float32)
    p['bn1_mean'] = 0.05 * jax.random.normal(ks[3], (mid_chan,), jnp.float32)
    p['bn1_var'] = jnp.ones((mid_chan,), jnp.float32)
    p['w2'] = 0.1 * jax.random.normal(ks[4], (3, 3, mid_chan, mid_chan2), jnp.float32)
    p['bn2_gamma'] = 1.0 + 0.05 * jax.random.normal(ks[5], (mid_chan2,), jnp.float32)
    p['bn2_beta'] = 0.05 * jax.random.normal(ks[6], (mid_chan2,), jnp.float32)
    p['bn2_mean'] = 0.05 * jax.random.normal(ks[7], (mid_chan2,), jnp.float32)
    p['bn2_var'] = jnp.ones((mid_chan2,), jnp.float32)
    p['w_out'] = 0.1 * jax.random.normal(ks[8], (mid_chan2, n_classes), jnp.float32)
    p['b_out'] = 0.05 * jax.random.normal(ks[9], (n_classes,), jnp.float32)
    return p


def segment_head_forward(x_nchw, p, up_factor=8):
    # x: (N, in_chan, H, W) NCHW, matching the PyTorch module.
    N, Cin, H, W = x_nchw.shape
    up = up_factor // 2                     # aux=True branch
    Ho, Wo = 2 * H * up, 2 * W * up

    # NCHW -> NHWC fused with the 1-pixel zero halo for conv1 (tiny tensor).
    xp = jnp.pad(jnp.transpose(x_nchw, (0, 2, 3, 1)),
                 ((0, 0), (1, 1), (1, 1), (0, 0)))

    s1, t1 = fold_bn(p['bn1_gamma'], p['bn1_beta'], p['bn1_mean'], p['bn1_var'])
    s2, t2 = fold_bn(p['bn2_gamma'], p['bn2_beta'], p['bn2_mean'], p['bn2_var'])
    Cmid = p['w1'].shape[3]
    Cmid2 = p['w2'].shape[3]
    Ncls = p['w_out'].shape[1]

    w1i = p['w1'].reshape(9 * Cin, Cmid).astype(jnp.bfloat16)       # im2col HWIO
    wp = collapse_conv2_weights(p['w2']).reshape(
        4, 4 * Cmid, Cmid2).astype(jnp.bfloat16)                    # per-phase K-concat
    wot = p['w_out'].T.astype(jnp.bfloat16)                         # (Ncls, Cmid2)
    bo = p['b_out'][:, None].astype(jnp.float32)                    # (Ncls, 1)

    # Fused conv stage -> (N, Ncls, 4*H*W) phase logits (lane-dense store).
    logits_flat = head_conv_stage(xp, w1i, s1, t1, wp, s2, t2, wot, bo)

    # Tiny layout fix-up (~N*Ncls*4*H*W*4 B) to the (c, a, u, b, v) block layout
    # the bilinear kernel consumes; 1/64 of the final output bytes.
    lg = logits_flat.reshape(N, Ncls, 2, 2, H, W)                   # (n,c,a,b,u,v)
    ph = jnp.transpose(lg, (0, 1, 2, 4, 3, 5)).reshape(N, Ncls * 2 * H, 2 * W)

    # Parity-concatenated bilinear matrices on the (2H, 2W) conv2 grid.
    ah_full = bilinear_matrix(2 * H, Ho)                            # (Ho, 2H)
    aw_full = bilinear_matrix(2 * W, Wo)                            # (Wo, 2W)
    ahc = jnp.concatenate([ah_full[:, 0::2], ah_full[:, 1::2]],
                          axis=1).astype(jnp.bfloat16)              # (Ho, 2H)
    awtc = jnp.concatenate([aw_full[:, 0::2].T, aw_full[:, 1::2].T],
                           axis=0).astype(jnp.bfloat16)             # (2W, Wo)

    return bilinear_phase_upsample(ph, ahc, awtc)                   # (N, Ncls, 8H, 8W)


# Pure-JAX reference (same math, XLA ops, f32 HIGHEST) used as a sanity check.
def reference_forward(x_nchw, p, up_factor=8):
    def convbnrelu(x, w, g, b, m, v):
        y = jax.lax.conv_general_dilated(
            x, w, window_strides=(1, 1), padding=((1, 1), (1, 1)),
            dimension_numbers=('NCHW', 'HWIO', 'NCHW'),
            precision=jax.lax.Precision.HIGHEST)
        s = g / jnp.sqrt(v + 1e-5)
        y = y * s[None, :, None, None] + (b - m * s)[None, :, None, None]
        return jnp.maximum(y, 0.0)

    feat = convbnrelu(x_nchw, p['w1'], p['bn1_gamma'], p['bn1_beta'],
                      p['bn1_mean'], p['bn1_var'])
    feat = jnp.repeat(jnp.repeat(feat, 2, axis=2), 2, axis=3)
    feat = convbnrelu(feat, p['w2'], p['bn2_gamma'], p['bn2_beta'],
                      p['bn2_mean'], p['bn2_var'])
    logits = jnp.einsum('nchw,ck->nkhw', feat, p['w_out'],
                        precision=jax.lax.Precision.HIGHEST)
    logits = logits + p['b_out'][None, :, None, None]
    up = up_factor // 2
    H2, W2 = logits.shape[2], logits.shape[3]
    ah = bilinear_matrix(H2, H2 * up)
    aw = bilinear_matrix(W2, W2 * up)
    return jnp.einsum('Hh,nchw,Ww->ncHW', ah, logits, aw,
                      precision=jax.lax.Precision.HIGHEST)


if __name__ == "__main__":
    key = jax.random.PRNGKey(0)
    k_x, k_p = jax.random.split(key)

    # SegmentHead(in_chan=4, mid_chan=32, n_classes=5, up_factor=8, aux=True),
    # input spatial 16x16.
    N, in_chan, H, W = 2, 4, 16, 16
    mid_chan, n_classes, up_factor = 32, 5, 8

    x = jax.random.normal(k_x, (N, in_chan, H, W), jnp.float32)
    params = init_params(k_p, in_chan, mid_chan, n_classes, up_factor)

    out = jax.block_until_ready(segment_head_forward(x, params, up_factor))
    assert out.shape == (N, n_classes, H * up_factor, W * up_factor), out.shape

    ref = reference_forward(x, params, up_factor)
    max_err = float(jnp.max(jnp.abs(out - ref)))
    # bf16 matmul operands (conv1/conv2/proj/interp) with f32 accumulation,
    # compared against an f32 HIGHEST reference.
    assert max_err < 1e-1, f"mismatch vs reference: {max_err}"

    print("KERNEL_OK")
</pallas_src>

<mosaic_0001>
module attributes {stable_mosaic.version = 11 : i64} {
  func.func @_head_conv_kernel(%arg0: i32, %arg1: memref<1x18x18x4xf32, #tpu.memory_space<vmem>>, %arg2: memref<36x32xbf16, #tpu.memory_space<vmem>>, %arg3: memref<1x32xf32, #tpu.memory_space<vmem>>, %arg4: memref<1x32xf32, #tpu.memory_space<vmem>>, %arg5: memref<4x128x64xbf16, #tpu.memory_space<vmem>>, %arg6: memref<1x64xf32, #tpu.memory_space<vmem>>, %arg7: memref<1x64xf32, #tpu.memory_space<vmem>>, %arg8: memref<5x64xbf16, #tpu.memory_space<vmem>>, %arg9: memref<5x1xf32, #tpu.memory_space<vmem>>, %arg10: memref<1x5x1024xf32, #tpu.memory_space<vmem>>, %arg11: memref<18x32x32xf32, #tpu.memory_space<vmem>>) attributes {dimension_semantics = [#tpu.dimension_semantics<parallel>], iteration_bounds = array<i64: 2>, scalar_prefetch = 0 : i64, scratch_operands = 1 : i64, tpu.core_type = #tpu.core_type<tc>, window_params = [{transform_indices = @transform_0, window_bounds = array<i64: 1, 18, 18, 4>}, {pipeline_mode = #tpu.pipeline_mode<synchronous>, transform_indices = @transform_1, window_bounds = array<i64: 36, 32>}, {pipeline_mode = #tpu.pipeline_mode<synchronous>, transform_indices = @transform_2, window_bounds = array<i64: 1, 32>}, {pipeline_mode = #tpu.pipeline_mode<synchronous>, transform_indices = @transform_3, window_bounds = array<i64: 1, 32>}, {pipeline_mode = #tpu.pipeline_mode<synchronous>, transform_indices = @transform_4, window_bounds = array<i64: 4, 128, 64>}, {pipeline_mode = #tpu.pipeline_mode<synchronous>, transform_indices = @transform_5, window_bounds = array<i64: 1, 64>}, {pipeline_mode = #tpu.pipeline_mode<synchronous>, transform_indices = @transform_6, window_bounds = array<i64: 1, 64>}, {pipeline_mode = #tpu.pipeline_mode<synchronous>, transform_indices = @transform_7, window_bounds = array<i64: 5, 64>}, {pipeline_mode = #tpu.pipeline_mode<synchronous>, transform_indices = @transform_8, window_bounds = array<i64: 5, 1>}, {transform_indices = @transform_9, window_bounds = array<i64: 1, 5, 1024>}]} {
    %c0 = arith.constant 0 : index
    %c0_0 = arith.constant 0 : index
    %c0_1 = arith.constant 0 : index
    %c0_2 = arith.constant 0 : index
    %0 = vector.load %arg1[%c0, %c0_0, %c0_1, %c0_2] : memref<1x18x18x4xf32, #tpu.memory_space<vmem>>, vector<1x18x18x4xf32>
    %1 = vector.shape_cast %0 : vector<1x18x18x4xf32> to vector<18x18x4xf32>
    %2 = vector.extract_strided_slice %1 {offsets = [0, 0, 0], sizes = [16, 16, 4], strides = [1, 1, 1]} : vector<18x18x4xf32> to vector<16x16x4xf32>
    %3 = vector.shape_cast %2 : vector<16x16x4xf32> to vector<256x4xf32>
    %4 = vector.extract_strided_slice %1 {offsets = [0, 1, 0], sizes = [16, 16, 4], strides = [1, 1, 1]} : vector<18x18x4xf32> to vector<16x16x4xf32>
    %5 = vector.shape_cast %4 : vector<16x16x4xf32> to vector<256x4xf32>
    %6 = vector.extract_strided_slice %1 {offsets = [0, 2, 0], sizes = [16, 16, 4], strides = [1, 1, 1]} : vector<18x18x4xf32> to vector<16x16x4xf32>
    %7 = vector.shape_cast %6 : vector<16x16x4xf32> to vector<256x4xf32>
    %8 = vector.extract_strided_slice %1 {offsets = [1, 0, 0], sizes = [16, 16, 4], strides = [1, 1, 1]} : vector<18x18x4xf32> to vector<16x16x4xf32>
    %9 = vector.shape_cast %8 : vector<16x16x4xf32> to vector<256x4xf32>
    %10 = vector.extract_strided_slice %1 {offsets = [1, 1, 0], sizes = [16, 16, 4], strides = [1, 1, 1]} : vector<18x18x4xf32> to vector<16x16x4xf32>
    %11 = vector.shape_cast %10 : vector<16x16x4xf32> to vector<256x4xf32>
    %12 = vector.extract_strided_slice %1 {offsets = [1, 2, 0], sizes = [16, 16, 4], strides = [1, 1, 1]} : vector<18x18x4xf32> to vector<16x16x4xf32>
    %13 = vector.shape_cast %12 : vector<16x16x4xf32> to vector<256x4xf32>
    %14 = vector.extract_strided_slice %1 {offsets = [2, 0, 0], sizes = [16, 16, 4], strides = [1, 1, 1]} : vector<18x18x4xf32> to vector<16x16x4xf32>
    %15 = vector.shape_cast %14 : vector<16x16x4xf32> to vector<256x4xf32>
    %16 = vector.extract_strided_slice %1 {offsets = [2, 1, 0], sizes = [16, 16, 4], strides = [1, 1, 1]} : vector<18x18x4xf32> to vector<16x16x4xf32>
    %17 = vector.shape_cast %16 : vector<16x16x4xf32> to vector<256x4xf32>
    %18 = vector.extract_strided_slice %1 {offsets = [2, 2, 0], sizes = [16, 16, 4], strides = [1, 1, 1]} : vector<18x18x4xf32> to vector<16x16x4xf32>
    %19 = vector.shape_cast %18 : vector<16x16x4xf32> to vector<256x4xf32>
    %20 = tpu.concatenate %3, %5, %7, %9, %11, %13, %15, %17, %19 in 1 : vector<256x4xf32>, vector<256x4xf32>, vector<256x4xf32>, vector<256x4xf32>, vector<256x4xf32>, vector<256x4xf32>, vector<256x4xf32>, vector<256x4xf32>, vector<256x4xf32> -> vector<256x36xf32>
    %21 = arith.truncf %20 : vector<256x36xf32> to vector<256x36xbf16>
    %c0_3 = arith.constant 0 : index
    %c0_4 = arith.constant 0 : index
    %22 = vector.load %arg2[%c0_3, %c0_4] : memref<36x32xbf16, #tpu.memory_space<vmem>>, vector<36x32xbf16>
    %cst = arith.constant dense<0.000000e+00> : vector<256x32xf32>
    %23 = tpu.matmul %21, %22, %cst {dimension_numbers = #tpu.dot_dimension_numbers<[1], [0], [0], [1], [0, 0, 1, 1], [], []>} : vector<256x36xbf16>, vector<36x32xbf16>, vector<256x32xf32> -> vector<256x32xf32>
    %c0_5 = arith.constant 0 : index
    %c0_6 = arith.constant 0 : index
    %24 = vector.load %arg3[%c0_5, %c0_6] : memref<1x32xf32, #tpu.memory_space<vmem>>, vector<1x32xf32>
    %25 = vector.broadcast %24 : vector<1x32xf32> to vector<256x32xf32>
    %26 = arith.mulf %23, %25 : vector<256x32xf32>
    %c0_7 = arith.constant 0 : index
    %c0_8 = arith.constant 0 : index
    %27 = vector.load %arg4[%c0_7, %c0_8] : memref<1x32xf32, #tpu.memory_space<vmem>>, vector<1x32xf32>
    %28 = vector.broadcast %27 : vector<1x32xf32> to vector<256x32xf32>
    %29 = arith.addf %26, %28 : vector<256x32xf32>
    %cst_9 = arith.constant 0.000000e+00 : f32
    %30 = vector.broadcast %cst_9 : f32 to vector<256x32xf32>
    %31 = arith.maximumf %29, %30 : vector<256x32xf32>
    %cst_10 = arith.constant 0.000000e+00 : f32
    %32 = vector.broadcast %cst_10 : f32 to vector<1x32x32xf32>
    %c0_11 = arith.constant 0 : index
    %c0_12 = arith.constant 0 : index
    %c0_13 = arith.constant 0 : index
    %33 = vector.load %arg11[%c0_11, %c0_12, %c0_13] : memref<18x32x32xf32, #tpu.memory_space<vmem>>, vector<1x32x32xf32>
    tpu.vector_store %arg11[%c0_11, %c0_12, %c0_13], %32 {strides = array<i32>} : memref<18x32x32xf32, #tpu.memory_space<vmem>>, vector<1x32x32xf32>,
    %c17 = arith.constant 17 : index
    %c0_14 = arith.constant 0 : index
    %c0_15 = arith.constant 0 : index
    %34 = vector.load %arg11[%c17, %c0_14, %c0_15] : memref<18x32x32xf32, #tpu.memory_space<vmem>>, vector<1x32x32xf32>
    tpu.vector_store %arg11[%c17, %c0_14, %c0_15], %32 {strides = array<i32>} : memref<18x32x32xf32, #tpu.memory_space<vmem>>, vector<1x32x32xf32>,
    %cst_16 = arith.constant 0.000000e+00 : f32
    %35 = vector.broadcast %cst_16 : f32 to vector<16x1x32xf32>
    %c1 = arith.constant 1 : index
    %c7 = arith.constant 7 : index
    %c0_17 = arith.constant 0 : index
    %36 = vector.load %arg11[%c1, %c7, %c0_17] : memref<18x32x32xf32, #tpu.memory_space<vmem>>, vector<16x1x32xf32>
    tpu.vector_store %arg11[%c1, %c7, %c0_17], %35 {strides = array<i32>} : memref<18x32x32xf32, #tpu.memory_space<vmem>>, vector<16x1x32xf32>,
    %c1_18 = arith.constant 1 : index
    %c24 = arith.constant 24 : index
    %c0_19 = arith.constant 0 : index
    %37 = vector.load %arg11[%c1_18, %c24, %c0_19] : memref<18x32x32xf32, #tpu.memory_space<vmem>>, vector<16x1x32xf32>
    tpu.vector_store %arg11[%c1_18, %c24, %c0_19], %35 {strides = array<i32>} : memref<18x32x32xf32, #tpu.memory_space<vmem>>, vector<16x1x32xf32>,
    %38 = vector.shape_cast %31 : vector<256x32xf32> to vector<16x16x32xf32>
    %c1_20 = arith.constant 1 : index
    %c8 = arith.constant 8 : index
    %c0_21 = arith.constant 0 : index
    %39 = vector.load %arg11[%c1_20, %c8, %c0_21] : memref<18x32x32xf32, #tpu.memory_space<vmem>>, vector<16x16x32xf32>
    tpu.vector_store %arg11[%c1_20, %c8, %c0_21], %38 {strides = array<i32>} : memref<18x32x32xf32, #tpu.memory_space<vmem>>, vector<16x16x32xf32>,
    %c0_22 = arith.constant 0 : index
    %c0_23 = arith.constant 0 : index
    %c0_24 = arith.constant 0 : index
    %40 = vector.load %arg11[%c0_22, %c0_23, %c0_24] : memref<18x32x32xf32, #tpu.memory_space<vmem>>, vector<18x32x32xf32>
    %41 = vector.extract_strided_slice %40 {offsets = [0, 7, 0], sizes = [16, 16, 32], strides = [1, 1, 1]} : vector<18x32x32xf32> to vector<16x16x32xf32>
    %42 = vector.shape_cast %41 : vector<16x16x32xf32> to vector<256x32xf32>
    %43 = vector.extract_strided_slice %40 {offsets = [0, 8, 0], sizes = [16, 16, 32], strides = [1, 1, 1]} : vector<18x32x32xf32> to vector<16x16x32xf32>
    %44 = vector.shape_cast %43 : vector<16x16x32xf32> to vector<256x32xf32>
    %45 = vector.extract_strided_slice %40 {offsets = [0, 9, 0], sizes = [16, 16, 32], strides = [1, 1, 1]} : vector<18x32x32xf32> to vector<16x16x32xf32>
    %46 = vector.shape_cast %45 : vector<16x16x32xf32> to vector<256x32xf32>
    %47 = vector.extract_strided_slice %40 {offsets = [1, 7, 0], sizes = [16, 16, 32], strides = [1, 1, 1]} : vector<18x32x32xf32> to vector<16x16x32xf32>
    %48 = vector.shape_cast %47 : vector<16x16x32xf32> to vector<256x32xf32>
    %49 = vector.extract_strided_slice %40 {offsets = [1, 8, 0], sizes = [16, 16, 32], strides = [1, 1, 1]} : vector<18x32x32xf32> to vector<16x16x32xf32>
    %50 = vector.shape_cast %49 : vector<16x16x32xf32> to vector<256x32xf32>
    %51 = vector.extract_strided_slice %40 {offsets = [1, 9, 0], sizes = [16, 16, 32], strides = [1, 1, 1]} : vector<18x32x32xf32> to vector<16x16x32xf32>
    %52 = vector.shape_cast %51 : vector<16x16x32xf32> to vector<256x32xf32>
    %53 = vector.extract_strided_slice %40 {offsets = [2, 7, 0], sizes = [16, 16, 32], strides = [1, 1, 1]} : vector<18x32x32xf32> to vector<16x16x32xf32>
    %54 = vector.shape_cast %53 : vector<16x16x32xf32> to vector<256x32xf32>
    %55 = vector.extract_strided_slice %40 {offsets = [2, 8, 0], sizes = [16, 16, 32], strides = [1, 1, 1]} : vector<18x32x32xf32> to vector<16x16x32xf32>
    %56 = vector.shape_cast %55 : vector<16x16x32xf32> to vector<256x32xf32>
    %57 = vector.extract_strided_slice %40 {offsets = [2, 9, 0], sizes = [16, 16, 32], strides = [1, 1, 1]} : vector<18x32x32xf32> to vector<16x16x32xf32>
    %58 = vector.shape_cast %57 : vector<16x16x32xf32> to vector<256x32xf32>
    %c0_25 = arith.constant 0 : index
    %c0_26 = arith.constant 0 : index
    %59 = vector.load %arg6[%c0_25, %c0_26] : memref<1x64xf32, #tpu.memory_space<vmem>>, vector<1x64xf32>
    %c0_27 = arith.constant 0 : index
    %c0_28 = arith.constant 0 : index
    %60 = vector.load %arg7[%c0_27, %c0_28] : memref<1x64xf32, #tpu.memory_space<vmem>>, vector<1x64xf32>
    %61 = tpu.concatenate %42, %44, %48, %50 in 1 : vector<256x32xf32>, vector<256x32xf32>, vector<256x32xf32>, vector<256x32xf32> -> vector<256x128xf32>
    %62 = arith.truncf %61 : vector<256x128xf32> to vector<256x128xbf16>
    %c0_29 = arith.constant 0 : index
    %c0_30 = arith.constant 0 : index
    %c0_31 = arith.constant 0 : index
    %63 = vector.load %arg5[%c0_29, %c0_30, %c0_31] : memref<4x128x64xbf16, #tpu.memory_space<vmem>>, vector<1x128x64xbf16>
    %64 = vector.shape_cast %63 : vector<1x128x64xbf16> to vector<128x64xbf16>
    %cst_32 = arith.constant dense<0.000000e+00> : vector<256x64xf32>
    %65 = tpu.matmul %62, %64, %cst_32 {dimension_numbers = #tpu.dot_dimension_numbers<[1], [0], [0], [1], [0, 0, 1, 1], [], []>} : vector<256x128xbf16>, vector<128x64xbf16>, vector<256x64xf32> -> vector<256x64xf32>
    %66 = vector.broadcast %59 : vector<1x64xf32> to vector<256x64xf32>
    %67 = arith.mulf %65, %66 : vector<256x64xf32>
    %68 = vector.broadcast %60 : vector<1x64xf32> to vector<256x64xf32>
    %69 = arith.addf %67, %68 : vector<256x64xf32>
    %cst_33 = arith.constant 0.000000e+00 : f32
    %70 = vector.broadcast %cst_33 : f32 to vector<256x64xf32>
    %71 = arith.maximumf %69, %70 : vector<256x64xf32>
    %72 = tpu.concatenate %44, %46, %50, %52 in 1 : vector<256x32xf32>, vector<256x32xf32>, vector<256x32xf32>, vector<256x32xf32> -> vector<256x128xf32>
    %73 = arith.truncf %72 : vector<256x128xf32> to vector<256x128xbf16>
    %c1_34 = arith.constant 1 : index
    %c0_35 = arith.constant 0 : index
    %c0_36 = arith.constant 0 : index
    %74 = vector.load %arg5[%c1_34, %c0_35, %c0_36] : memref<4x128x64xbf16, #tpu.memory_space<vmem>>, vector<1x128x64xbf16>
    %75 = vector.shape_cast %74 : vector<1x128x64xbf16> to vector<128x64xbf16>
    %cst_37 = arith.constant dense<0.000000e+00> : vector<256x64xf32>
    %76 = tpu.matmul %73, %75, %cst_37 {dimension_numbers = #tpu.dot_dimension_numbers<[1], [0], [0], [1], [0, 0, 1, 1], [], []>} : vector<256x128xbf16>, vector<128x64xbf16>, vector<256x64xf32> -> vector<256x64xf32>
    %77 = vector.broadcast %59 : vector<1x64xf32> to vector<256x64xf32>
    %78 = arith.mulf %76, %77 : vector<256x64xf32>
    %79 = vector.broadcast %60 : vector<1x64xf32> to vector<256x64xf32>
    %80 = arith.addf %78, %79 : vector<256x64xf32>
    %cst_38 = arith.constant 0.000000e+00 : f32
    %81 = vector.broadcast %cst_38 : f32 to vector<256x64xf32>
    %82 = arith.maximumf %80, %81 : vector<256x64xf32>
    %83 = tpu.concatenate %48, %50, %54, %56 in 1 : vector<256x32xf32>, vector<256x32xf32>, vector<256x32xf32>, vector<256x32xf32> -> vector<256x128xf32>
    %84 = arith.truncf %83 : vector<256x128xf32> to vector<256x128xbf16>
    %c2 = arith.constant 2 : index
    %c0_39 = arith.constant 0 : index
    %c0_40 = arith.constant 0 : index
    %85 = vector.load %arg5[%c2, %c0_39, %c0_40] : memref<4x128x64xbf16, #tpu.memory_space<vmem>>, vector<1x128x64xbf16>
    %86 = vector.shape_cast %85 : vector<1x128x64xbf16> to vector<128x64xbf16>
    %cst_41 = arith.constant dense<0.000000e+00> : vector<256x64xf32>
    %87 = tpu.matmul %84, %86, %cst_41 {dimension_numbers = #tpu.dot_dimension_numbers<[1], [0], [0], [1], [0, 0, 1, 1], [], []>} : vector<256x128xbf16>, vector<128x64xbf16>, vector<256x64xf32> -> vector<256x64xf32>
    %88 = vector.broadcast %59 : vector<1x64xf32> to vector<256x64xf32>
    %89 = arith.mulf %87, %88 : vector<256x64xf32>
    %90 = vector.broadcast %60 : vector<1x64xf32> to vector<256x64xf32>
    %91 = arith.addf %89, %90 : vector<256x64xf32>
    %cst_42 = arith.constant 0.000000e+00 : f32
    %92 = vector.broadcast %cst_42 : f32 to vector<256x64xf32>
    %93 = arith.maximumf %91, %92 : vector<256x64xf32>
    %94 = tpu.concatenate %50, %52, %56, %58 in 1 : vector<256x32xf32>, vector<256x32xf32>, vector<256x32xf32>, vector<256x32xf32> -> vector<256x128xf32>
    %95 = arith.truncf %94 : vector<256x128xf32> to vector<256x128xbf16>
    %c3 = arith.constant 3 : index
    %c0_43 = arith.constant 0 : index
    %c0_44 = arith.constant 0 : index
    %96 = vector.load %arg5[%c3, %c0_43, %c0_44] : memref<4x128x64xbf16, #tpu.memory_space<vmem>>, vector<1x128x64xbf16>
    %97 = vector.shape_cast %96 : vector<1x128x64xbf16> to vector<128x64xbf16>
    %cst_45 = arith.constant dense<0.000000e+00> : vector<256x64xf32>
    %98 = tpu.matmul %95, %97, %cst_45 {dimension_numbers = #tpu.dot_dimension_numbers<[1], [0], [0], [1], [0, 0, 1, 1], [], []>} : vector<256x128xbf16>, vector<128x64xbf16>, vector<256x64xf32> -> vector<256x64xf32>
    %99 = vector.broadcast %59 : vector<1x64xf32> to vector<256x64xf32>
    %100 = arith.mulf %98, %99 : vector<256x64xf32>
    %101 = vector.broadcast %60 : vector<1x64xf32> to vector<256x64xf32>
    %102 = arith.addf %100, %101 : vector<256x64xf32>
    %cst_46 = arith.constant 0.000000e+00 : f32
    %103 = vector.broadcast %cst_46 : f32 to vector<256x64xf32>
    %104 = arith.maximumf %102, %103 : vector<256x64xf32>
    %105 = tpu.concatenate %71, %82, %93, %104 in 0 : vector<256x64xf32>, vector<256x64xf32>, vector<256x64xf32>, vector<256x64xf32> -> vector<1024x64xf32>
    %106 = tpu.transpose %105, [1, 0] : vector<1024x64xf32> -> vector<64x1024xf32>
    %107 = arith.truncf %106 : vector<64x1024xf32> to vector<64x1024xbf16>
    %c0_47 = arith.constant 0 : index
    %c0_48 = arith.constant 0 : index
    %108 = vector.load %arg8[%c0_47, %c0_48] : memref<5x64xbf16, #tpu.memory_space<vmem>>, vector<5x64xbf16>
    %cst_49 = arith.constant dense<0.000000e+00> : vector<5x1024xf32>
    %109 = tpu.matmul %108, %107, %cst_49 {dimension_numbers = #tpu.dot_dimension_numbers<[1], [0], [0], [1], [0, 0, 1, 1], [], []>} : vector<5x64xbf16>, vector<64x1024xbf16>, vector<5x1024xf32> -> vector<5x1024xf32>
    %c0_50 = arith.constant 0 : index
    %c0_51 = arith.constant 0 : index
    %110 = vector.load %arg9[%c0_50, %c0_51] : memref<5x1xf32, #tpu.memory_space<vmem>>, vector<5x1xf32>
    %111 = vector.broadcast %110 : vector<5x1xf32> to vector<5x1024xf32>
    %112 = arith.addf %109, %111 : vector<5x1024xf32>
    %c0_52 = arith.constant 0 : index
    %c0_53 = arith.constant 0 : index
    %c0_54 = arith.constant 0 : index
    %113 = vector.load %arg10[%c0_52, %c0_53, %c0_54] : memref<1x5x1024xf32, #tpu.memory_space<vmem>>, vector<1x5x1024xf32>
    %114 = vector.shape_cast %113 : vector<1x5x1024xf32> to vector<5x1024xf32>
    %115 = vector.shape_cast %112 : vector<5x1024xf32> to vector<1x5x1024xf32>
    tpu.vector_store %arg10[%c0_52, %c0_53, %c0_54], %115 {strides = array<i32>} : memref<1x5x1024xf32, #tpu.memory_space<vmem>>, vector<1x5x1024xf32>,
    return
  }
  func.func @transform_0(%arg0: i32) -> (i32, i32, i32, i32) {
    %c0_i32 = arith.constant 0 : i32
    %c0_i32_0 = arith.constant 0 : i32
    %c0_i32_1 = arith.constant 0 : i32
    %c0_i32_2 = arith.constant 0 : i32
    return %arg0, %c0_i32, %c0_i32_0, %c0_i32_1 : i32, i32, i32, i32
  }
  func.func @transform_1(%arg0: i32) -> (i32, i32) {
    %c0_i32 = arith.constant 0 : i32
    %c0_i32_0 = arith.constant 0 : i32
    %c0_i32_1 = arith.constant 0 : i32
    return %c0_i32, %c0_i32_0 : i32, i32
  }
  func.func @transform_2(%arg0: i32) -> (i32, i32) {
    %c0_i32 = arith.constant 0 : i32
    %c0_i32_0 = arith.constant 0 : i32
    %c0_i32_1 = arith.constant 0 : i32
    return %c0_i32, %c0_i32_0 : i32, i32
  }
  func.func @transform_3(%arg0: i32) -> (i32, i32) {
    %c0_i32 = arith.constant 0 : i32
    %c0_i32_0 = arith.constant 0 : i32
    %c0_i32_1 = arith.constant 0 : i32
    return %c0_i32, %c0_i32_0 : i32, i32
  }
  func.func @transform_4(%arg0: i32) -> (i32, i32, i32) {
    %c0_i32 = arith.constant 0 : i32
    %c0_i32_0 = arith.constant 0 : i32
    %c0_i32_1 = arith.constant 0 : i32
    %c0_i32_2 = arith.constant 0 : i32
    return %c0_i32, %c0_i32_0, %c0_i32_1 : i32, i32, i32
  }
  func.func @transform_5(%arg0: i32) -> (i32, i32) {
    %c0_i32 = arith.constant 0 : i32
    %c0_i32_0 = arith.constant 0 : i32
    %c0_i32_1 = arith.constant 0 : i32
    return %c0_i32, %c0_i32_0 : i32, i32
  }
  func.func @transform_6(%arg0: i32) -> (i32, i32) {
    %c0_i32 = arith.constant 0 : i32
    %c0_i32_0 = arith.constant 0 : i32
    %c0_i32_1 = arith.constant 0 : i32
    return %c0_i32, %c0_i32_0 : i32, i32
  }
  func.func @transform_7(%arg0: i32) -> (i32, i32) {
    %c0_i32 = arith.constant 0 : i32
    %c0_i32_0 = arith.constant 0 : i32
    %c0_i32_1 = arith.constant 0 : i32
    return %c0_i32, %c0_i32_0 : i32, i32
  }
  func.func @transform_8(%arg0: i32) -> (i32, i32) {
    %c0_i32 = arith.constant 0 : i32
    %c0_i32_0 = arith.constant 0 : i32
    %c0_i32_1 = arith.constant 0 : i32
    return %c0_i32, %c0_i32_0 : i32, i32
  }
  func.func @transform_9(%arg0: i32) -> (i32, i32, i32) {
    %c0_i32 = arith.constant 0 : i32
    %c0_i32_0 = arith.constant 0 : i32
    %c0_i32_1 = arith.constant 0 : i32
    return %arg0, %c0_i32, %c0_i32_0 : i32, i32, i32
  }
}

</mosaic_0001>

<bundles_post_ra>
// kernel: tpu_custom_call.1
= control target key start
LH: loop header
LB: loop body
LE: loop exit
PB: predicated region body
PF: predicated region fallthrough
CT: control target
= control target key end

     0   :  { %s7217_s30 = smov 0   ;;  %s10199_s0 = inlined_call_operand.vmem [shape: f32[2,18,18,4], index: 0, kind: input, shape index: {}]   ;;  %s10200_s1 = inlined_call_operand.vmem [shape: bf16[36,32], index: 1, kind: input, shape index: {}]   ;;  %s10201_s2 = inlined_call_operand.vmem [shape: f32[1,32], index: 2, kind: input, shape index: {}]   ;;  %s10202_s3 = inlined_call_operand.vmem [shape: f32[1,32], index: 3, kind: input, shape index: {}]   ;;  %s10203_s4 = inlined_call_operand.vmem [shape: bf16[4,128,64], index: 4, kind: input, shape index: {}]   ;;  %s10204_s5 = inlined_call_operand.vmem [shape: f32[1,64], index: 5, kind: input, shape index: {}]   ;;  %s10205_s6 = inlined_call_operand.vmem [shape: f32[1,64], index: 6, kind: input, shape index: {}]   ;;  %s10206_s7 = inlined_call_operand.vmem [shape: bf16[5,64], index: 7, kind: input, shape index: {}]   ;;  %s10207_s8 = inlined_call_operand.vmem [shape: f32[5,1], index: 8, kind: input, shape index: {}]   ;;  %s10208_s9 = inlined_call_operand.vmem [shape: f32[2,5,1024], index: 9, kind: output, shape index: {}]  }
   0x1 LB: > { %s5128_s10 = sadd.s32 4294967295, %s7153_s30   ;;  %p5132_p0 = scmp.ge.s32.totalorder %s7153_s30, 1  ;;  %s7153_s30 = sphi %s7217_s30, %s19_s30  }
   0x2   : > { %p287_p1 = scmp.lt.s32.totalorder %s7153_s30, 3 }
   0x4   : > { %p288_p2 = pnand %p5132_p0, %p287_p1 }
   0x6   : > { %291 = sbr.rel (%p288_p2) target bundleno = 1458 (0x5b2), region = 56 }
   0xd   : > { %p323_p3 = scmp.lt.s32.totalorder %s5128_s10, 1  ;;  %vm436_vm0 = vcmask 1046528   ;;  %s7155_s15 = smov 4   ;;  %vm517_vm1 = vcmask 1045504   ;;  %vm1741_vm2 = vcmask 1041408   ;;  %vm1392_vm3 = vcmask 31744  }
   0xe   : > { %s7156_s16 = smov 8   ;;  %s7157_s17 = smov 12   ;;  %vm1425_vm4 = vcmask 64512   ;;  %vm1458_vm5 = vcmask 97280   ;;  %vm1491_vm6 = vcmask 130048   ;;  %vm1524_vm7 = vcmask 162816  }
   0xf   : > { %s10364_s10 = smov (!%p323_p3, %s5128_s10), 1  ;;  %s7158_s18 = smov 16   ;;  %vm1557_vm8 = vcmask 195584   ;;  %vm1590_vm9 = vcmask 228352   ;;  %vm1623_vm10 = vcmask 261120   ;;  %vm1692_vm11 = vcmask 293888  }
  0x10   : > { %s5592_s11 = smul.u32 432, %s10364_s10  ;;  %s7159_s21 = smov 20   ;;  %vm2026_vm12 = vcmask 253952   ;;  %vm2211_vm13 = vcmask 1040384   ;;  %vm2772_vm14 = vcmask 523264   ;;  %vm2805_vm15 = vcmask 785408  }
  0x11   : > { %s7160_s24 = smov 24   ;;  %s7161_s27 = smov 28  }
  0x12   : > { %s7231_s14 = scalar_lea.vmem %s10199_s0, %s5592_s11  ;;  %s7162_s28 = smov 32  }
  0x13   : > { %v7234_v0 = vld [vmem:[%s7231_s14 + $0x30] sm:$0xff]  ;;  %v7237_v1 = vld [vmem:[%s7231_s14 + $0x38] sm:$0xff]  ;;  %v7240_v2 = vld [vmem:[%s7231_s14 + $0x40] sm:$0x3]  ;;  %s7165_s23 = smov 96   ;;  %s5245_s22 = sshll.u32 %s10364_s10, 6 }
  0x14   : > { %v447_v3 = vrot.slane %v7234_v0, 1  ;;  %v448_v4 = vrot.slane %v7237_v1, 1  ;;  %v450_v5 = vrot.slane %v7240_v2, 1  ;;  %v7246_v6 = vld [vmem:[%s7231_s14] sm:$0xff]  ;;  %v7249_v7 = vld [vmem:[%s7231_s14 + $0x8] sm:$0xff]  ;;  %v7260_v12 = vld [vmem:[%s7231_s14 + $0x50] sm:$0xff]  ;;  %s10186_s26 = scalar_lea.vmem %s10208_s9, %s5245_s22 }
  0x15   : > { %v7252_v8 = vld [vmem:[%s7231_s14 + $0x10] sm:$0x3]  ;;  %v437_v9 = vrot.slane %v7246_v6, 1  ;;  %v438_v10 = vrot.slane %v7249_v7, 1  ;;  %v7257_v11 = vld [vmem:[%s7231_s14 + $0x48] sm:$0xff]  ;;  %v7269_v17 = vld [vmem:[%s7231_s14 + $0x18] sm:$0xff] }
  0x16   : > { %v449_v13 = vsel %vm436_vm0, %v447_v3, %v448_v4  ;;  %v451_v14 = vsel %vm436_vm0, %v448_v4, %v450_v5  ;;  %v440_v15 = vrot.slane %v7252_v8, 1  ;;  %v7266_v16 = vld [vmem:[%s7231_s14 + $0x58] sm:$0x3]  ;;  %v7272_v18 = vld [vmem:[%s7231_s14 + $0x20] sm:$0xff]  ;;  %v452_v21 = vrot.slane %v7257_v11, 1  ;;  %v7304_v36 = vld [vmem:[%s7231_s14 + $0x68] sm:$0xff] }
  0x17   : > { %v7274_v19 = vpack.i.bf16 %v451_v14, %v449_v13  ;;  %v439_v20 = vsel %vm436_vm0, %v437_v9, %v438_v10  ;;  %v453_v22 = vrot.slane %v7260_v12, 1  ;;  %v7280_v23 = vld [vmem:[%s7231_s14 + $0x28] sm:$0x3]  ;;  %v7283_v24 = vld [vmem:[%s7231_s14 + $0x78] sm:$0xff]  ;;  %v7286_v25 = vld [vmem:[%s7231_s14 + $0x80] sm:$0xff]  ;;  %v455_v27 = vrot.slane %v7266_v16, 1 }
  0x18   : > { %v441_v26 = vsel %vm436_vm0, %v438_v10, %v440_v15  ;;  %v442_v28 = vrot.slane %v7269_v17, 1  ;;  %v443_v29 = vrot.slane %v7272_v18, 1  ;;  %v7293_v30 = vld [vmem:[%s7231_s14 + $0x88] sm:$0x3]  ;;  %v7296_v31 = vld [vmem:[%s7231_s14 + $0x60] sm:$0xff]  ;;  %v445_v34 = vrot.slane %v7280_v23, 1 }
  0x19   : > { %10261 = vst [vmem:[#allocation3_spill] sm:$0xff] %v7274_v19  ;;  %5624 = vrot.lane.b32.xlu1 %v7274_v19, %s7155_s15  ;;  %v5613_v32 = vpack.i.bf16 %v441_v26, %v439_v20  ;;  %v454_v33 = vsel %vm436_vm0, %v452_v21, %v453_v22  ;;  %v462_v35 = vrot.slane %v7283_v24, 1  ;;  %v7307_v37 = vld [vmem:[%s7231_s14 + $0x70] sm:$0x3]  ;;  %v456_v38 = vsel %vm436_vm0, %v453_v22, %v455_v27  ;;  %v7314_v42 = vld [vmem:[%s7231_s14 + $0xa8] sm:$0xff]  ;;  %v7332_v50 = vld [vmem:[%s7231_s14 + $0x98] sm:$0xff] }
  0x1a   : > { %v444_v39 = vsel %vm436_vm0, %v442_v28, %v443_v29  ;;  %v463_v40 = vrot.slane %v7286_v25, 1  ;;  %v465_v41 = vrot.slane %v7293_v30, 1  ;;  %v7317_v43 = vld [vmem:[%s7231_s14 + $0xb0] sm:$0xff]  ;;  %v7320_v44 = vpack.i.bf16 %v456_v38, %v454_v33  ;;  %v7326_v48 = vld [vmem:[%s7231_s14 + $0xb8] sm:$0x3]  ;;  %v7353_v61 = vld [vmem:[%s7231_s14 + $0xe0] sm:$0xff] }
  0x1b   : > { %5614 = vrot.lane.b32.xlu0 %v5613_v32, %s7155_s15  ;;  %v446_v45 = vsel %vm436_vm0, %v443_v29, %v445_v34  ;;  %v457_v46 = vrot.slane %v7296_v31, 1  ;;  %v458_v47 = vrot.slane %v7304_v36, 1  ;;  %v7329_v49 = vld [vmem:[%s7231_s14 + $0x90] sm:$0xff]  ;;  %v460_v54 = vrot.slane %v7307_v37, 1  ;;  %v7340_v55 = vld [vmem:[%s7231_s14 + $0xa0] sm:$0x3] }
  0x1c   : > { %10262 = vst [vmem:[#allocation4_spill] sm:$0xff] %v7320_v44  ;;  %v7334_v51 = vpack.i.bf16 %v446_v45, %v444_v39  ;;  %v464_v52 = vsel %vm436_vm0, %v462_v35, %v463_v40  ;;  %v466_v53 = vsel %vm436_vm0, %v463_v40, %v465_v41  ;;  %v7343_v56 = vld [vmem:[%s7231_s14 + $0xd8] sm:$0xff]  ;;  %v472_v59 = vrot.slane %v7314_v42, 1  ;;  %v7356_v62 = vld [vmem:[%s7231_s14 + $0xe8] sm:$0x3]  ;;  %v7363_v9 = vld [vmem:[%s7231_s14 + $0xc0] sm:$0xff] }
  0x1d   : > { %5629 = vrot.lane.b32.xlu1 %v7320_v44, %s7155_s15  ;;  %v7347_v57 = vpack.i.bf16 %v466_v53, %v464_v52  ;;  %v459_v58 = vsel %vm436_vm0, %v457_v46, %v458_v47  ;;  %v473_v60 = vrot.slane %v7317_v43, 1  ;;  %v461_v63 = vsel %vm436_vm0, %v458_v47, %v460_v54  ;;  %v7366_v10 = vld [vmem:[%s7231_s14 + $0xc8] sm:$0xff]  ;;  %v7376_v21 = vld [vmem:[%s7231_s14 + $0xd0] sm:$0x3]  ;;  %v7396_v39 = vld [vmem:[%s7231_s14 + $0x118] sm:$0x3] }
  0x1e   : > { %10263 = vst [vmem:[#allocation5_spill] sm:$0xff] %v7334_v51  ;;  %v475_v3 = vrot.slane %v7326_v48, 1  ;;  %v467_v4 = vrot.slane %v7329_v49, 1  ;;  %v468_v5 = vrot.slane %v7332_v50, 1  ;;  %v7370_v13 = vpack.i.bf16 %v461_v63, %v459_v58  ;;  %v7383_v29 = vld [vmem:[%s7231_s14 + $0x108] sm:$0xff]  ;;  %v7386_v32 = vld [vmem:[%s7231_s14 + $0x110] sm:$0xff] }
  0x1f   : > { %10264 = vst [vmem:[#allocation6_spill] sm:$0xff] %v7347_v57  ;;  %5619 = vrot.lane.b32.xlu0 %v7334_v51, %s7155_s15  ;;  %v474_v14 = vsel %vm436_vm0, %v472_v59, %v473_v60  ;;  %v470_v15 = vrot.slane %v7340_v55, 1  ;;  %v482_v20 = vrot.slane %v7343_v56, 1  ;;  %v483_v27 = vrot.slane %v7353_v61, 1  ;;  %v7399_v40 = vld [vmem:[%s7231_s14 + $0xf0] sm:$0xff]  ;;  %v7402_v41 = vld [vmem:[%s7231_s14 + $0xf8] sm:$0xff] }
  0x20   : > { %10265 = vst [vmem:[#allocation7_spill] sm:$0xff] %v7370_v13  ;;  %v476_v22 = vsel %vm436_vm0, %v473_v60, %v475_v3  ;;  %v469_v26 = vsel %vm436_vm0, %v467_v4, %v468_v5  ;;  %v485_v28 = vrot.slane %v7356_v62, 1  ;;  %v477_v35 = vrot.slane %v7363_v9, 1  ;;  %v7409_v53 = vld [vmem:[%s7231_s14 + $0x100] sm:$0x3]  ;;  %v7412_v54 = vld [vmem:[%s7231_s14 + $0x138] sm:$0xff] }
  0x21   : > { %5639 = vrot.lane.b32.xlu1 %v7347_v57, %s7155_s15  ;;  %v7390_v33 = vpack.i.bf16 %v476_v22, %v474_v14  ;;  %v471_v34 = vsel %vm436_vm0, %v468_v5, %v470_v15  ;;  %v478_v38 = vrot.slane %v7366_v10, 1  ;;  %v484_v46 = vsel %vm436_vm0, %v482_v20, %v483_v27  ;;  %v7422_v3 = vld [vmem:[%s7231_s14 + $0x140] sm:$0xff]  ;;  %v7425_v4 = vld [vmem:[%s7231_s14 + $0x148] sm:$0x3]  ;;  %v7453_v45 = vld [vmem:[%s7231_s14 + $0x178] sm:$0x3] }
  0x22   : > { %v486_v47 = vsel %vm436_vm0, %v483_v27, %v485_v28  ;;  %v480_v52 = vrot.slane %v7376_v21, 1  ;;  %v7416_v58 = vpack.i.bf16 %v471_v34, %v469_v26  ;;  %v492_v60 = vrot.slane %v7383_v29, 1  ;;  %10268 = vst [vmem:[#allocation10_spill] sm:$0xff] %v7422_v3  ;;  %10269 = vst [vmem:[#allocation11_spill] sm:$0xff] %v7425_v4  ;;  %v7428_v5 = vld [vmem:[%s7231_s14 + $0x120] sm:$0xff]  ;;  %v7435_v26 = vld [vmem:[%s7231_s14 + $0x128] sm:$0xff] }
  0x23   : > { %10266 = vst [vmem:[#allocation8_spill] sm:$0xff] %v7390_v33  ;;  %5634 = vrot.lane.b32.xlu0 %v7370_v13, %s7155_s15  ;;  %v479_v59 = vsel %vm436_vm0, %v477_v35, %v478_v38  ;;  %v493_v63 = vrot.slane %v7386_v32, 1  ;;  %10270 = vst [vmem:[#allocation12_spill] sm:$0xff] %v7428_v5  ;;  %v495_v15 = vrot.slane %v7396_v39, 1  ;;  %v487_v20 = vrot.slane %v7399_v40, 1  ;;  %v7468_v19 = vld [vmem:[%s7231_s14 + $0x158] sm:$0xff] }
  0x24   : > { %10267 = vst [vmem:[#allocation9_spill] sm:$0xff] %v7416_v58  ;;  %v481_v14 = vsel %vm436_vm0, %v478_v38, %v480_v52  ;;  %v488_v22 = vrot.slane %v7402_v41, 1  ;;  %v7438_v27 = vld [vmem:[%s7231_s14 + $0x130] sm:$0x3]  ;;  %v7442_v28 = vpack.i.bf16 %v486_v47, %v484_v46  ;;  %v490_v34 = vrot.slane %v7409_v53, 1  ;;  %v7447_v38 = vld [vmem:[%s7231_s14 + $0x168] sm:$0xff] }
  0x25   : > { %5649 = vrot.lane.b32.xlu1 %v7390_v33, %s7155_s15  ;;  %v502_v35 = vrot.slane %v7412_v54, 1  ;;  %v7450_v52 = vld [vmem:[%s7231_s14 + $0x170] sm:$0xff]  ;;  %10272 = vst [vmem:[#allocation14_spill] sm:$0xff] %v7453_v45  ;;  %v494_v57 = vsel %vm436_vm0, %v492_v60, %v493_v63  ;;  %v496_v44 = vsel %vm436_vm0, %v493_v63, %v495_v15  ;;  %v503_v13 = vrot.slane %v7422_v3, 1  ;;  %10274 = vst [vmem:[#allocation16_spill] sm:$0xff] %v7468_v19 }
  0x26   : > { %10271 = vst [vmem:[#allocation13_spill] sm:$0xff] %v7442_v28  ;;  %v505_v46 = vrot.slane %v7425_v4, 1  ;;  %v7460_v47 = vld [vmem:[%s7231_s14 + $0x150] sm:$0xff]  ;;  %v7464_v33 = vpack.i.bf16 %v481_v14, %v479_v59  ;;  %v497_v51 = vrot.slane %v7428_v5, 1  ;;  %v489_v60 = vsel %vm436_vm0, %v487_v20, %v488_v22  ;;  %v7480_v14 = vld [vmem:[%s7231_s14 + $0x160] sm:$0x3] }
  0x27   : > { %5644 = vrot.lane.b32.xlu0 %v7416_v58, %s7155_s15  ;;  %v491_v63 = vsel %vm436_vm0, %v488_v22, %v490_v34  ;;  %v498_v15 = vrot.slane %v7435_v26, 1  ;;  %v500_v4 = vrot.slane %v7438_v27, 1  ;;  %v7476_v3 = vpack.i.bf16 %v496_v44, %v494_v57 }
  0x28   : > { %10273 = vst [vmem:[#allocation15_spill] sm:$0xff] %v7464_v33  ;;  %v504_v59 = vsel %vm436_vm0, %v502_v35, %v503_v13  ;;  %v506_v58 = vsel %vm436_vm0, %v503_v13, %v505_v46  ;;  %v512_v5 = vrot.slane %v7447_v38, 1  ;;  %v513_v20 = vrot.slane %v7450_v52, 1 }
  0x29   : > { %5659 = vrot.lane.b32.xlu1 %v7442_v28, %s7155_s15  ;;  %10275 = vst [vmem:[#allocation17_spill] sm:$0xff] %v7476_v3  ;;  %v515_v22 = vrot.slane %v7453_v45, 1  ;;  %v7488_v34 = vpack.i.bf16 %v491_v63, %v489_v60  ;;  %v507_v44 = vrot.slane %v7460_v47, 1  ;;  %v508_v57 = vrot.slane %v7468_v19, 1 }
  0x2a   : > { %v499_v35 = vsel %vm436_vm0, %v497_v51, %v498_v15  ;;  %v501_v28 = vsel %vm436_vm0, %v498_v15, %v500_v4  ;;  %v510_v13 = vrot.slane %v7480_v14, 1  ;;  %v523_v46 = vrot.slane %v7269_v17, 2 }
  0x2b   : > { %5654 = vrot.lane.b32.xlu0 %v7464_v33, %s7155_s15  ;;  %v7498_v45 = vpack.i.bf16 %v506_v58, %v504_v59  ;;  %v524_v60 = vrot.slane %v7272_v18, 2  ;;  %v526_v63 = vrot.slane %v7280_v23, 2  ;;  %v514_v33 = vsel %vm436_vm0, %v512_v5, %v513_v20 }
  0x2c   : > { %v516_v19 = vsel %vm436_vm0, %v513_v20, %v515_v22  ;;  %v518_v51 = vrot.slane %v7246_v6, 2  ;;  %v519_v4 = vrot.slane %v7249_v7, 2  ;;  %v7508_v15 = vpack.i.bf16 %v501_v28, %v499_v35 }
  0x2d   : > { %5669 = vrot.lane.b32.xlu1 %v7476_v3, %s7155_s15  ;;  %10276 = vst [vmem:[#allocation18_spill] sm:$0xff] %v7498_v45  ;;  %v533_v58 = vrot.slane %v7257_v11, 2  ;;  %v534_v59 = vrot.slane %v7260_v12, 2  ;;  %v509_v3 = vsel %vm436_vm0, %v507_v44, %v508_v57  ;;  %v511_v23 = vsel %vm436_vm0, %v508_v57, %v510_v13 }
  0x2e   : > { %10277 = vst [vmem:[#allocation19_spill] sm:$0xff] %v7508_v15  ;;  %v536_v5 = vrot.slane %v7266_v16, 2  ;;  %v531_v20 = vrot.slane %v7240_v2, 2  ;;  %v7518_v6 = vpack.i.bf16 %v516_v19, %v514_v33  ;;  %v525_v7 = vsel %vm517_vm1, %v523_v46, %v524_v60 }
  0x2f   : > { %5664 = vrot.lane.b32.xlu0 %v7488_v34, %s7155_s15  ;;  %v527_v28 = vsel %vm517_vm1, %v524_v60, %v526_v63  ;;  %v528_v22 = vrot.slane %v7234_v0, 2  ;;  %v529_v35 = vrot.slane %v7237_v1, 2  ;;  %v7526_v44 = vpack.i.bf16 %v511_v23, %v509_v3 }
  0x30   : > { %10278 = vst [vmem:[#allocation20_spill] sm:$0xff] %v7518_v6  ;;  %v520_v2 = vsel %vm517_vm1, %v518_v51, %v519_v4  ;;  %v10280_v16 = vrot.slane %v7252_v8, 2  ;;  %v535_v33 = vsel %vm517_vm1, %v533_v58, %v534_v59  ;;  %v537_v57 = vsel %vm517_vm1, %v534_v59, %v536_v5 }
  0x31   : > { %5679 = vrot.lane.b32.xlu1 %v7498_v45, %s7155_s15  ;;  %10279 = vst [vmem:[#allocation21_spill] sm:$0xff] %v7526_v44  ;;  %v543_v13 = vrot.slane %v7283_v24, 2  ;;  %v544_v46 = vrot.slane %v7286_v25, 2  ;;  %v546_v60 = vrot.slane %v7293_v30, 2  ;;  %v7539_v3 = vpack.i.bf16 %v527_v28, %v525_v7  ;;  %v10284_v45 = vld [vmem:[#allocation12_spill] sm:$0xff] }
  0x32   : > { %v522_v19 = vsel %vm517_vm1, %v519_v4, %v10280_v16  ;;  %v538_v63 = vrot.slane %v7296_v31, 2  ;;  %v539_v8 = vrot.slane %v7304_v36, 2  ;;  %v541_v51 = vrot.slane %v7307_v37, 2 }
  0x33   : > { %5674 = vrot.lane.b32.xlu0 %v7508_v15, %s7155_s15  ;;  %v553_v4 = vrot.slane %v7314_v42, 2  ;;  %v554_v58 = vrot.slane %v7317_v43, 2  ;;  %v5693_v59 = vpack.i.bf16 %v522_v19, %v520_v2  ;;  %v7548_v30 = vpack.i.bf16 %v537_v57, %v535_v33 }
  0x34   : > { %v530_v23 = vsel %vm517_vm1, %v528_v22, %v529_v35  ;;  %v532_v5 = vsel %vm517_vm1, %v529_v35, %v531_v20  ;;  %v545_v7 = vsel %vm517_vm1, %v543_v13, %v544_v46  ;;  %v547_v28 = vsel %vm517_vm1, %v544_v46, %v546_v60 }
  0x35   : > { %5689 = vrot.lane.b32.xlu1 %v7518_v6, %s7155_s15  ;;  %v556_v37 = vrot.slane %v7326_v48, 2  ;;  %v548_v16 = vrot.slane %v7329_v49, 2  ;;  %v540_v2 = vsel %vm517_vm1, %v538_v63, %v539_v8  ;;  %v542_v19 = vsel %vm517_vm1, %v539_v8, %v541_v51 }
  0x36   : > { %v549_v22 = vrot.slane %v7332_v50, 2  ;;  %v551_v20 = vrot.slane %v7340_v55, 2  ;;  %v563_v35 = vrot.slane %v7343_v56, 2  ;;  %v564_v33 = vrot.slane %v7353_v61, 2 }
  0x37   : > { %5684 = vrot.lane.b32.xlu0 %v7526_v44, %s7155_s15  ;;  %v7565_v48 = vpack.i.bf16 %v532_v5, %v530_v23  ;;  %v566_v57 = vrot.slane %v7356_v62, 2  ;;  %v558_v13 = vrot.slane %v7363_v9, 2  ;;  %v7569_v46 = vpack.i.bf16 %v547_v28, %v545_v7 }
  0x38   : > { %v7571_v60 = vpack.i.bf16 %v542_v19, %v540_v2  ;;  %v559_v63 = vrot.slane %v7366_v10, 2  ;;  %v561_v55 = vrot.slane %v7376_v21, 2  ;;  %v573_v8 = vrot.slane %v7383_v29, 2 }
  0x39   : > { %5699 = vrot.lane.b32.xlu1 %v7539_v3, %s7156_s16  ;;  %10281 = vst [vmem:[#allocation22_spill] sm:$0xff] %v7569_v46  ;;  %v574_v51 = vrot.slane %v7386_v32, 2  ;;  %v568_v62 = vrot.slane %v7399_v40, 2  ;;  %v555_v23 = vsel %vm517_vm1, %v553_v4, %v554_v58  ;;  %v557_v5 = vsel %vm517_vm1, %v554_v58, %v556_v37  ;;  %v10283_v58 = vld [vmem:[#allocation11_spill] sm:$0xff] }
  0x3a   : > { %v569_v7 = vrot.slane %v7402_v41, 2  ;;  %v571_v28 = vrot.slane %v7409_v53, 2  ;;  %v550_v21 = vsel %vm517_vm1, %v548_v16, %v549_v22  ;;  %v552_v2 = vsel %vm517_vm1, %v549_v22, %v551_v20 }
  0x3b   : > { %5694 = vrot.lane.b32.xlu0 %v5693_v59, %s7156_s16  ;;  %v576_v59 = vrot.slane %v7396_v39, 2  ;;  %v583_v19 = vrot.slane %v7412_v54, 2  ;;  %v10282_v39 = vld [vmem:[#allocation10_spill] sm:$0xff]  ;;  %v565_v44 = vsel %vm517_vm1, %v563_v35, %v564_v33  ;;  %v567_v4 = vsel %vm517_vm1, %v564_v33, %v566_v57 }
  0x3c   : > { %v584_v6 = vrot.slane %v10282_v39, 2  ;;  %v586_v37 = vrot.slane %v10283_v58, 2  ;;  %v578_v15 = vrot.slane %v10284_v45, 2  ;;  %v7597_v53 = vpack.i.bf16 %v557_v5, %v555_v23 }
  0x3d   : > { %5709 = vrot.lane.b32.xlu1 %v7548_v30, %s7156_s16  ;;  %v579_v16 = vrot.slane %v7435_v26, 2  ;;  %v581_v22 = vrot.slane %v7438_v27, 2  ;;  %v7603_v20 = vpack.i.bf16 %v552_v2, %v550_v21  ;;  %v7605_v35 = vpack.i.bf16 %v567_v4, %v565_v44  ;;  %v10286_v2 = vld [vmem:[#allocation16_spill] sm:$0xff] }
  0x3e   : > { %v560_v33 = vsel %vm517_vm1, %v558_v13, %v559_v63  ;;  %v562_v57 = vsel %vm517_vm1, %v559_v63, %v561_v55  ;;  %v575_v58 = vsel %vm517_vm1, %v573_v8, %v574_v51  ;;  %v577_v23 = vsel %vm517_vm1, %v574_v51, %v576_v59 }
  0x3f   : > { %5704 = vrot.lane.b32.xlu0 %v7565_v48, %s7156_s16  ;;  %v570_v5 = vsel %vm517_vm1, %v568_v62, %v569_v7  ;;  %v585_v27 = vsel %vm517_vm1, %v583_v19, %v584_v6  ;;  %v587_v44 = vsel %vm517_vm1, %v584_v6, %v586_v37  ;;  %v580_v21 = vsel %vm517_vm1, %v578_v15, %v579_v16  ;;  %v10285_v15 = vld [vmem:[#allocation14_spill] sm:$0xff] }
  0x40   : > { %v582_v13 = vsel %vm517_vm1, %v579_v16, %v581_v22  ;;  %v7619_v63 = vpack.i.bf16 %v562_v57, %v560_v33  ;;  %v7623_v55 = vpack.i.bf16 %v577_v23, %v575_v58  ;;  %v593_v51 = vrot.slane %v7447_v38, 2 }
  0x41   : > { %5719 = vrot.lane.b32.xlu1 %v7569_v46, %s7156_s16  ;;  %v572_v46 = vsel %vm517_vm1, %v569_v7, %v571_v28  ;;  %v594_v59 = vrot.slane %v7450_v52, 2  ;;  %v7629_v62 = vpack.i.bf16 %v587_v44, %v585_v27  ;;  %v7631_v6 = vpack.i.bf16 %v582_v13, %v580_v21  ;;  %v10287_v27 = vld [vmem:[#allocation3_spill] sm:$0xff]  ;;  %v10288_v44 = vld [vmem:[#allocation5_spill] sm:$0xff]  ;;  %v10290_v13 = vld [vmem:[#allocation4_spill] sm:$0xff] }
  0x42   : > { %v7625_v8 = vpack.i.bf16 %v572_v46, %v570_v5  ;;  %v596_v7 = vrot.slane %v10285_v15, 2  ;;  %v588_v28 = vrot.slane %v7460_v47, 2  ;;  %v589_v19 = vrot.slane %v10286_v2, 2  ;;  %v10289_v21 = vld [vmem:[#allocation7_spill] sm:$0xff] }
  0x43   : > { %5714 = vrot.lane.b32.xlu0 %v7571_v60, %s7156_s16  ;;  %v591_v46 = vrot.slane %v7480_v14, 2  ;;  %v595_v4 = vsel %vm517_vm1, %v593_v51, %v594_v59  ;;  %v5778_v57 = vpack.i.bf16 %v7237_v1, %v7234_v0  ;;  %v5773_v58 = vpack.i.bf16 %v7272_v18, %v7269_v17  ;;  %v10291_v51 = vld [vmem:[#allocation9_spill] sm:$0xff]  ;;  %v10293_v15 = vld [vmem:[#allocation15_spill] sm:$0xff] }
  0x44   : > { %v597_v37 = vsel %vm517_vm1, %v594_v59, %v596_v7  ;;  %v590_v16 = vsel %vm517_vm1, %v588_v28, %v589_v19  ;;  %v7668_v23 = vpack.i.bf16 %v7304_v36, %v7296_v31  ;;  %v7673_v5 = vpack.i.bf16 %v7260_v12, %v7257_v11  ;;  %v7725_v36 = vld [vmem:[%s7231_s14 + $0x180] sm:$0xff]  ;;  %v10292_v59 = vld [vmem:[#allocation6_spill] sm:$0xff]  ;;  %v10294_v7 = vld [vmem:[#allocation8_spill] sm:$0xff] }
  0x45   : > { %5729 = vrot.lane.b32.xlu1 %v7597_v53, %s7156_s16  ;;  %v592_v22 = vsel %vm517_vm1, %v589_v19, %v591_v46  ;;  %v7651_v33 = vpack.i.bf16 %v597_v37, %v595_v4  ;;  %v7679_v0 = vpack.i.bf16 %v7332_v50, %v7329_v49  ;;  %v7685_v1 = vpack.i.bf16 %v7286_v25, %v7283_v24  ;;  %v7052_v28 = vld [vmem:[%s10200_s1] sm:$0xff]   ;;  %v10295_v19 = vld [vmem:[#allocation13_spill] sm:$0xff]  ;;  %v7053_v37 = vld [vmem:[%s10200_s1 + $0x8] sm:$0xff]  }
  0x46   : > { %v7655_v14 = vpack.i.bf16 %v592_v22, %v590_v16  ;;  %v7691_v11 = vpack.i.bf16 %v7366_v10, %v7363_v9  ;;  %v7697_v12 = vpack.i.bf16 %v7317_v43, %v7314_v42  ;;  %v7703_v17 = vpack.i.bf16 %v7402_v41, %v7399_v40  ;;  %v7728_v42 = vld [vmem:[%s7231_s14 + $0x188] sm:$0xff]  ;;  %5361 = vmatprep.subr.bf16.mxu0 %v7052_v28  ;;  %v10296_v16 = vld [vmem:[#allocation17_spill] sm:$0xff] }
  0x47   : > { %5724 = vrot.lane.b32.xlu0 %v7603_v20, %s7156_s16  ;;  %v7709_v18 = vpack.i.bf16 %v7353_v61, %v7343_v56  ;;  %v5828_v24 = vpack.i.bf16 %v7435_v26, %v10284_v45  ;;  %v7719_v25 = vpack.i.bf16 %v7386_v32, %v7383_v29  ;;  %v5838_v31 = vpack.i.bf16 %v10286_v2, %v7460_v47 }
  0x48   : > { %v5833_v43 = vpack.i.bf16 %v10282_v39, %v7412_v54  ;;  %v7737_v49 = vpack.i.bf16 %v7728_v42, %v7725_v36  ;;  %v5843_v50 = vpack.i.bf16 %v7450_v52, %v7447_v38  ;;  %5362 = vmatpush3.bf16.msra.mxu0 %v7052_v28 }
  0x49   : > { %5739 = vrot.lane.b32.xlu1 %v7605_v35, %s7156_s16  ;;  %5363 = vmatprep.subr.bf16.mxu0 %v7053_v37 }
  0x4b   : > { %5734 = vrot.lane.b32.xlu0 %v7619_v63, %s7156_s16 }
  0x4c   : > { %5364 = vmatpush3.bf16.msra.mxu0 %v7053_v37 }
  0x4d   : > { %5749 = vrot.lane.b32.xlu1 %v7623_v55, %s7156_s16 }
  0x4f   : > { %5744 = vrot.lane.b32.xlu0 %v7625_v8, %s7156_s16 }
  0x51   : > { %5759 = vrot.lane.b32.xlu1 %v7629_v62, %s7156_s16 }
  0x53   : > { %5754 = vrot.lane.b32.xlu0 %v7631_v6, %s7156_s16 }
  0x55   : > { %5769 = vrot.lane.b32.xlu1 %v7651_v33, %s7156_s16 }
  0x57   : > { %5764 = vrot.lane.b32.xlu0 %v7655_v14, %s7156_s16 }
  0x59   : > { %5779 = vrot.lane.b32.xlu1 %v5778_v57, %s7157_s17 }
  0x5b   : > { %5774 = vrot.lane.b32.xlu0 %v5773_v58, %s7157_s17 }
  0x5d   : > { %5789 = vrot.lane.b32.xlu1 %v7668_v23, %s7157_s17 }
  0x5f   : > { %5784 = vrot.lane.b32.xlu0 %v7673_v5, %s7157_s17 }
  0x61   : > { %5799 = vrot.lane.b32.xlu1 %v7679_v0, %s7157_s17 }
  0x63   : > { %5794 = vrot.lane.b32.xlu0 %v7685_v1, %s7157_s17 }
  0x65   : > { %5809 = vrot.lane.b32.xlu1 %v7691_v11, %s7157_s17 }
  0x67   : > { %5804 = vrot.lane.b32.xlu0 %v7697_v12, %s7157_s17 }
  0x69   : > { %5819 = vrot.lane.b32.xlu1 %v7703_v17, %s7157_s17 }
  0x6b   : > { %5814 = vrot.lane.b32.xlu0 %v7709_v18, %s7157_s17 }
  0x6d   : > { %5829 = vrot.lane.b32.xlu1 %v5828_v24, %s7157_s17 }
  0x6f   : > { %5824 = vrot.lane.b32.xlu0 %v7719_v25, %s7157_s17 }
  0x71   : > { %5839 = vrot.lane.b32.xlu1 %v5838_v31, %s7157_s17 }
  0x73   : > { %5834 = vrot.lane.b32.xlu0 %v5833_v43, %s7157_s17 }
  0x75   : > { %5849 = vrot.lane.b32.xlu1 %v7737_v49, %s7157_s17 }
  0x77   : > { %5844 = vrot.lane.b32.xlu0 %v5843_v50, %s7157_s17 }
  0x79   : > { %5859 = vrot.lane.b32.xlu1 %v10287_v27, %s7158_s18 }
  0x7b   : > { %5854 = vrot.lane.b32.xlu0 %v10288_v44, %s7158_s18 }
  0x7d   : > { %5869 = vrot.lane.b32.xlu1 %v10289_v21, %s7158_s18 }
  0x7f   : > { %5864 = vrot.lane.b32.xlu0 %v10290_v13, %s7158_s18 }
  0x81   : > { %5879 = vrot.lane.b32.xlu1 %v10291_v51, %s7158_s18 }
  0x83   : > { %5874 = vrot.lane.b32.xlu0 %v10292_v59, %s7158_s18 }
  0x85   : > { %5889 = vrot.lane.b32.xlu1 %v10293_v15, %s7158_s18 }
  0x87   : > { %5884 = vrot.lane.b32.xlu0 %v10294_v7, %s7158_s18 }
  0x89   : > { %5899 = vrot.lane.b32.xlu1 %v7488_v34, %s7158_s18 }
  0x8b   : > { %5894 = vrot.lane.b32.xlu0 %v10295_v19, %s7158_s18  ;;  %v7768_v46 = vpop.permute.xlu1 %5624 }
  0x8d   : > { %v7770_v4 = vpop.permute.xlu0 %5614  ;;  %5909 = vrot.lane.b32.xlu1 %v7539_v3, %s7159_s21  ;;  %v7054_v3 = vld [vmem:[%s10200_s1 + $0x10] ss:$0 sps:$4 sm:$0x33]  }
  0x8e   : > { %5591 = vmatprep.subr.msk.bf16.mxu0 %vm1741_vm2, %v7054_v3  ;;  %v1743_v43 = vsel %vm1741_vm2, %v7054_v3, 0 }
  0x8f   : > { %5904 = vrot.lane.b32.xlu0 %v10296_v16, %s7158_s18  ;;  %v7779_v22 = vpop.permute.xlu1 %5629  ;;  %5366 = vmatpush3.bf16.msra.mxu0 %v1743_v43  ;;  %v10300_v43 = vld [vmem:[#allocation22_spill] sm:$0xff] }
  0x91   : > { %v7781_v58 = vpop.permute.xlu0 %5619  ;;  %5919 = vrot.lane.b32.xlu1 %v5778_v57, %s7160_s24 }
  0x93   : > { %5914 = vrot.lane.b32.xlu0 %v7565_v48, %s7159_s21  ;;  %v7789_v24 = vpop.permute.xlu1 %5639 }
  0x95   : > { %v7791_v31 = vpop.permute.xlu0 %5634  ;;  %5929 = vrot.lane.b32.xlu1 %v10287_v27, %s7161_s27 }
  0x96   : > { %10297 = vst [vmem:[#allocation10_spill] sm:$0xff] %v7791_v31 }
  0x97   : > { %5924 = vrot.lane.b32.xlu0 %v7673_v5, %s7160_s24  ;;  %v7797_v57 = vpop.permute.xlu1 %5649 }
  0x98   : > { %10298 = vst [vmem:[#allocation11_spill] sm:$0xff] %v7797_v57 }
  0x99   : > { %v7799_v50 = vpop.permute.xlu0 %5644  ;;  %5939 = vrot.lane.b32.xlu1 %v7565_v48, %s7162_s28 }
  0x9a   : > { %10299 = vst [vmem:[#allocation12_spill] sm:$0xff] %v7799_v50 }
  0x9b   : > { %5934 = vrot.lane.b32.xlu0 %v10290_v13, %s7161_s27  ;;  %v5660_v44 = vpop.permute.xlu1 %5659 }
  0x9c   : > { %v5662_v50 = vunpack.i.h.bf16 %v5660_v44  ;;  %v5661_v57 = vunpack.i.l.bf16 %v5660_v44 }
  0x9d   : > { %v5655_v28 = vpop.permute.xlu0 %5654  ;;  %5949 = vrot.lane.b32.xlu1 %v7548_v30, %s7159_s21 }
  0x9e   : > { %v1411_v44 = vsel %vm1392_vm3, %v7343_v56, %v5661_v57 }
  0x9f   : > { %5944 = vrot.lane.b32.xlu0 %v7548_v30, %s7162_s28  ;;  %v5670_v5 = vpop.permute.xlu1 %5669 }
  0xa1   : > { %v7809_v27 = vpop.permute.xlu0 %5664  ;;  %5959 = vrot.lane.b32.xlu1 %v7668_v23, %s7160_s24 }
  0xa2   : > { %v5667_v57 = vunpack.i.h.bf16 %v7809_v27 }
  0xa3   : > { %5954 = vrot.lane.b32.xlu0 %v7571_v60, %s7159_s21  ;;  %v7815_v48 = vpop.permute.xlu1 %5679 }
  0xa5   : > { %v7817_v13 = vpop.permute.xlu0 %5674  ;;  %5969 = vrot.lane.b32.xlu1 %v10289_v21, %s7161_s27 }
  0xa7   : > { %5964 = vrot.lane.b32.xlu0 %v7685_v1, %s7160_s24  ;;  %v7823_v30 = vpop.permute.xlu1 %5689 }
  0xa9   : > { %v7825_v37 = vpop.permute.xlu0 %5684  ;;  %5979 = vrot.lane.b32.xlu1 %v7571_v60, %s7162_s28 }
  0xab   : > { %5974 = vrot.lane.b32.xlu0 %v10292_v59, %s7161_s27  ;;  %v7831_v23 = vpop.permute.xlu1 %5699 }
  0xad   : > { %v7833_v3 = vpop.permute.xlu0 %5694  ;;  %5989 = vrot.lane.b32.xlu1 %v10300_v43, %s7159_s21 }
  0xaf   : > { %5984 = vrot.lane.b32.xlu0 %v10300_v43, %s7162_s28  ;;  %v7839_v1 = vpop.permute.xlu1 %5709 }
  0xb0   : > { %10301 = vst [vmem:[#allocation14_spill] sm:$0xff] %v7839_v1 }
  0xb1   : > { %v7841_v21 = vpop.permute.xlu0 %5704  ;;  %5999 = vrot.lane.b32.xlu1 %v7679_v0, %s7160_s24  ;;  %v5657_v0 = vunpack.i.h.bf16 %v5655_v28 }
  0xb2   : > { %10302 = vst [vmem:[#allocation16_spill] sm:$0xff] %v7841_v21 }
  0xb3   : > { %5994 = vrot.lane.b32.xlu0 %v7603_v20, %s7159_s21  ;;  %v7847_v60 = vpop.permute.xlu1 %5719 }
  0xb4   : > { %10303 = vst [vmem:[#allocation3_spill] sm:$0xff] %v7847_v60  ;;  %v5656_v60 = vunpack.i.l.bf16 %v5655_v28 }
  0xb5   : > { %v7849_v59 = vpop.permute.xlu0 %5714  ;;  %6009 = vrot.lane.b32.xlu1 %v10291_v51, %s7161_s27 }
  0xb6   : > { %10304 = vst [vmem:[#allocation5_spill] sm:$0xff] %v7849_v59  ;;  %v1409_v56 = vsel %vm1392_vm3, %v7363_v9, %v5656_v60  ;;  %v5681_v60 = vunpack.i.l.bf16 %v7815_v48 }
  0xb7   : > { %6004 = vrot.lane.b32.xlu0 %v7697_v12, %s7160_s24  ;;  %v7855_v43 = vpop.permute.xlu1 %5729  ;;  %v1412_v12 = vsel %vm1392_vm3, %v7353_v61, %v5662_v50  ;;  %v1410_v61 = vsel %vm1392_vm3, %v7366_v10, %v5657_v0  ;;  %v5666_v50 = vunpack.i.l.bf16 %v7809_v27  ;;  %v5682_v27 = vunpack.i.h.bf16 %v7815_v48 }
  0xb8   : > { %10305 = vst [vmem:[#allocation7_spill] sm:$0xff] %v7855_v43  ;;  %v5671_v43 = vunpack.i.l.bf16 %v5670_v5  ;;  %v5676_v48 = vunpack.i.l.bf16 %v7817_v13 }
  0xb9   : > { %v7857_v31 = vpop.permute.xlu0 %5724  ;;  %6019 = vrot.lane.b32.xlu1 %v7603_v20, %s7162_s28 }
  0xba   : > { %10306 = vst [vmem:[#allocation4_spill] sm:$0xff] %v7857_v31  ;;  %v5672_v31 = vunpack.i.h.bf16 %v5670_v5  ;;  %v1415_v9 = vsel %vm1392_vm3, %v7383_v29, %v5671_v43  ;;  %v1413_v29 = vsel %vm1392_vm3, %v7399_v40, %v5666_v50  ;;  %v1419_v40 = vsel %vm1392_vm3, %v7412_v54, %v5681_v60 }
  0xbb   : > { %6014 = vrot.lane.b32.xlu0 %v10294_v7, %s7161_s27  ;;  %v5740_v51 = vpop.permute.xlu1 %5739  ;;  %v1417_v54 = vsel %vm1392_vm3, %v10284_v45, %v5676_v48 }
  0xbc   : > { %v5742_v59 = vunpack.i.h.bf16 %v5740_v51  ;;  %v5741_v21 = vunpack.i.l.bf16 %v5740_v51  ;;  %v1416_v10 = vsel %vm1392_vm3, %v7386_v32, %v5672_v31  ;;  %v1414_v32 = vsel %vm1392_vm3, %v7402_v41, %v5667_v57 }
  0xbd   : > { %v5735_v1 = vpop.permute.xlu0 %5734  ;;  %6029 = vrot.lane.b32.xlu1 %v7597_v53, %s7159_s21  ;;  %v5677_v31 = vunpack.i.h.bf16 %v7817_v13  ;;  %v1420_v41 = vsel %vm1392_vm3, %v10282_v39, %v5682_v27  ;;  %v5692_v13 = vunpack.i.h.bf16 %v7823_v30  ;;  %v5691_v57 = vunpack.i.l.bf16 %v7823_v30 }
  0xbe   : > { %v7870_v20 = vsel %vm1425_vm4, %v1412_v12, %v5742_v59  ;;  %v7873_v7 = vsel %vm1425_vm4, %v1411_v44, %v5741_v21  ;;  %v5737_v28 = vunpack.i.h.bf16 %v5735_v1  ;;  %v5736_v51 = vunpack.i.l.bf16 %v5735_v1 }
  0xbf   : > { %6024 = vrot.lane.b32.xlu0 %v7597_v53, %s7162_s28  ;;  %v5750_v5 = vpop.permute.xlu1 %5749  ;;  %v1418_v39 = vsel %vm1392_vm3, %v7435_v26, %v5677_v31  ;;  %v5687_v30 = vunpack.i.h.bf16 %v7825_v37  ;;  %v5686_v27 = vunpack.i.l.bf16 %v7825_v37  ;;  %v1424_v26 = vsel %vm1392_vm3, %v7450_v52, %v5692_v13 }
  0xc0   : > { %v7884_v59 = vsel %vm1425_vm4, %v1409_v56, %v5736_v51  ;;  %v7887_v21 = vsel %vm1425_vm4, %v1410_v61, %v5737_v28  ;;  %v5752_v1 = vunpack.i.h.bf16 %v5750_v5  ;;  %v5751_v12 = vunpack.i.l.bf16 %v5750_v5 }
  0xc1   : > { %v5745_v53 = vpop.permute.xlu0 %5744  ;;  %6039 = vrot.lane.b32.xlu1 %v7691_v11, %s7160_s24  ;;  %v1423_v45 = vsel %vm1392_vm3, %v7447_v38, %v5691_v57  ;;  %v1422_v48 = vsel %vm1392_vm3, %v10286_v2, %v5687_v30  ;;  %v1421_v52 = vsel %vm1392_vm3, %v7460_v47, %v5686_v27  ;;  %v10307_v57 = vld [vmem:[#allocation19_spill] sm:$0xff]  ;;  %v7087_v30 = vld [vmem:[%s7231_s14 + $0x138] sm:$0xff] }
  0xc2   : > { %v7898_v0 = vsel %vm1425_vm4, %v1416_v10, %v5752_v1  ;;  %v7901_v44 = vsel %vm1425_vm4, %v1415_v9, %v5751_v12  ;;  %v5747_v28 = vunpack.i.h.bf16 %v5745_v53  ;;  %v5746_v51 = vunpack.i.l.bf16 %v5745_v53  ;;  %v7088_v27 = vld [vmem:[%s7231_s14 + $0x140] sm:$0xff] }
  0xc3   : > { %6034 = vrot.lane.b32.xlu0 %v7619_v63, %s7159_s21  ;;  %v5760_v11 = vpop.permute.xlu1 %5759 }
  0xc4   : > { %v7912_v43 = vsel %vm1425_vm4, %v1413_v29, %v5746_v51  ;;  %v7915_v61 = vsel %vm1425_vm4, %v1414_v32, %v5747_v28  ;;  %v5762_v56 = vunpack.i.h.bf16 %v5760_v11  ;;  %v5761_v5 = vunpack.i.l.bf16 %v5760_v11 }
  0xc5   : > { %v5755_v50 = vpop.permute.xlu0 %5754  ;;  %6049 = vrot.lane.b32.xlu1 %v10293_v15, %s7161_s27 }
  0xc6   : > { %v7926_v1 = vsel %vm1425_vm4, %v1420_v41, %v5762_v56  ;;  %v7929_v12 = vsel %vm1425_vm4, %v1419_v40, %v5761_v5  ;;  %v5757_v10 = vunpack.i.h.bf16 %v5755_v50  ;;  %v5756_v9 = vunpack.i.l.bf16 %v5755_v50 }
  0xc7   : > { %6044 = vrot.lane.b32.xlu0 %v7709_v18, %s7160_s24  ;;  %v5770_v15 = vpop.permute.xlu1 %5769 }
  0xc8   : > { %v7940_v60 = vsel %vm1425_vm4, %v1417_v54, %v5756_v9  ;;  %v7943_v53 = vsel %vm1425_vm4, %v1418_v39, %v5757_v10  ;;  %v5772_v28 = vunpack.i.h.bf16 %v5770_v15  ;;  %v5771_v51 = vunpack.i.l.bf16 %v5770_v15 }
  0xc9   : > { %v5765_v32 = vpop.permute.xlu0 %5764  ;;  %6059 = vrot.lane.b32.xlu1 %v7619_v63, %s7162_s28  ;;  %v6128_v15 = vpack.i.bf16 %v7088_v27, %v7087_v30  ;;  %v10321_v27 = vld [vmem:[#allocation21_spill] sm:$0xff] }
  0xca   : > { %v7952_v18 = vsel %vm1425_vm4, %v1424_v26, %v5772_v28  ;;  %v7955_v37 = vsel %vm1425_vm4, %v1423_v45, %v5771_v51  ;;  %v5767_v29 = vunpack.i.h.bf16 %v5765_v32  ;;  %v5766_v31 = vunpack.i.l.bf16 %v5765_v32  ;;  %v7089_v45 = vld [vmem:[%s7231_s14 + $0x120] sm:$0xff]  ;;  %v7090_v32 = vld [vmem:[%s7231_s14 + $0x128] sm:$0xff] }
  0xcb   : > { %6054 = vrot.lane.b32.xlu0 %v10295_v19, %s7161_s27  ;;  %v7963_v38 = vpop.permute.xlu1 %5779 }
  0xcc   : > { %v7966_v63 = vsel %vm1425_vm4, %v1421_v52, %v5766_v31  ;;  %v7969_v11 = vsel %vm1425_vm4, %v1422_v48, %v5767_v29  ;;  %v6123_v29 = vpack.i.bf16 %v7090_v32, %v7089_v45  ;;  %v601_v45 = vrot.slane %v7725_v36, 1 }
  0xcd   : > { %v7971_v56 = vpop.permute.xlu0 %5774  ;;  %6069 = vrot.lane.b32.xlu1 %v7605_v35, %s7159_s21 }
  0xcf   : > { %6064 = vrot.lane.b32.xlu0 %v7605_v35, %s7162_s28  ;;  %v7977_v47 = vpop.permute.xlu1 %5789 }
  0xd1   : > { %v7979_v2 = vpop.permute.xlu0 %5784  ;;  %6079 = vrot.lane.b32.xlu1 %v7703_v17, %s7160_s24 }
  0xd3   : > { %6074 = vrot.lane.b32.xlu0 %v7625_v8, %s7159_s21  ;;  %v7985_v19 = vpop.permute.xlu1 %5799 }
  0xd5   : > { %v7987_v5 = vpop.permute.xlu0 %5794  ;;  %6089 = vrot.lane.b32.xlu1 %v7488_v34, %s7161_s27 }
  0xd7   : > { %6084 = vrot.lane.b32.xlu0 %v7719_v25, %s7160_s24  ;;  %v7993_v35 = vpop.permute.xlu1 %5809 }
  0xd9   : > { %v7995_v41 = vpop.permute.xlu0 %5804  ;;  %6099 = vrot.lane.b32.xlu1 %v7625_v8, %s7162_s28 }
  0xdb   : > { %6094 = vrot.lane.b32.xlu0 %v10296_v16, %s7161_s27  ;;  %v5820_v17 = vpop.permute.xlu1 %5819 }
  0xdc   : > { %v5822_v40 = vunpack.i.h.bf16 %v5820_v17  ;;  %v5821_v13 = vunpack.i.l.bf16 %v5820_v17 }
  0xdd   : > { %v5815_v34 = vpop.permute.xlu0 %5814  ;;  %6109 = vrot.lane.b32.xlu1 %v10307_v57, %s7158_s18 }
  0xde   : > { %v8005_v25 = vsel %vm1458_vm5, %v7873_v7, %v5821_v13  ;;  %v8009_v8 = vsel %vm1458_vm5, %v7870_v20, %v5822_v40  ;;  %v5817_v50 = vunpack.i.h.bf16 %v5815_v34  ;;  %v5816_v16 = vunpack.i.l.bf16 %v5815_v34 }
  0xdf   : > { %6104 = vrot.lane.b32.xlu0 %v7623_v55, %s7162_s28  ;;  %v5830_v10 = vpop.permute.xlu1 %5829 }
  0xe0   : > { %v8015_v9 = vsel %vm1458_vm5, %v7884_v59, %v5816_v16  ;;  %v8019_v7 = vsel %vm1458_vm5, %v7887_v21, %v5817_v50  ;;  %v5832_v39 = vunpack.i.h.bf16 %v5830_v10  ;;  %v5831_v54 = vunpack.i.l.bf16 %v5830_v10  ;;  %v10316_v10 = vld [vmem:[#allocation18_spill] sm:$0xff] }
  0xe1   : > { %v5825_v20 = vpop.permute.xlu0 %5824  ;;  %6119 = vrot.lane.b32.xlu1 %v7631_v6, %s7159_s21 }
  0xe2   : > { %v8027_v28 = vsel %vm1458_vm5, %v7901_v44, %v5831_v54  ;;  %v8031_v59 = vsel %vm1458_vm5, %v7898_v0, %v5832_v39  ;;  %v5827_v51 = vunpack.i.h.bf16 %v5825_v20  ;;  %v5826_v21 = vunpack.i.l.bf16 %v5825_v20 }
  0xe3   : > { %10308 = vst [vmem:[#allocation9_spill] sm:$0xff] %v8027_v28  ;;  %10309 = vst [vmem:[#allocation6_spill] sm:$0xff] %v8031_v59  ;;  %6114 = vrot.lane.b32.xlu0 %v7623_v55, %s7159_s21  ;;  %v5840_v26 = vpop.permute.xlu1 %5839 }
  0xe4   : > { %v8039_v31 = vsel %vm1458_vm5, %v7912_v43, %v5826_v21  ;;  %v8043_v44 = vsel %vm1458_vm5, %v7915_v61, %v5827_v51  ;;  %v5842_v48 = vunpack.i.h.bf16 %v5840_v26  ;;  %v5841_v0 = vunpack.i.l.bf16 %v5840_v26  ;;  %v7092_v51 = vld [vmem:[%s7231_s14 + $0x170] sm:$0xff] }
  0xe5   : > { %10310 = vst [vmem:[#allocation15_spill] sm:$0xff] %v8039_v31  ;;  %10311 = vst [vmem:[#allocation8_spill] sm:$0xff] %v8043_v44  ;;  %v5835_v52 = vpop.permute.xlu0 %5834  ;;  %6129 = vrot.lane.b32.xlu1 %v6128_v15, %s7160_s24  ;;  %v602_v26 = vrot.slane %v7728_v42, 1 }
  0xe6   : > { %v8048_v55 = vsel %vm1458_vm5, %v7929_v12, %v5841_v0  ;;  %v8052_v17 = vsel %vm1458_vm5, %v7926_v1, %v5842_v48  ;;  %v5837_v40 = vunpack.i.h.bf16 %v5835_v52  ;;  %v5836_v43 = vunpack.i.l.bf16 %v5835_v52  ;;  %v7093_v52 = vld [vmem:[%s7231_s14 + $0x150] sm:$0xff] }
  0xe7   : > { %10312 = vst [vmem:[#allocation13_spill] sm:$0xff] %v8048_v55  ;;  %10313 = vst [vmem:[#allocation17_spill] sm:$0xff] %v8052_v17  ;;  %6124 = vrot.lane.b32.xlu0 %v6123_v29, %s7160_s24  ;;  %v5850_v13 = vpop.permute.xlu1 %5849  ;;  %v607_v29 = vrot.slane %v7728_v42, 2  ;;  %v606_v48 = vrot.slane %v7725_v36, 2  ;;  %v8128_v42 = vld [vmem:[%s7231_s14 + $0x1a8] sm:$0x3]  ;;  %v603_v36 = vsel %vm436_vm0, %v601_v45, %v602_v26  ;;  %v5626_v45 = vunpack.i.l.bf16 %v7768_v46 }
  0xe8   : > { %v8057_v61 = vsel %vm1458_vm5, %v7940_v60, %v5836_v43  ;;  %v8061_v34 = vsel %vm1458_vm5, %v7943_v53, %v5837_v40  ;;  %v5852_v50 = vunpack.i.h.bf16 %v5850_v13  ;;  %v5851_v12 = vunpack.i.l.bf16 %v5850_v13  ;;  %v7094_v40 = vld [vmem:[%s7231_s14 + $0x158] sm:$0xff] }
  0xe9   : > { %10314 = vst [vmem:[#allocation22_spill] sm:$0xff] %v8057_v61  ;;  %10315 = vst [vmem:[#allocation19_spill] sm:$0xff] %v8061_v34  ;;  %v5845_v16 = vpop.permute.xlu0 %5844  ;;  %6139 = vrot.lane.b32.xlu1 %v10316_v10, %s7161_s27  ;;  %v6173_v43 = vpack.i.bf16 %v7094_v40, %v7093_v52  ;;  %v5632_v40 = vunpack.i.h.bf16 %v7779_v22  ;;  %v5702_v61 = vunpack.i.h.bf16 %v7831_v23  ;;  %v5701_v17 = vunpack.i.l.bf16 %v7831_v23 }
  0xea   : > { %v8067_v1 = vsel %vm1458_vm5, %v7955_v37, %v5851_v12  ;;  %v8071_v39 = vsel %vm1458_vm5, %v7952_v18, %v5852_v50  ;;  %v5847_v60 = vunpack.i.h.bf16 %v5845_v16  ;;  %v5846_v54 = vunpack.i.l.bf16 %v5845_v16  ;;  %v8122_v12 = vld [vmem:[%s7231_s14 + $0x198] sm:$0xff]  ;;  %v8125_v16 = vld [vmem:[%s7231_s14 + $0x1a0] sm:$0xff] }
  0xeb   : > { %10317 = vst [vmem:[#allocation18_spill] sm:$0xff] %v8067_v1  ;;  %10318 = vst [vmem:[#allocation23_spill] sm:$0xff] %v8071_v39  ;;  %6134 = vrot.lane.b32.xlu0 %v10307_v57, %s7161_s27  ;;  %v8075_v53 = vpop.permute.xlu1 %5859  ;;  %v622_v39 = vrot.slane %v8128_v42, 2  ;;  %v7100_v1 = vld [vmem:[%s7231_s14 + $0x48] sm:$0xff]  ;;  %v5777_v23 = vunpack.i.h.bf16 %v7971_v56 }
  0xec   : > { %v8079_v20 = vsel %vm1458_vm5, %v7966_v63, %v5846_v54  ;;  %v8083_v37 = vsel %vm1458_vm5, %v7969_v11, %v5847_v60  ;;  %v384_v11 = vld [vmem:[%s7231_s14 + $0x190] sm:$0x3]  ;;  %v608_v60 = vsel %vm517_vm1, %v606_v48, %v607_v29  ;;  %v5616_v48 = vunpack.i.l.bf16 %v7770_v4 }
  0xed   : > { %10319 = vst [vmem:[#allocation24_spill] sm:$0xff] %v8079_v20  ;;  %10320 = vst [vmem:[#allocation25_spill] sm:$0xff] %v8083_v37  ;;  %v8085_v30 = vpop.permute.xlu0 %5854  ;;  %6149 = vrot.lane.b32.xlu1 %v7629_v62, %s7162_s28  ;;  %v604_v32 = vrot.slane %v384_v11, 1  ;;  %v609_v13 = vrot.slane %v384_v11, 2  ;;  %v5627_v11 = vunpack.i.h.bf16 %v7768_v46 }
  0xef   : > { %6144 = vrot.lane.b32.xlu0 %v7631_v6, %s7162_s28  ;;  %v8091_v18 = vpop.permute.xlu1 %5869  ;;  %v7091_v6 = vld [vmem:[%s7231_s14 + $0x168] sm:$0xff]  ;;  %v610_v54 = vsel %vm517_vm1, %v607_v29, %v609_v13  ;;  %v5617_v29 = vunpack.i.h.bf16 %v7770_v4  ;;  %v5631_v13 = vunpack.i.l.bf16 %v7779_v22 }
  0xf0   : > { %v6178_v21 = vpack.i.bf16 %v7092_v51, %v7091_v6  ;;  %v615_v6 = vrot.slane %v8125_v16, 1  ;;  %v614_v51 = vrot.slane %v8122_v12, 1 }
  0xf1   : > { %v8093_v57 = vpop.permute.xlu0 %5864  ;;  %6159 = vrot.lane.b32.xlu1 %v10321_v27, %s7158_s18  ;;  %v8193_v34 = vsel %vm1392_vm3, %v7100_v1, %v5631_v13  ;;  %v5696_v1 = vunpack.i.l.bf16 %v7833_v3  ;;  %v7102_v13 = vld [vmem:[%s7231_s14 + $0x18] sm:$0xff] }
  0xf2   : > { %v8166_v22 = vsel %vm436_vm0, %v614_v51, %v615_v6  ;;  %v619_v51 = vrot.slane %v8122_v12, 2 }
  0xf3   : > { %6154 = vrot.lane.b32.xlu0 %v10316_v10, %s7158_s18  ;;  %v8099_v63 = vpop.permute.xlu1 %5879 }
  0xf5   : > { %v8102_v15 = vpop.permute.xlu0 %5874  ;;  %6169 = vrot.lane.b32.xlu1 %v7655_v14, %s7159_s21 }
  0xf7   : > { %6164 = vrot.lane.b32.xlu0 %v7629_v62, %s7159_s21  ;;  %v8114_v0 = vpop.permute.xlu1 %5889  ;;  %v605_v62 = vsel %vm436_vm0, %v602_v26, %v604_v32  ;;  %v10322_v32 = vld [vmem:[#allocation20_spill] sm:$0xff] }
  0xf8   : > { %v8146_v52 = vpack.i.bf16 %v605_v62, %v603_v36  ;;  %v7095_v62 = vld [vmem:[%s7231_s14 + $0x38] sm:$0xff]  ;;  %v5621_v36 = vunpack.i.l.bf16 %v7781_v58 }
  0xf9   : > { %v8118_v50 = vpop.permute.xlu0 %5884  ;;  %6179 = vrot.lane.b32.xlu1 %v6178_v21, %s7160_s24  ;;  %v617_v21 = vrot.slane %v8128_v42, 1  ;;  %v8162_v4 = vsel %vm1392_vm3, %v7095_v62, %v5627_v11  ;;  %v620_v11 = vrot.slane %v8125_v16, 2  ;;  %v7097_v62 = vld [vmem:[%s7231_s14 + $0x8] sm:$0xff]  ;;  %v5697_v42 = vunpack.i.h.bf16 %v7833_v3 }
  0xfa   : > { %v5856_v3 = vunpack.i.l.bf16 %v8085_v30 }
  0xfb   : > { %6174 = vrot.lane.b32.xlu0 %v6173_v43, %s7160_s24  ;;  %v8133_v10 = vpop.permute.xlu1 %5899  ;;  %v8151_v43 = vpack.i.bf16 %v610_v54, %v608_v60  ;;  %v5622_v60 = vunpack.i.h.bf16 %v7781_v58  ;;  %v7096_v54 = vld [vmem:[%s7231_s14 + $0x30] sm:$0xff] }
  0xfc   : > { %v8173_v37 = vsel %vm1392_vm3, %v7096_v54, %v5626_v45  ;;  %v7099_v54 = vld [vmem:[%s7231_s14 + $0x50] sm:$0xff] }
  0xfd   : > { %v8142_v26 = vpop.permute.xlu0 %5894  ;;  %6189 = vrot.lane.b32.xlu1 %v10322_v32, %s7161_s27  ;;  %v8188_v58 = vsel %vm1392_vm3, %v7099_v54, %v5632_v40  ;;  %v7101_v40 = vld [vmem:[%s7231_s14 + $0x20] sm:$0xff]  ;;  %v5776_v54 = vunpack.i.l.bf16 %v7971_v56 }
  0xff   : > { %6184 = vrot.lane.b32.xlu0 %v10321_v27, %s7161_s27  ;;  %v8156_v46 = vpop.permute.xlu1 %5909  ;;  %v8169_v27 = vsel %vm436_vm0, %v615_v6, %v617_v21  ;;  %v1394_v6 = vsel %vm1392_vm3, %v7097_v62, %v5617_v29  ;;  %v7098_v21 = vld [vmem:[%s7231_s14] sm:$0xff]  ;;  %v1396_v62 = vsel %vm1392_vm3, %v7101_v40, %v5622_v60  ;;  %v5781_v60 = vunpack.i.l.bf16 %v7963_v38 }
 0x100   : > { %v1393_v45 = vsel %vm1392_vm3, %v7098_v21, %v5616_v48  ;;  %v1395_v21 = vsel %vm1392_vm3, %v7102_v13, %v5621_v36  ;;  %v8212_v48 = vsel %vm517_vm1, %v619_v51, %v620_v11  ;;  %v5857_v40 = vunpack.i.h.bf16 %v8085_v30 }
 0x101   : > { %v8176_v20 = vpop.permute.xlu0 %5904  ;;  %6199 = vrot.lane.b32.xlu1 %v7651_v33, %s7162_s28  ;;  %v8218_v36 = vsel %vm517_vm1, %v620_v11, %v622_v39  ;;  %v1428_v13 = vsel %vm1425_vm4, %v1395_v21, %v5701_v17  ;;  %v1429_v56 = vsel %vm1425_vm4, %v1396_v62, %v5702_v61  ;;  %v5912_v55 = vunpack.i.h.bf16 %v8156_v46 }
 0x102   : > { %v5911_v44 = vunpack.i.l.bf16 %v8156_v46  ;;  %v1426_v31 = vsel %vm1425_vm4, %v1393_v45, %v5696_v1  ;;  %v1427_v30 = vsel %vm1425_vm4, %v1394_v6, %v5697_v42  ;;  %v5782_v46 = vunpack.i.h.bf16 %v7963_v38 }
 0x103   : > { %6194 = vrot.lane.b32.xlu0 %v7655_v14, %s7162_s28  ;;  %v5920_v29 = vpop.permute.xlu1 %5919  ;;  %v1459_v39 = vsel %vm1458_vm5, %v1426_v31, %v5776_v54  ;;  %v1460_v17 = vsel %vm1458_vm5, %v1427_v30, %v5777_v23  ;;  %v5861_v31 = vunpack.i.l.bf16 %v8075_v53 }
 0x104   : > { %v5922_v59 = vunpack.i.h.bf16 %v5920_v29  ;;  %v5921_v28 = vunpack.i.l.bf16 %v5920_v29  ;;  %v1492_v45 = vsel %vm1491_vm6, %v1459_v39, %v5856_v3  ;;  %v1493_v6 = vsel %vm1491_vm6, %v1460_v17, %v5857_v40 }
 0x105   : > { %v5915_v14 = vpop.permute.xlu0 %5914  ;;  %6209 = vrot.lane.b32.xlu1 %v8146_v52, %s7158_s18  ;;  %v5862_v29 = vunpack.i.h.bf16 %v8075_v53  ;;  %v1525_v42 = vsel %vm1524_vm7, %v1492_v45, %v5911_v44  ;;  %v1526_v1 = vsel %vm1524_vm7, %v1493_v6, %v5912_v55  ;;  %v10323_v53 = vpack.i.bf16 %v8125_v16, %v8122_v12 }
 0x106   : > { %v1558_v54 = vsel %vm1557_vm8, %v1525_v42, %v5921_v28  ;;  %v5917_v3 = vunpack.i.h.bf16 %v5915_v14  ;;  %v5916_v40 = vunpack.i.l.bf16 %v5915_v14  ;;  %v5642_v16 = vunpack.i.h.bf16 %v7789_v24 }
 0x107   : > { %6204 = vrot.lane.b32.xlu0 %v10322_v32, %s7158_s18  ;;  %v5930_v51 = vpop.permute.xlu1 %5929  ;;  %v1461_v32 = vsel %vm1458_vm5, %v1428_v13, %v5781_v60  ;;  %v1559_v60 = vsel %vm1557_vm8, %v1526_v1, %v5922_v59  ;;  %v1462_v59 = vsel %vm1458_vm5, %v1429_v56, %v5782_v46  ;;  %v10324_v46 = vpack.i.bf16 %v8169_v27, %v8166_v22  ;;  %v10325_v1 = vld [vmem:[#allocation14_spill] sm:$0xff]  ;;  %s7164_s18 = smov 64  }
 0x108   : > { %v5932_v11 = vunpack.i.h.bf16 %v5930_v51  ;;  %v5931_v61 = vunpack.i.l.bf16 %v5930_v51 }
 0x109   : > { %v5925_v62 = vpop.permute.xlu0 %5924  ;;  %6219 = vrot.lane.b32.xlu1 %v8151_v43, %s7159_s21 }
 0x10a   : > { %v1591_v44 = vsel %vm1590_vm9, %v1558_v54, %v5931_v61  ;;  %v1592_v55 = vsel %vm1590_vm9, %v1559_v60, %v5932_v11  ;;  %v5926_v51 = vunpack.i.l.bf16 %v5925_v62  ;;  %v1494_v61 = vsel %vm1491_vm6, %v1461_v32, %v5861_v31  ;;  %v10326_v54 = vld [vmem:[#allocation16_spill] sm:$0xff] }
 0x10b   : > { %6214 = vrot.lane.b32.xlu0 %v7651_v33, %s7159_s21  ;;  %v5940_v21 = vpop.permute.xlu1 %5939  ;;  %v5927_v33 = vunpack.i.h.bf16 %v5925_v62  ;;  %v1495_v11 = vsel %vm1491_vm6, %v1462_v59, %v5862_v29  ;;  %v5641_v62 = vunpack.i.l.bf16 %v7789_v24  ;;  %v1527_v45 = vsel %vm1524_vm7, %v1494_v61, %v5916_v40  ;;  %v10327_v40 = vld [vmem:[#allocation10_spill] sm:$0xff] }
 0x10c   : > { %v5942_v23 = vunpack.i.h.bf16 %v5940_v21  ;;  %v5941_v38 = vunpack.i.l.bf16 %v5940_v21  ;;  %v1528_v6 = vsel %vm1524_vm7, %v1495_v11, %v5917_v3  ;;  %v1560_v32 = vsel %vm1557_vm8, %v1527_v45, %v5926_v51 }
 0x10d   : > { %v5935_v13 = vpop.permute.xlu0 %5934  ;;  %6229 = vrot.lane.b32.xlu1 %v10323_v53, %s7160_s24  ;;  %v1561_v29 = vsel %vm1557_vm8, %v1528_v6, %v5927_v33  ;;  %v5712_v21 = vunpack.i.h.bf16 %v10325_v1  ;;  %v5787_v53 = vunpack.i.h.bf16 %v7979_v2  ;;  %v5636_v33 = vunpack.i.l.bf16 %v10327_v40 }
 0x10e   : > { %v1624_v30 = vsel %vm1623_vm10, %v1591_v44, %v5941_v38  ;;  %v1625_v28 = vsel %vm1623_vm10, %v1592_v55, %v5942_v23  ;;  %v5937_v39 = vunpack.i.h.bf16 %v5935_v13  ;;  %v5936_v14 = vunpack.i.l.bf16 %v5935_v13 }
 0x10f   : > { %6224 = vrot.lane.b32.xlu0 %v7737_v49, %s7160_s24  ;;  %v5950_v17 = vpop.permute.xlu1 %5949  ;;  %v1656_v12 = vpack.c.bf16 %v1625_v28, %v1624_v30  ;;  %v6248_v49 = vpack.i.bf16 %v8218_v36, %v8212_v48  ;;  %v5711_v23 = vunpack.i.l.bf16 %v10325_v1  ;;  %v5707_v48 = vunpack.i.h.bf16 %v10326_v54 }
 0x110   : > { %v1593_v38 = vsel %vm1590_vm9, %v1560_v32, %v5936_v14  ;;  %v1594_v22 = vsel %vm1590_vm9, %v1561_v29, %v5937_v39  ;;  %v5706_v36 = vunpack.i.l.bf16 %v10326_v54  ;;  %v5637_v13 = vunpack.i.h.bf16 %v10327_v40 }
 0x111   : > { %v5945_v56 = vpop.permute.xlu0 %5944  ;;  %6239 = vrot.lane.b32.xlu1 %v10324_v46, %s7161_s27  ;;  %5367 = vmatprep.mubr.msk.bf16.mxu0 %vm1692_vm11, %v1656_v12  ;;  %v5786_v44 = vunpack.i.l.bf16 %v7979_v2  ;;  %v5791_v51 = vunpack.i.l.bf16 %v7977_v47  ;;  %v5867_v30 = vunpack.i.h.bf16 %v8093_v57  ;;  %v5866_v28 = vunpack.i.l.bf16 %v8093_v57 }
 0x112   : > { %v5947_v31 = vunpack.i.h.bf16 %v5945_v56  ;;  %v5946_v42 = vunpack.i.l.bf16 %v5945_v56  ;;  %v1433_v59 = vsel %vm1425_vm4, %v8188_v58, %v5712_v21  ;;  %v1432_v39 = vsel %vm1425_vm4, %v8193_v34, %v5711_v23 }
 0x113   : > { %6234 = vrot.lane.b32.xlu0 %v8146_v52, %s7161_s27  ;;  %v5960_v27 = vpop.permute.xlu1 %5959  ;;  %v5952_v2 = vunpack.i.h.bf16 %v5950_v17  ;;  %v5951_v14 = vunpack.i.l.bf16 %v5950_v17  ;;  %v1431_v61 = vsel %vm1425_vm4, %v8162_v4, %v5707_v48  ;;  %v1430_v57 = vsel %vm1425_vm4, %v8173_v37, %v5706_v36 }
 0x114   : > { %v1626_v60 = vsel %vm1623_vm10, %v1593_v38, %v5946_v42  ;;  %v1627_v3 = vsel %vm1623_vm10, %v1594_v22, %v5947_v31  ;;  %v5962_v11 = vunpack.i.h.bf16 %v5960_v27  ;;  %v5961_v45 = vunpack.i.l.bf16 %v5960_v27 }
 0x115   : > { %v8283_v55 = vpop.permute.xlu0 %5954  ;;  %6249 = vrot.lane.b32.xlu1 %v6248_v49, %s7162_s28  ;;  %v1657_v52 = vpack.c.bf16 %v1627_v3, %v1626_v60  ;;  %v1463_v58 = vsel %vm1458_vm5, %v1430_v57, %v5786_v44  ;;  %v1464_v34 = vsel %vm1458_vm5, %v1431_v61, %v5787_v53  ;;  %v1465_v46 = vsel %vm1458_vm5, %v1432_v39, %v5791_v51  ;;  %v7106_v61 = vld [vmem:[%s7231_s14 + $0x60] sm:$0xff] }
 0x116   : > { %v1496_v49 = vsel %vm1491_vm6, %v1463_v58, %v5866_v28  ;;  %v1497_v4 = vsel %vm1491_vm6, %v1464_v34, %v5867_v30  ;;  %v5872_v32 = vunpack.i.h.bf16 %v8091_v18  ;;  %v5871_v37 = vunpack.i.l.bf16 %v8091_v18  ;;  %v7104_v28 = vld [vmem:[%s7231_s14 + $0x78] sm:$0xff] }
 0x117   : > { %6244 = vrot.lane.b32.xlu0 %v8151_v43, %s7162_s28  ;;  %5368 = vmatmul.mubr.msk.bf16.vlgmr.msra.gmra.mrb[0].mxu0 %vm1692_vm11, %v1657_v52  ;;  %v5970_v12 = vpop.permute.xlu1 %5969  ;;  %v5792_v43 = vunpack.i.h.bf16 %v7977_v47  ;;  %v1529_v29 = vsel %vm1524_vm7, %v1496_v49, %v5951_v14  ;;  %v1530_v31 = vsel %vm1524_vm7, %v1497_v4, %v5952_v2  ;;  %v5957_v38 = vunpack.i.h.bf16 %v8283_v55 }
 0x118   : > { %v5972_v6 = vunpack.i.h.bf16 %v5970_v12  ;;  %v5971_v17 = vunpack.i.l.bf16 %v5970_v12  ;;  %v1562_v1 = vsel %vm1557_vm8, %v1529_v29, %v5961_v45  ;;  %v1563_v21 = vsel %vm1557_vm8, %v1530_v31, %v5962_v11  ;;  %v7105_v12 = vld [vmem:[%s7231_s14 + $0x68] sm:$0xff]  ;;  %v10330_v29 = vld [vmem:[#allocation11_spill] sm:$0xff] }
 0x119   : > { %v5965_v56 = vpop.permute.xlu0 %5964  ;;  %v5956_v22 = vunpack.i.l.bf16 %v8283_v55  ;;  %v1466_v40 = vsel %vm1458_vm5, %v1433_v59, %v5792_v43  ;;  %v7103_v55 = vld [vmem:[%s7231_s14 + $0x80] sm:$0xff]  ;;  %v1403_v39 = vsel %vm1392_vm3, %v7104_v28, %v5641_v62  ;;  %v1498_v2 = vsel %vm1491_vm6, %v1465_v46, %v5871_v37  ;;  %v10329_v46 = vld [vmem:[#allocation5_spill] sm:$0xff] }
 0x11a   : > { %v1595_v27 = vsel %vm1590_vm9, %v1562_v1, %v5971_v17  ;;  %v1596_v18 = vsel %vm1590_vm9, %v1563_v21, %v5972_v6  ;;  %v5967_v48 = vunpack.i.h.bf16 %v5965_v56  ;;  %v5966_v36 = vunpack.i.l.bf16 %v5965_v56  ;;  %v10328_v6 = vld [vmem:[#allocation3_spill] sm:$0xff] }
 0x11b   : > { %v5980_v42 = vpop.permute.xlu1 %5979  ;;  %v1404_v30 = vsel %vm1392_vm3, %v7103_v55, %v5642_v16  ;;  %v1499_v14 = vsel %vm1491_vm6, %v1466_v40, %v5872_v32  ;;  %v1402_v59 = vsel %vm1392_vm3, %v7105_v12, %v5637_v13  ;;  %v1401_v57 = vsel %vm1392_vm3, %v7106_v61, %v5636_v33 }
 0x11c   : > { %v5982_v47 = vunpack.i.h.bf16 %v5980_v42  ;;  %v5981_v23 = vunpack.i.l.bf16 %v5980_v42  ;;  %v1532_v11 = vsel %vm1524_vm7, %v1499_v14, %v5957_v38  ;;  %v1531_v45 = vsel %vm1524_vm7, %v1498_v2, %v5956_v22 }
 0x11d   : > { %v5975_v54 = vpop.permute.xlu0 %5974  ;;  %v1564_v24 = vsel %vm1557_vm8, %v1531_v45, %v5966_v36  ;;  %v1565_v62 = vsel %vm1557_vm8, %v1532_v11, %v5967_v48  ;;  %v5722_v17 = vunpack.i.h.bf16 %v10328_v6  ;;  %v5721_v13 = vunpack.i.l.bf16 %v10328_v6 }
 0x11e   : > { %v1628_v60 = vsel %vm1623_vm10, %v1595_v27, %v5981_v23  ;;  %v1629_v3 = vsel %vm1623_vm10, %v1596_v18, %v5982_v47  ;;  %v5977_v53 = vunpack.i.h.bf16 %v5975_v54  ;;  %v5976_v44 = vunpack.i.l.bf16 %v5975_v54 }
 0x11f   : > { %v5990_v52 = vpop.permute.xlu1 %5989  ;;  %v1658_v51 = vpack.c.bf16 %v1629_v3, %v1628_v60  ;;  %v5717_v49 = vunpack.i.h.bf16 %v10329_v46  ;;  %v5716_v4 = vunpack.i.l.bf16 %v10329_v46  ;;  %v5652_v31 = vunpack.i.h.bf16 %v10330_v29 }
 0x120   : > { %v1597_v56 = vsel %vm1590_vm9, %v1564_v24, %v5976_v44  ;;  %v1598_v33 = vsel %vm1590_vm9, %v1565_v62, %v5977_v53  ;;  %v5797_v42 = vunpack.i.h.bf16 %v7987_v5  ;;  %v5796_v1 = vunpack.i.l.bf16 %v7987_v5 }
 0x121   : > { %v5985_v16 = vpop.permute.xlu0 %5984  ;;  %5371 = vmatprep.mubr.msk.bf16.mxu0 %vm1692_vm11, %v1658_v51  ;;  %v5651_v23 = vunpack.i.l.bf16 %v10330_v29  ;;  %v5801_v38 = vunpack.i.l.bf16 %v7985_v19  ;;  %v5877_v22 = vunpack.i.h.bf16 %v8102_v15  ;;  %v5876_v27 = vunpack.i.l.bf16 %v8102_v15  ;;  %v7108_v29 = vld [vmem:[%s7231_s14 + $0xa8] sm:$0xff] }
 0x122   : > { %v5987_v58 = vunpack.i.h.bf16 %v5985_v16  ;;  %v5986_v34 = vunpack.i.l.bf16 %v5985_v16  ;;  %v1437_v18 = vsel %vm1425_vm4, %v1404_v30, %v5722_v17  ;;  %v1436_v54 = vsel %vm1425_vm4, %v1403_v39, %v5721_v13 }
 0x123   : > { %v6000_v43 = vpop.permute.xlu1 %5999  ;;  %v5992_v48 = vunpack.i.h.bf16 %v5990_v52  ;;  %v5991_v36 = vunpack.i.l.bf16 %v5990_v52  ;;  %v1434_v5 = vsel %vm1425_vm4, %v1401_v57, %v5716_v4  ;;  %v1435_v3 = vsel %vm1425_vm4, %v1402_v59, %v5717_v49 }
 0x124   : > { %v1630_v32 = vsel %vm1623_vm10, %v1597_v56, %v5986_v34  ;;  %v1631_v37 = vsel %vm1623_vm10, %v1598_v33, %v5987_v58  ;;  %v6002_v40 = vunpack.i.h.bf16 %v6000_v43  ;;  %v6001_v53 = vunpack.i.l.bf16 %v6000_v43 }
 0x125   : > { %v5995_v21 = vpop.permute.xlu0 %5994  ;;  %v1659_v47 = vpack.c.bf16 %v1631_v37, %v1630_v32  ;;  %v1467_v44 = vsel %vm1458_vm5, %v1434_v5, %v5796_v1  ;;  %v1468_v51 = vsel %vm1458_vm5, %v1435_v3, %v5797_v42  ;;  %v5802_v28 = vunpack.i.h.bf16 %v7985_v19  ;;  %v7107_v32 = vld [vmem:[%s7231_s14 + $0xb0] sm:$0xff] }
 0x126   : > { %v1469_v52 = vsel %vm1458_vm5, %v1436_v54, %v5801_v38  ;;  %v1500_v39 = vsel %vm1491_vm6, %v1467_v44, %v5876_v27  ;;  %v1501_v2 = vsel %vm1491_vm6, %v1468_v51, %v5877_v22  ;;  %v5882_v14 = vunpack.i.h.bf16 %v8099_v63  ;;  %v10333_v51 = vld [vmem:[#allocation4_spill] sm:$0xff] }
 0x127   : > { %5372 = vmatmul.mubr.msk.bf16.gmra.mrb[4].mxu0 %vm1692_vm11, %v1659_v47  ;;  %v6010_v60 = vpop.permute.xlu1 %6009  ;;  %v5881_v12 = vunpack.i.l.bf16 %v8099_v63  ;;  %v1533_v59 = vsel %vm1524_vm7, %v1500_v39, %v5991_v36  ;;  %v1534_v61 = vsel %vm1524_vm7, %v1501_v2, %v5992_v48  ;;  %v5997_v24 = vunpack.i.h.bf16 %v5995_v21  ;;  %v10331_v47 = vld [vmem:[#allocation12_spill] sm:$0xff] }
 0x128   : > { %v6012_v15 = vunpack.i.h.bf16 %v6010_v60  ;;  %v6011_v55 = vunpack.i.l.bf16 %v6010_v60  ;;  %v1566_v11 = vsel %vm1557_vm8, %v1533_v59, %v6001_v53  ;;  %v1567_v45 = vsel %vm1557_vm8, %v1534_v61, %v6002_v40  ;;  %v10332_v60 = vld [vmem:[#allocation7_spill] sm:$0xff]  ;;  %v7110_v61 = vld [vmem:[%s7231_s14 + $0x90] sm:$0xff] }
 0x129   : > { %v6005_v30 = vpop.permute.xlu0 %6004  ;;  %v5996_v62 = vunpack.i.l.bf16 %v5995_v21  ;;  %v1470_v33 = vsel %vm1458_vm5, %v1437_v18, %v5802_v28  ;;  %v1408_v37 = vsel %vm1392_vm3, %v7107_v32, %v5652_v31  ;;  %v1407_v42 = vsel %vm1392_vm3, %v7108_v29, %v5651_v23 }
 0x12a   : > { %v1599_v58 = vsel %vm1590_vm9, %v1566_v11, %v6011_v55  ;;  %v1600_v34 = vsel %vm1590_vm9, %v1567_v45, %v6012_v15  ;;  %v6007_v6 = vunpack.i.h.bf16 %v6005_v30  ;;  %v6006_v17 = vunpack.i.l.bf16 %v6005_v30 }
 0x12b   : > { %v6020_v57 = vpop.permute.xlu1 %6019  ;;  %v1502_v1 = vsel %vm1491_vm6, %v1469_v52, %v5881_v12  ;;  %v1503_v21 = vsel %vm1491_vm6, %v1470_v33, %v5882_v14  ;;  %v5647_v38 = vunpack.i.h.bf16 %v10331_v47  ;;  %v5646_v22 = vunpack.i.l.bf16 %v10331_v47  ;;  %v7109_v52 = vld [vmem:[%s7231_s14 + $0x98] sm:$0xff] }
 0x12c   : > { %v6022_v19 = vunpack.i.h.bf16 %v6020_v57  ;;  %v6021_v16 = vunpack.i.l.bf16 %v6020_v57  ;;  %v1536_v27 = vsel %vm1524_vm7, %v1503_v21, %v5997_v24  ;;  %v1535_v18 = vsel %vm1524_vm7, %v1502_v1, %v5996_v62 }
 0x12d   : > { %v6015_v63 = vpop.permute.xlu0 %6014  ;;  %v1568_v31 = vsel %vm1557_vm8, %v1535_v18, %v6006_v17  ;;  %v1569_v23 = vsel %vm1557_vm8, %v1536_v27, %v6007_v6  ;;  %v5732_v5 = vunpack.i.h.bf16 %v10332_v60  ;;  %v5731_v3 = vunpack.i.l.bf16 %v10332_v60 }
 0x12e   : > { %v1632_v13 = vsel %vm1623_vm10, %v1599_v58, %v6021_v16  ;;  %v1633_v56 = vsel %vm1623_vm10, %v1600_v34, %v6022_v19  ;;  %v6017_v43 = vunpack.i.h.bf16 %v6015_v63  ;;  %v6016_v46 = vunpack.i.l.bf16 %v6015_v63 }
 0x12f   : > { %v6030_v49 = vpop.permute.xlu1 %6029  ;;  %v1660_v4 = vpack.c.bf16 %v1633_v56, %v1632_v13  ;;  %v5727_v15 = vunpack.i.h.bf16 %v10333_v51  ;;  %v5726_v55 = vunpack.i.l.bf16 %v10333_v51  ;;  %v1406_v39 = vsel %vm1392_vm3, %v7109_v52, %v5647_v38 }
 0x130   : > { %v1601_v40 = vsel %vm1590_vm9, %v1568_v31, %v6016_v46  ;;  %v1602_v53 = vsel %vm1590_vm9, %v1569_v23, %v6017_v43  ;;  %v5807_v2 = vunpack.i.h.bf16 %v7995_v41  ;;  %v5806_v14 = vunpack.i.l.bf16 %v7995_v41 }
 0x131   : > { %v6025_v54 = vpop.permute.xlu0 %6024  ;;  %5375 = vmatprep.mubr.msk.bf16.mxu0 %vm1692_vm11, %v1660_v4  ;;  %v1405_v57 = vsel %vm1392_vm3, %v7110_v61, %v5646_v22  ;;  %v5811_v11 = vunpack.i.l.bf16 %v7993_v35  ;;  %v5887_v45 = vunpack.i.h.bf16 %v8118_v50  ;;  %v5886_v19 = vunpack.i.l.bf16 %v8118_v50 }
 0x132   : > { %v6027_v48 = vunpack.i.h.bf16 %v6025_v54  ;;  %v6026_v36 = vunpack.i.l.bf16 %v6025_v54  ;;  %v1441_v16 = vsel %vm1425_vm4, %v1408_v37, %v5732_v5  ;;  %v1440_v24 = vsel %vm1425_vm4, %v1407_v42, %v5731_v3 }
 0x133   : > { %v6040_v44 = vpop.permute.xlu1 %6039  ;;  %v6032_v62 = vunpack.i.h.bf16 %v6030_v49  ;;  %v6031_v58 = vunpack.i.l.bf16 %v6030_v49  ;;  %v1438_v34 = vsel %vm1425_vm4, %v1405_v57, %v5726_v55  ;;  %v1439_v63 = vsel %vm1425_vm4, %v1406_v39, %v5727_v15 }
 0x134   : > { %v1634_v30 = vsel %vm1623_vm10, %v1601_v40, %v6026_v36  ;;  %v1635_v28 = vsel %vm1623_vm10, %v1602_v53, %v6027_v48  ;;  %v6042_v6 = vunpack.i.h.bf16 %v6040_v44  ;;  %v6041_v17 = vunpack.i.l.bf16 %v6040_v44 }
 0x135   : > { %v6035_v12 = vpop.permute.xlu0 %6034  ;;  %v1661_v59 = vpack.c.bf16 %v1635_v28, %v1634_v30  ;;  %v1471_v13 = vsel %vm1458_vm5, %v1438_v34, %v5806_v14  ;;  %v1472_v56 = vsel %vm1458_vm5, %v1439_v63, %v5807_v2  ;;  %v5812_v46 = vunpack.i.h.bf16 %v7993_v35 }
 0x136   : > { %v1473_v49 = vsel %vm1458_vm5, %v1440_v24, %v5811_v11  ;;  %v1504_v4 = vsel %vm1491_vm6, %v1471_v13, %v5886_v19  ;;  %v1505_v32 = vsel %vm1491_vm6, %v1472_v56, %v5887_v45  ;;  %v5892_v37 = vunpack.i.h.bf16 %v8114_v0 }
 0x137   : > { %5376 = vmatmul.mubr.msk.bf16.gmra.mrb[8].mxu0 %vm1692_vm11, %v1661_v59  ;;  %v6050_v41 = vpop.permute.xlu1 %6049  ;;  %v5891_v29 = vunpack.i.l.bf16 %v8114_v0  ;;  %v1537_v42 = vsel %vm1524_vm7, %v1504_v4, %v6031_v58  ;;  %v1538_v1 = vsel %vm1524_vm7, %v1505_v32, %v6032_v62  ;;  %v6037_v27 = vunpack.i.h.bf16 %v6035_v12 }
 0x138   : > { %v6052_v50 = vunpack.i.h.bf16 %v6050_v41  ;;  %v6051_v33 = vunpack.i.l.bf16 %v6050_v41  ;;  %v1570_v47 = vsel %vm1557_vm8, %v1537_v42, %v6041_v17  ;;  %v1571_v38 = vsel %vm1557_vm8, %v1538_v1, %v6042_v6 }
 0x139   : > { %v6045_v43 = vpop.permute.xlu0 %6044  ;;  %v6036_v18 = vunpack.i.l.bf16 %v6035_v12  ;;  %v1474_v5 = vsel %vm1458_vm5, %v1441_v16, %v5812_v46  ;;  %v1506_v51 = vsel %vm1491_vm6, %v1473_v49, %v5891_v29  ;;  %v5897_v16 = vunpack.i.h.bf16 %v8142_v26 }
 0x13a   : > { %v1603_v54 = vsel %vm1590_vm9, %v1570_v47, %v6051_v33  ;;  %v1604_v31 = vsel %vm1590_vm9, %v1571_v38, %v6052_v50  ;;  %v6047_v48 = vunpack.i.h.bf16 %v6045_v43  ;;  %v6046_v0 = vunpack.i.l.bf16 %v6045_v43 }
 0x13b   : > { %v6060_v21 = vpop.permute.xlu1 %6059  ;;  %v1507_v15 = vsel %vm1491_vm6, %v1474_v5, %v5892_v37  ;;  %v1539_v30 = vsel %vm1524_vm7, %v1506_v51, %v6036_v18  ;;  %v5896_v24 = vunpack.i.l.bf16 %v8142_v26  ;;  %v1509_v50 = vsel %vm1491_vm6, %v8019_v7, %v5897_v16  ;;  %v10335_v16 = vld [vmem:[#allocation6_spill] sm:$0xff] }
 0x13c   : > { %v6062_v35 = vunpack.i.h.bf16 %v6060_v21  ;;  %v6061_v22 = vunpack.i.l.bf16 %v6060_v21  ;;  %v1540_v55 = vsel %vm1524_vm7, %v1507_v15, %v6037_v27  ;;  %v1572_v52 = vsel %vm1557_vm8, %v1539_v30, %v6046_v0 }
 0x13d   : > { %v6055_v23 = vpop.permute.xlu0 %6054  ;;  %v1573_v39 = vsel %vm1557_vm8, %v1540_v55, %v6047_v48  ;;  %v1508_v56 = vsel %vm1491_vm6, %v8015_v9, %v5896_v24  ;;  %v5902_v33 = vunpack.i.h.bf16 %v8133_v10  ;;  %v5901_v26 = vunpack.i.l.bf16 %v8133_v10 }
 0x13e   : > { %v1636_v36 = vsel %vm1623_vm10, %v1603_v54, %v6061_v22  ;;  %v1637_v60 = vsel %vm1623_vm10, %v1604_v31, %v6062_v35  ;;  %v6057_v3 = vunpack.i.h.bf16 %v6055_v23  ;;  %v6056_v40 = vunpack.i.l.bf16 %v6055_v23 }
 0x13f   : > { %v6070_v53 = vpop.permute.xlu1 %6069  ;;  %v1662_v44 = vpack.c.bf16 %v1637_v60, %v1636_v36  ;;  %v1510_v31 = vsel %vm1491_vm6, %v8005_v25, %v5901_v26  ;;  %v1511_v23 = vsel %vm1491_vm6, %v8009_v8, %v5902_v33 }
 0x140   : > { %v1605_v12 = vsel %vm1590_vm9, %v1572_v52, %v6056_v40  ;;  %v1606_v59 = vsel %vm1590_vm9, %v1573_v39, %v6057_v3  ;;  %v6072_v62 = vunpack.i.h.bf16 %v6070_v53  ;;  %v6071_v58 = vunpack.i.l.bf16 %v6070_v53 }
 0x141   : > { %v6065_v28 = vpop.permute.xlu0 %6064  ;;  %5379 = vmatprep.mubr.msk.bf16.mxu0 %vm1692_vm11, %v1662_v44 }
 0x142   : > { %v6067_v2 = vunpack.i.h.bf16 %v6065_v28  ;;  %v6066_v14 = vunpack.i.l.bf16 %v6065_v28  ;;  %v1541_v43 = vsel %vm1524_vm7, %v1508_v56, %v6071_v58  ;;  %v1542_v46 = vsel %vm1524_vm7, %v1509_v50, %v6072_v62  ;;  %v10337_v56 = vld [vmem:[#allocation8_spill] sm:$0xff] }
 0x143   : > { %v6080_v61 = vpop.permute.xlu1 %6079 }
 0x144   : > { %v1638_v57 = vsel %vm1623_vm10, %v1605_v12, %v6066_v14  ;;  %v1639_v11 = vsel %vm1623_vm10, %v1606_v59, %v6067_v2  ;;  %v6082_v34 = vunpack.i.h.bf16 %v6080_v61  ;;  %v6081_v63 = vunpack.i.l.bf16 %v6080_v61 }
 0x145   : > { %v6075_v45 = vpop.permute.xlu0 %6074  ;;  %v1663_v19 = vpack.c.bf16 %v1639_v11, %v1638_v57  ;;  %v5907_v2 = vunpack.i.h.bf16 %v8176_v20  ;;  %v5906_v14 = vunpack.i.l.bf16 %v8176_v20 }
 0x146   : > { %v1574_v4 = vsel %vm1557_vm8, %v1541_v43, %v6081_v63  ;;  %v1575_v32 = vsel %vm1557_vm8, %v1542_v46, %v6082_v34  ;;  %v6077_v42 = vunpack.i.h.bf16 %v6075_v45  ;;  %v6076_v9 = vunpack.i.l.bf16 %v6075_v45  ;;  %v10334_v45 = vld [vmem:[#allocation9_spill] sm:$0xff] }
 0x147   : > { %5380 = vmatmul.mubr.msk.bf16.gmra.mrb[12].mxu0 %vm1692_vm11, %v1663_v19  ;;  %v6090_v41 = vpop.permute.xlu1 %6089  ;;  %v1513_v50 = vsel %vm1491_vm6, %v10337_v56, %v5907_v2 }
 0x148   : > { %v6092_v6 = vunpack.i.h.bf16 %v6090_v41  ;;  %v6091_v17 = vunpack.i.l.bf16 %v6090_v41  ;;  %v1544_v48 = vsel %vm1524_vm7, %v1511_v23, %v6077_v42  ;;  %v1543_v0 = vsel %vm1524_vm7, %v1510_v31, %v6076_v9 }
 0x149   : > { %v6085_v13 = vpop.permute.xlu0 %6084 }
 0x14a   : > { %v1607_v1 = vsel %vm1590_vm9, %v1574_v4, %v6091_v17  ;;  %v1608_v7 = vsel %vm1590_vm9, %v1575_v32, %v6092_v6  ;;  %v6087_v47 = vunpack.i.h.bf16 %v6085_v13  ;;  %v6086_v10 = vunpack.i.l.bf16 %v6085_v13  ;;  %v10336_v13 = vld [vmem:[#allocation15_spill] sm:$0xff] }
 0x14b   : > { %v6100_v49 = vpop.permute.xlu1 %6099  ;;  %v1512_v20 = vsel %vm1491_vm6, %v10336_v13, %v5906_v14  ;;  %v10338_v14 = vld [vmem:[#allocation13_spill] sm:$0xff] }
 0x14c   : > { %v6102_v37 = vunpack.i.h.bf16 %v6100_v49  ;;  %v6101_v29 = vunpack.i.l.bf16 %v6100_v49  ;;  %v1576_v60 = vsel %vm1557_vm8, %v1543_v0, %v6086_v10  ;;  %v1577_v5 = vsel %vm1557_vm8, %v1544_v48, %v6087_v47 }
 0x14d   : > { %v6095_v21 = vpop.permute.xlu0 %6094 }
 0x14e   : > { %v1640_v38 = vsel %vm1623_vm10, %v1607_v1, %v6101_v29  ;;  %v1641_v35 = vsel %vm1623_vm10, %v1608_v7, %v6102_v37  ;;  %v6097_v22 = vunpack.i.h.bf16 %v6095_v21  ;;  %v6096_v27 = vunpack.i.l.bf16 %v6095_v21 }
 0x14f   : > { %v6110_v18 = vpop.permute.xlu1 %6109  ;;  %v1664_v54 = vpack.c.bf16 %v1641_v35, %v1640_v38 }
 0x150   : > { %v1609_v53 = vsel %vm1590_vm9, %v1576_v60, %v6096_v27  ;;  %v1610_v25 = vsel %vm1590_vm9, %v1577_v5, %v6097_v22  ;;  %v6112_v28 = vunpack.i.h.bf16 %v6110_v18  ;;  %v6111_v52 = vunpack.i.l.bf16 %v6110_v18 }
 0x151   : > { %v6105_v36 = vpop.permute.xlu0 %6104  ;;  %5383 = vmatprep.mubr.msk.bf16.mxu0 %vm1692_vm11, %v1664_v54 }
 0x152   : > { %v6107_v3 = vunpack.i.h.bf16 %v6105_v36  ;;  %v6106_v40 = vunpack.i.l.bf16 %v6105_v36  ;;  %v1514_v19 = vsel %vm1491_vm6, %v10334_v45, %v6111_v52  ;;  %v1515_v24 = vsel %vm1491_vm6, %v10335_v16, %v6112_v28 }
 0x153   : > { %v6120_v44 = vpop.permute.xlu1 %6119 }
 0x154   : > { %v1642_v8 = vsel %vm1623_vm10, %v1609_v53, %v6106_v40  ;;  %v1643_v51 = vsel %vm1623_vm10, %v1610_v25, %v6107_v3  ;;  %v6122_v12 = vunpack.i.h.bf16 %v6120_v44  ;;  %v6121_v59 = vunpack.i.l.bf16 %v6120_v44 }
 0x155   : > { %v6115_v15 = vpop.permute.xlu0 %6114  ;;  %v1665_v55 = vpack.c.bf16 %v1643_v51, %v1642_v8  ;;  %v7163_v51 = vmov 0.0  }
 0x156   : > { %v6117_v61 = vunpack.i.h.bf16 %v6115_v15  ;;  %v6116_v57 = vunpack.i.l.bf16 %v6115_v15  ;;  %v1547_v33 = vsel %vm1524_vm7, %v1514_v19, %v6121_v59  ;;  %v1548_v26 = vsel %vm1524_vm7, %v1515_v24, %v6122_v12  ;;  %2017 = vst.msk [vmem:[#allocation2 + $0x8] sm:$0xff] %vm1623_vm10, %v7163_v51  ;;  %2018 = vst.msk [vmem:[#allocation2 + $0x10] sm:$0xff] %vm1623_vm10, %v7163_v51  ;;  %v10339_v59 = vld [vmem:[#allocation17_spill] sm:$0xff]  ;;  %v10340_v19 = vld [vmem:[#allocation22_spill] sm:$0xff] }
 0x157   : > { %5384 = vmatmul.mubr.msk.bf16.gmra.mrb[16].mxu0 %vm1692_vm11, %v1665_v55  ;;  %v6130_v30 = vpop.permute.xlu1 %6129  ;;  %2019 = vst.msk [vmem:[#allocation2 + $0x18] sm:$0xff] %vm1623_vm10, %v7163_v51  ;;  %2016 = vst.msk [vmem:[#allocation2] sm:$0xff] %vm1623_vm10, %v7163_v51  ;;  %v10341_v24 = vld [vmem:[#allocation19_spill] sm:$0xff] }
 0x158   : > { %v6132_v62 = vunpack.i.h.bf16 %v6130_v30  ;;  %v6131_v58 = vunpack.i.l.bf16 %v6130_v30  ;;  %v1545_v43 = vsel %vm1524_vm7, %v1512_v20, %v6116_v57  ;;  %v1546_v46 = vsel %vm1524_vm7, %v1513_v50, %v6117_v61  ;;  %2021 = vst.msk [vmem:[#allocation2 + $0x220] sm:$0xff] %vm1623_vm10, %v7163_v51  ;;  %2022 = vst.msk [vmem:[#allocation2 + $0x228] sm:$0xff] %vm1623_vm10, %v7163_v51 }
 0x159   : > { %v6125_v39 = vpop.permute.xlu0 %6124  ;;  %2023 = vst.msk [vmem:[#allocation2 + $0x230] sm:$0xff] %vm1623_vm10, %v7163_v51  ;;  %2024 = vst.msk [vmem:[#allocation2 + $0x238] sm:$0xff] %vm1623_vm10, %v7163_v51 }
 0x15a   : > { %v6127_v41 = vunpack.i.h.bf16 %v6125_v39  ;;  %v6126_v34 = vunpack.i.l.bf16 %v6125_v39  ;;  %v1580_v37 = vsel %vm1557_vm8, %v1547_v33, %v6131_v58  ;;  %v1581_v29 = vsel %vm1557_vm8, %v1548_v26, %v6132_v62  ;;  %2044 = vst.msk [vmem:[#allocation2 + $0x58] sm:$0x1] %vm2026_vm12, %v7163_v51  ;;  %2027 = vst.msk [vmem:[#allocation2 + $0x27] sm:$0x1] %vm2026_vm12, %v7163_v51 }
 0x15b   : > { %v6140_v11 = vpop.permute.xlu1 %6139  ;;  %2028 = vst.msk [vmem:[#allocation2 + $0x47] sm:$0x1] %vm2026_vm12, %v7163_v51  ;;  %2029 = vst.msk [vmem:[#allocation2 + $0x67] sm:$0x1] %vm2026_vm12, %v7163_v51 }
 0x15c   : > { %v6142_v63 = vunpack.i.h.bf16 %v6140_v11  ;;  %v6141_v6 = vunpack.i.l.bf16 %v6140_v11  ;;  %v1578_v1 = vsel %vm1557_vm8, %v1545_v43, %v6126_v34  ;;  %v1579_v7 = vsel %vm1557_vm8, %v1546_v46, %v6127_v41  ;;  %2030 = vst.msk [vmem:[#allocation2 + $0x87] sm:$0x1] %vm2026_vm12, %v7163_v51  ;;  %2031 = vst.msk [vmem:[#allocation2 + $0xa7] sm:$0x1] %vm2026_vm12, %v7163_v51 }
 0x15d   : > { %v6135_v17 = vpop.permute.xlu0 %6134  ;;  %2032 = vst.msk [vmem:[#allocation2 + $0xc7] sm:$0x1] %vm2026_vm12, %v7163_v51  ;;  %2033 = vst.msk [vmem:[#allocation2 + $0xe7] sm:$0x1] %vm2026_vm12, %v7163_v51 }
 0x15e   : > { %v6137_v49 = vunpack.i.h.bf16 %v6135_v17  ;;  %v6136_v4 = vunpack.i.l.bf16 %v6135_v17  ;;  %v1613_v21 = vsel %vm1590_vm9, %v1580_v37, %v6141_v6  ;;  %v1614_v47 = vsel %vm1590_vm9, %v1581_v29, %v6142_v63  ;;  %2034 = vst.msk [vmem:[#allocation2 + $0x107] sm:$0x1] %vm2026_vm12, %v7163_v51  ;;  %2035 = vst.msk [vmem:[#allocation2 + $0x127] sm:$0x1] %vm2026_vm12, %v7163_v51  ;;  %v2094_v37 = vld [vmem:[#allocation2 + $0x18] sm:$0xff] }
 0x15f   : > { %v6150_v32 = vpop.permute.xlu1 %6149  ;;  %2036 = vst.msk [vmem:[#allocation2 + $0x147] sm:$0x1] %vm2026_vm12, %v7163_v51  ;;  %2037 = vst.msk [vmem:[#allocation2 + $0x167] sm:$0x1] %vm2026_vm12, %v7163_v51 }
 0x160   : > { %v6152_v42 = vunpack.i.h.bf16 %v6150_v32  ;;  %v6151_v9 = vunpack.i.l.bf16 %v6150_v32  ;;  %v1611_v18 = vsel %vm1590_vm9, %v1578_v1, %v6136_v4  ;;  %v1612_v54 = vsel %vm1590_vm9, %v1579_v7, %v6137_v49  ;;  %2038 = vst.msk [vmem:[#allocation2 + $0x187] sm:$0x1] %vm2026_vm12, %v7163_v51  ;;  %2039 = vst.msk [vmem:[#allocation2 + $0x1a7] sm:$0x1] %vm2026_vm12, %v7163_v51  ;;  %v2092_v4 = vld [vmem:[#allocation2 + $0x8] sm:$0xff]  ;;  %v2093_v32 = vld [vmem:[#allocation2 + $0x10] sm:$0xff] }
 0x161   : > { %v6145_v10 = vpop.permute.xlu0 %6144  ;;  %2040 = vst.msk [vmem:[#allocation2 + $0x1c7] sm:$0x1] %vm2026_vm12, %v7163_v51  ;;  %2041 = vst.msk [vmem:[#allocation2 + $0x1e7] sm:$0x1] %vm2026_vm12, %v7163_v51 }
 0x162   : > { %v1646_v38 = vsel %vm1623_vm10, %v1613_v21, %v6151_v9  ;;  %v1647_v35 = vsel %vm1623_vm10, %v1614_v47, %v6152_v42  ;;  %v6147_v22 = vunpack.i.h.bf16 %v6145_v10  ;;  %v6146_v27 = vunpack.i.l.bf16 %v6145_v10  ;;  %2042 = vst.msk [vmem:[#allocation2 + $0x207] sm:$0x1] %vm2026_vm12, %v7163_v51  ;;  %2043 = vst.msk [vmem:[#allocation2 + $0x38] sm:$0x1] %vm2026_vm12, %v7163_v51 }
 0x163   : > { %v6160_v31 = vpop.permute.xlu1 %6159  ;;  %v1667_v23 = vpack.c.bf16 %v1647_v35, %v1646_v38  ;;  %2045 = vst.msk [vmem:[#allocation2 + $0x78] sm:$0x1] %vm2026_vm12, %v7163_v51  ;;  %2046 = vst.msk [vmem:[#allocation2 + $0x98] sm:$0x1] %vm2026_vm12, %v7163_v51  ;;  %v2340_v21 = vrot.slane %v2092_v4, 1  ;;  %v2341_v47 = vrot.slane %v2093_v32, 1  ;;  %v6253_v38 = vpack.i.bf16 %v2093_v32, %v2092_v4 }
 0x164   : > { %v1644_v48 = vsel %vm1623_vm10, %v1611_v18, %v6146_v27  ;;  %v1645_v0 = vsel %vm1623_vm10, %v1612_v54, %v6147_v22  ;;  %v6162_v40 = vunpack.i.h.bf16 %v6160_v31  ;;  %v6161_v53 = vunpack.i.l.bf16 %v6160_v31  ;;  %2047 = vst.msk [vmem:[#allocation2 + $0xb8] sm:$0x1] %vm2026_vm12, %v7163_v51  ;;  %2048 = vst.msk [vmem:[#allocation2 + $0xd8] sm:$0x1] %vm2026_vm12, %v7163_v51 }
 0x165   : > { %v6155_v36 = vpop.permute.xlu0 %6154  ;;  %v1666_v60 = vpack.c.bf16 %v1645_v0, %v1644_v48  ;;  %2049 = vst.msk [vmem:[#allocation2 + $0xf8] sm:$0x1] %vm2026_vm12, %v7163_v51  ;;  %2050 = vst.msk [vmem:[#allocation2 + $0x118] sm:$0x1] %vm2026_vm12, %v7163_v51  ;;  %v2343_v10 = vrot.slane %v2094_v37, 1  ;;  %v2342_v48 = vsel %vm436_vm0, %v2340_v21, %v2341_v47  ;;  %6254 = vrot.lane.b32.xlu0 %v6253_v38, %s7162_s28 }
 0x166   : > { %v6157_v44 = vunpack.i.h.bf16 %v6155_v36  ;;  %v6156_v8 = vunpack.i.l.bf16 %v6155_v36  ;;  %v1518_v12 = vsel %vm1491_vm6, %v10338_v14, %v6161_v53  ;;  %v1519_v61 = vsel %vm1491_vm6, %v10339_v59, %v6162_v40  ;;  %2051 = vst.msk [vmem:[#allocation2 + $0x138] sm:$0x1] %vm2026_vm12, %v7163_v51  ;;  %2052 = vst.msk [vmem:[#allocation2 + $0x158] sm:$0x1] %vm2026_vm12, %v7163_v51 }
 0x167   : > { %5387 = vmatprep.mubr.msk.bf16.mxu0 %vm1692_vm11, %v1666_v60  ;;  %v6170_v5 = vpop.permute.xlu1 %6169  ;;  %2053 = vst.msk [vmem:[#allocation2 + $0x178] sm:$0x1] %vm2026_vm12, %v7163_v51  ;;  %2054 = vst.msk [vmem:[#allocation2 + $0x198] sm:$0x1] %vm2026_vm12, %v7163_v51  ;;  %v2344_v0 = vsel %vm436_vm0, %v2341_v47, %v2343_v10 }
 0x168   : > { %5388 = vmatmul.mubr.msk.bf16.gmra.mrb[20].mxu0 %vm1692_vm11, %v1667_v23  ;;  %v6172_v15 = vunpack.i.h.bf16 %v6170_v5  ;;  %v6171_v55 = vunpack.i.l.bf16 %v6170_v5  ;;  %v1516_v16 = vsel %vm1491_vm6, %v10340_v19, %v6156_v8  ;;  %v1517_v62 = vsel %vm1491_vm6, %v10341_v24, %v6157_v44  ;;  %2055 = vst.msk [vmem:[#allocation2 + $0x1b8] sm:$0x1] %vm2026_vm12, %v7163_v51  ;;  %2056 = vst.msk [vmem:[#allocation2 + $0x1d8] sm:$0x1] %vm2026_vm12, %v7163_v51 }
 0x169   : > { %v6165_v3 = vpop.permute.xlu0 %6164  ;;  %2057 = vst.msk [vmem:[#allocation2 + $0x1f8] sm:$0x1] %vm2026_vm12, %v7163_v51  ;;  %2058 = vst.msk [vmem:[#allocation2 + $0x218] sm:$0x1] %vm2026_vm12, %v7163_v51  ;;  %v6258_v40 = vpack.i.bf16 %v2344_v0, %v2342_v48 }
 0x16a   : > { %v6166_v30 = vunpack.i.l.bf16 %v6165_v3  ;;  %v6167_v52 = vunpack.i.h.bf16 %v6165_v3  ;;  %v1551_v34 = vsel %vm1524_vm7, %v1518_v12, %v6171_v55  ;;  %v1552_v63 = vsel %vm1524_vm7, %v1519_v61, %v6172_v15  ;;  %v10342_v12 = vld [vmem:[#allocation18_spill] sm:$0xff]  ;;  %v10343_v61 = vld [vmem:[#allocation23_spill] sm:$0xff] }
 0x16b   : > { %v6180_v25 = vpop.permute.xlu1 %6179  ;;  %6259 = vrot.lane.b32.xlu1 %v6258_v40, %s7162_s28 }
 0x16c   : > { %v6182_v39 = vunpack.i.h.bf16 %v6180_v25  ;;  %v6181_v2 = vunpack.i.l.bf16 %v6180_v25  ;;  %v1549_v6 = vsel %vm1524_vm7, %v1516_v16, %v6166_v30  ;;  %v1550_v13 = vsel %vm1524_vm7, %v1517_v62, %v6167_v52 }
 0x16d   : > { %v6175_v28 = vpop.permute.xlu0 %6174 }
 0x16e   : > { %v6177_v57 = vunpack.i.h.bf16 %v6175_v28  ;;  %v6176_v11 = vunpack.i.l.bf16 %v6175_v28  ;;  %v1584_v20 = vsel %vm1557_vm8, %v1551_v34, %v6181_v2  ;;  %v1585_v56 = vsel %vm1557_vm8, %v1552_v63, %v6182_v39  ;;  %v10345_v63 = vld [vmem:[#allocation25_spill] sm:$0xff] }
 0x16f   : > { %v6190_v45 = vpop.permute.xlu1 %6189 }
 0x170   : > { %v6192_v58 = vunpack.i.h.bf16 %v6190_v45  ;;  %v6191_v41 = vunpack.i.l.bf16 %v6190_v45  ;;  %v1582_v33 = vsel %vm1557_vm8, %v1549_v6, %v6176_v11  ;;  %v1583_v26 = vsel %vm1557_vm8, %v1550_v13, %v6177_v57 }
 0x171   : > { %v6185_v17 = vpop.permute.xlu0 %6184 }
 0x172   : > { %v6186_v50 = vunpack.i.l.bf16 %v6185_v17  ;;  %v1617_v43 = vsel %vm1590_vm9, %v1584_v20, %v6191_v41  ;;  %v6187_v46 = vunpack.i.h.bf16 %v6185_v17  ;;  %v1618_v29 = vsel %vm1590_vm9, %v1585_v56, %v6192_v58  ;;  %v10344_v41 = vld [vmem:[#allocation24_spill] sm:$0xff] }
 0x173   : > { %v6200_v49 = vpop.permute.xlu1 %6199 }
 0x174   : > { %v1615_v42 = vsel %vm1590_vm9, %v1582_v33, %v6186_v50  ;;  %v6202_v9 = vunpack.i.h.bf16 %v6200_v49  ;;  %v6201_v1 = vunpack.i.l.bf16 %v6200_v49  ;;  %v1616_v54 = vsel %vm1590_vm9, %v1583_v26, %v6187_v46 }
 0x175   : > { %v6195_v7 = vpop.permute.xlu0 %6194 }
 0x176   : > { %v1650_v35 = vsel %vm1623_vm10, %v1617_v43, %v6201_v1  ;;  %v1651_v22 = vsel %vm1623_vm10, %v1618_v29, %v6202_v9  ;;  %v6197_v27 = vunpack.i.h.bf16 %v6195_v7  ;;  %v6196_v18 = vunpack.i.l.bf16 %v6195_v7 }
 0x177   : > { %v6210_v31 = vpop.permute.xlu1 %6209  ;;  %v1669_v23 = vpack.c.bf16 %v1651_v22, %v1650_v35 }
 0x178   : > { %v1648_v36 = vsel %vm1623_vm10, %v1615_v42, %v6196_v18  ;;  %v1649_v60 = vsel %vm1623_vm10, %v1616_v54, %v6197_v27  ;;  %v6212_v8 = vunpack.i.h.bf16 %v6210_v31  ;;  %v6211_v51 = vunpack.i.l.bf16 %v6210_v31  ;;  %v8637_v54 = vld [vmem:[%s10201_s2] ss:$0 sm:$0xff] }
 0x179   : > { %v6205_v5 = vpop.permute.xlu0 %6204  ;;  %v1668_v3 = vpack.c.bf16 %v1649_v60, %v1648_v36  ;;  %v7055_v36 = vld [vmem:[%s10203_s4] sm:$0xff]  }
 0x17a   : > { %v6207_v55 = vunpack.i.h.bf16 %v6205_v5  ;;  %v6206_v30 = vunpack.i.l.bf16 %v6205_v5  ;;  %v1522_v59 = vsel %vm1491_vm6, %v10342_v12, %v6211_v51  ;;  %v1523_v57 = vsel %vm1491_vm6, %v10343_v61, %v6212_v8  ;;  %5399 = vmatprep.subr.bf16.mxu1 %v7055_v36  ;;  %v7061_v12 = vld [vmem:[%s10203_s4 + $0x50] sm:$0xff]   ;;  %v7063_v61 = vld [vmem:[%s10203_s4 + $0x58] sm:$0xff]  }
 0x17b   : > { %5391 = vmatprep.mubr.msk.bf16.mxu0 %vm1692_vm11, %v1668_v3  ;;  %v6220_v53 = vpop.permute.xlu1 %6219  ;;  %5400 = vmatpush3.bf16.msra.mxu1 %v7055_v36 }
 0x17c   : > { %5392 = vmatmul.mubr.msk.bf16.gmra.mrb[24].mxu0 %vm1692_vm11, %v1669_v23  ;;  %v6222_v28 = vunpack.i.h.bf16 %v6220_v53  ;;  %v6221_v52 = vunpack.i.l.bf16 %v6220_v53  ;;  %v1520_v34 = vsel %vm1491_vm6, %v10344_v41, %v6206_v30  ;;  %v1521_v6 = vsel %vm1491_vm6, %v10345_v63, %v6207_v55  ;;  %v8642_v23 = vld [vmem:[%s10202_s3] ss:$0 sm:$0xff]  ;;  %v2102_v41 = vld [vmem:[#allocation2 + $0x58] sm:$0xff] }
 0x17d   : > { %v6215_v25 = vpop.permute.xlu0 %6214 }
 0x17e   : > { %v6217_v39 = vunpack.i.h.bf16 %v6215_v25  ;;  %v6216_v2 = vunpack.i.l.bf16 %v6215_v25  ;;  %v1555_v17 = vsel %vm1524_vm7, %v1522_v59, %v6221_v52  ;;  %v1556_v13 = vsel %vm1524_vm7, %v1523_v57, %v6222_v28  ;;  %v7056_v25 = vld [vmem:[%s10203_s4 + $0x8] sm:$0xff]   ;;  %v7058_v28 = vld [vmem:[%s10203_s4 + $0x10] sm:$0xff]   ;;  %v7060_v59 = vld [vmem:[%s10203_s4 + $0x18] sm:$0xff]  }
 0x17f   : > { %v6230_v44 = vpop.permute.xlu1 %6229  ;;  %5401 = vmatprep.subr.bf16.mxu1 %v7056_v25  ;;  %v7062_v57 = vld [vmem:[%s10203_s4 + $0x20] sm:$0xff]  }
 0x180   : > { %v6232_v11 = vunpack.i.h.bf16 %v6230_v44  ;;  %v6231_v45 = vunpack.i.l.bf16 %v6230_v44  ;;  %v1553_v20 = vsel %vm1524_vm7, %v1520_v34, %v6216_v2  ;;  %v1554_v56 = vsel %vm1524_vm7, %v1521_v6, %v6217_v39  ;;  %v7057_v44 = vld [vmem:[%s10203_s4 + $0x40] sm:$0xff]   ;;  %5402 = vmatpush3.bf16.msra.mxu1 %v7056_v25  ;;  %v7064_v34 = vld [vmem:[%s10203_s4 + $0x28] sm:$0xff]  }
 0x181   : > { %v6225_v15 = vpop.permute.xlu0 %6224  ;;  %5447 = vmatprep.subr.bf16.mxu0 %v7057_v44  ;;  %5403 = vmatprep.subr.bf16.mxu1 %v7058_v28 }
 0x182   : > { %v6227_v19 = vunpack.i.h.bf16 %v6225_v15  ;;  %v6226_v16 = vunpack.i.l.bf16 %v6225_v15  ;;  %v1588_v43 = vsel %vm1557_vm8, %v1555_v17, %v6231_v45  ;;  %v1589_v46 = vsel %vm1557_vm8, %v1556_v13, %v6232_v11  ;;  %v7059_v15 = vld [vmem:[%s10203_s4 + $0x48] sm:$0xff]   ;;  %5448 = vmatpush3.bf16.msra.mxu0 %v7057_v44 }
 0x183   : > { %v6240_v14 = vpop.permute.xlu1 %6239  ;;  %5449 = vmatprep.subr.bf16.mxu0 %v7059_v15 }
 0x184   : > { %v6242_v24 = vunpack.i.h.bf16 %v6240_v14  ;;  %v6241_v62 = vunpack.i.l.bf16 %v6240_v14  ;;  %v1586_v32 = vsel %vm1557_vm8, %v1553_v20, %v6226_v16  ;;  %v1587_v37 = vsel %vm1557_vm8, %v1554_v56, %v6227_v19  ;;  %5404 = vmatpush3.bf16.msra.mxu1 %v7058_v28  ;;  %v7065_v16 = vld [vmem:[%s10203_s4 + $0x60] sm:$0xff]  }
 0x185   : > { %v6235_v58 = vpop.permute.xlu0 %6234  ;;  %5405 = vmatprep.subr.bf16.mxu1 %v7060_v59 }
 0x186   : > { %v6237_v50 = vunpack.i.h.bf16 %v6235_v58  ;;  %v6236_v33 = vunpack.i.l.bf16 %v6235_v58  ;;  %v1621_v29 = vsel %vm1590_vm9, %v1588_v43, %v6241_v62  ;;  %v1622_v42 = vsel %vm1590_vm9, %v1589_v46, %v6242_v24  ;;  %5450 = vmatpush3.bf16.msra.mxu0 %v7059_v15  ;;  %v7067_v46 = vld [vmem:[%s10203_s4 + $0x68] sm:$0xff]   ;;  %v7070_v15 = vld [vmem:[%s10203_s4 + $0x78] sm:$0xff]  }
 0x187   : > { %v6250_v26 = vpop.permute.xlu1 %6249  ;;  %5451 = vmatprep.subr.bf16.mxu0 %v7061_v12  ;;  %v2353_v43 = vrot.slane %v2102_v41, 1 }
 0x188   : > { %v6252_v49 = vunpack.i.h.bf16 %v6250_v26  ;;  %v6251_v4 = vunpack.i.l.bf16 %v6250_v26  ;;  %v1619_v10 = vsel %vm1590_vm9, %v1586_v32, %v6236_v33  ;;  %v1620_v38 = vsel %vm1590_vm9, %v1587_v37, %v6237_v50  ;;  %5406 = vmatpush3.bf16.msra.mxu1 %v7060_v59  ;;  %v2099_v37 = vld [vmem:[#allocation2 + $0x40] sm:$0xff] }
 0x189   : > { %v6245_v9 = vpop.permute.xlu0 %6244  ;;  %5407 = vmatprep.subr.bf16.mxu1 %v7062_v57 }
 0x18a   : > { %v1654_v1 = vsel %vm1623_vm10, %v1621_v29, %v6251_v4  ;;  %v1655_v7 = vsel %vm1623_vm10, %v1622_v42, %v6252_v49  ;;  %v6247_v21 = vunpack.i.h.bf16 %v6245_v9  ;;  %v6246_v47 = vunpack.i.l.bf16 %v6245_v9  ;;  %5452 = vmatpush3.bf16.msra.mxu0 %v7061_v12  ;;  %v7066_v29 = vld [vmem:[%s10203_s4 + $0x30] sm:$0xff]  }
 0x18b   : > { %v1671_v35 = vpack.c.bf16 %v1655_v7, %v1654_v1  ;;  %5453 = vmatprep.subr.bf16.mxu0 %v7063_v61 }
 0x18c   : > { %v1652_v22 = vsel %vm1623_vm10, %v1619_v10, %v6246_v47  ;;  %v1653_v27 = vsel %vm1623_vm10, %v1620_v38, %v6247_v21  ;;  %5408 = vmatpush3.bf16.msra.mxu1 %v7062_v57  ;;  %v2222_v38 = vrot.slane %v2099_v37, 7 }
 0x18d   : > { %v1670_v18 = vpack.c.bf16 %v1653_v27, %v1652_v22  ;;  %5409 = vmatprep.subr.bf16.mxu1 %v7064_v34  ;;  %v7069_v22 = vld [vmem:[%s10203_s4 + $0x70] sm:$0xff]   ;;  %v2095_v27 = vld [vmem:[#allocation2 + $0x20] sm:$0xff] }
 0x18e   : > { %5454 = vmatpush3.bf16.msra.mxu0 %v7063_v61 }
 0x18f   : > { %5395 = vmatprep.mubr.msk.bf16.mxu0 %vm1692_vm11, %v1670_v18  ;;  %5455 = vmatprep.subr.bf16.mxu0 %v7065_v16  ;;  %v7068_v18 = vld [vmem:[%s10203_s4 + $0x38] sm:$0xff]  }
 0x190   : > { %5396 = vmatmul.mubr.msk.bf16.gmra.mrb[28].mxu0 %vm1692_vm11, %v1671_v35  ;;  %5410 = vmatpush3.bf16.msra.mxu1 %v7064_v34 }
 0x191   : > { %5411 = vmatprep.subr.bf16.mxu1 %v7066_v29 }
 0x192   : > { %5456 = vmatpush3.bf16.msra.mxu0 %v7065_v16 }
 0x193   : > { %5457 = vmatprep.subr.bf16.mxu0 %v7067_v46 }
 0x194   : > { %5412 = vmatpush3.bf16.msra.mxu1 %v7066_v29 }
 0x195   : > { %5413 = vmatprep.subr.bf16.mxu1 %v7068_v18 }
 0x196   : > { %5458 = vmatpush3.bf16.msra.mxu0 %v7067_v46  ;;  %v2107_v46 = vld [vmem:[#allocation2 + $0x80] sm:$0xff] }
 0x197   : > { %5459 = vmatprep.subr.bf16.mxu0 %v7069_v22  ;;  %v2232_v29 = vrot.slane %v2107_v46, 7 }
 0x198   : > { %5414 = vmatpush3.bf16.msra.mxu1 %v7068_v18 }
 0x19a   : > { %5460 = vmatpush3.bf16.msra.mxu0 %v7069_v22 }
 0x19b   : > { %5461 = vmatprep.subr.bf16.mxu0 %v7070_v15 }
 0x19e   : > { %5462 = vmatpush3.bf16.msra.mxu0 %v7070_v15 }
 0x1ea   : > { %v5369_v31 = vpop.f32.mrb[0].mxu0 }
 0x1eb   : > { %v1915_v48 = vmul.f32 %v5369_v31, %v8637_v54  ;;  %v1779_v0 = vpop.f32.mrb[1].mxu0 }
 0x1ec   : > { %v1913_v60 = vmul.f32 %v8637_v54, %v1779_v0  ;;  %v5370_v5 = vpop.f32.mrb[2].mxu0 }
 0x1ed   : > { %v1954_v3 = vadd.f32 %v8642_v23, %v1915_v48  ;;  %v1916_v40 = vmul.f32 %v5370_v5, %v8637_v54  ;;  %v1782_v53 = vpop.f32.mrb[3].mxu0 }
 0x1ee   : > { %v1952_v8 = vadd.f32 %v8642_v23, %v1913_v60  ;;  %v1914_v51 = vmul.f32 %v8637_v54, %v1782_v53  ;;  %v2098_v60 = vld [vmem:[#allocation2 + $0x38] sm:$0xff] }
 0x1ef   : > { %v1986_v55 = vmax.f32 %v1954_v3, 0.0  ;;  %v1955_v30 = vadd.f32 %v8642_v23, %v1916_v40  ;;  %v2217_v3 = vrot.slane %v2095_v27, 7 }
 0x1f0   : > { %v1984_v52 = vmax.f32 %v1952_v8, 0.0  ;;  %v1953_v39 = vadd.f32 %v8642_v23, %v1914_v51  ;;  %v2348_v51 = vrot.slane %v2098_v60, 1 }
 0x1f1   : > { %2061 = vst.msk [vmem:[#allocation2 + $0x48] sm:$0xff] %vm1623_vm10, %v1986_v55  ;;  %v1987_v2 = vmax.f32 %v1955_v30, 0.0 }
 0x1f2   : > { %2059 = vst.msk [vmem:[#allocation2 + $0x28] sm:$0xff] %vm1623_vm10, %v1984_v52  ;;  %v1985_v14 = vmax.f32 %v1953_v39, 0.0 }
 0x1f3   : > { %2062 = vst.msk [vmem:[#allocation2 + $0x50] sm:$0xff] %vm1623_vm10, %v1987_v2 }
 0x1f4   : > { %2060 = vst.msk [vmem:[#allocation2 + $0x30] sm:$0xff] %vm1623_vm10, %v1985_v14 }
 0x1f8   : > { %v8683_v45 = vld [vmem:[#allocation2 + $0x48] sm:$0xff] }
 0x1f9   : > { %v8702_v26 = vld [vmem:[#allocation2 + $0x28] sm:$0xff]  ;;  %v2350_v10 = vrot.slane %v8683_v45, 1  ;;  %v2223_v35 = vrot.slane %v8683_v45, 7 }
 0x1fa   : > { %v5373_v11 = vpop.f32.mrb[4].mxu0  ;;  %v2101_v19 = vld [vmem:[#allocation2 + $0x50] sm:$0xff]  ;;  %v2218_v40 = vrot.slane %v8702_v26, 7  ;;  %v2345_v28 = vrot.slane %v8702_v26, 1 }
 0x1fb   : > { %v1919_v24 = vmul.f32 %v5373_v11, %v8637_v54  ;;  %v1795_v62 = vpop.f32.mrb[5].mxu0  ;;  %v6268_v58 = vpack.i.bf16 %v2101_v19, %v8683_v45  ;;  %v8694_v17 = vld [vmem:[#allocation2 + $0x30] sm:$0xff]  ;;  %v2351_v1 = vrot.slane %v2101_v19, 1  ;;  %v2225_v7 = vrot.slane %v2101_v19, 7 }
 0x1fc   : > { %v1917_v63 = vmul.f32 %v8637_v54, %v1795_v62  ;;  %v5374_v6 = vpop.f32.mrb[6].mxu0  ;;  %v6283_v32 = vpack.i.bf16 %v8694_v17, %v8702_v26  ;;  %v2220_v36 = vrot.slane %v8694_v17, 7  ;;  %v8737_v5 = vsel %vm2211_vm13, %v2222_v38, %v2223_v35 }
 0x1fd   : > { %v1958_v13 = vadd.f32 %v8642_v23, %v1919_v24  ;;  %v1920_v20 = vmul.f32 %v5374_v6, %v8637_v54  ;;  %6269 = vrot.lane.b32.xlu1 %v6268_v58, %s7164_s18  ;;  %6264 = vrot.lane.b32.xlu0 %v6268_v58, %s7162_s28  ;;  %v1798_v56 = vpop.f32.mrb[7].mxu0  ;;  %v2352_v31 = vsel %vm436_vm0, %v2350_v10, %v2351_v1  ;;  %v2346_v8 = vrot.slane %v8694_v17, 1 }
 0x1fe   : > { %v1956_v50 = vadd.f32 %v8642_v23, %v1917_v63  ;;  %v1918_v33 = vmul.f32 %v8637_v54, %v1798_v56  ;;  %v2354_v48 = vsel %vm436_vm0, %v2351_v1, %v2353_v43  ;;  %v8731_v0 = vsel %vm2211_vm13, %v2223_v35, %v2225_v7  ;;  %v2106_v1 = vld [vmem:[#allocation2 + $0x78] sm:$0xff] }
 0x1ff   : > { %v1990_v49 = vmax.f32 %v1958_v13, 0.0  ;;  %v1959_v4 = vadd.f32 %v8642_v23, %v1920_v20  ;;  %v6298_v53 = vpack.i.bf16 %v2354_v48, %v2352_v31  ;;  %v6293_v25 = vpack.i.bf16 %v8731_v0, %v8737_v5 }
 0x200   : > { %v1988_v42 = vmax.f32 %v1956_v50, 0.0  ;;  %v1957_v9 = vadd.f32 %v8642_v23, %v1918_v33  ;;  %v8743_v44 = vsel %vm2211_vm13, %v2218_v40, %v2220_v36  ;;  %v8752_v30 = vsel %vm2211_vm13, %v2217_v3, %v2218_v40  ;;  %v2110_v50 = vld [vmem:[#allocation2 + $0x98] sm:$0xff] }
 0x201   : > { %2065 = vst.msk [vmem:[#allocation2 + $0x88] sm:$0xff] %vm1623_vm10, %v1990_v49  ;;  %v1991_v21 = vmax.f32 %v1959_v4, 0.0  ;;  %6274 = vrot.lane.b32.xlu1 %v6268_v58, %s7165_s23  ;;  %6284 = vrot.lane.b32.xlu0 %v6283_v32, %s7164_s18  ;;  %v6308_v2 = vpack.i.bf16 %v8743_v44, %v8752_v30  ;;  %v2347_v59 = vsel %vm436_vm0, %v2345_v28, %v2346_v8  ;;  %v2363_v49 = vrot.slane %v2110_v50, 1 }
 0x202   : > { %2063 = vst.msk [vmem:[#allocation2 + $0x68] sm:$0xff] %vm1623_vm10, %v1988_v42  ;;  %v1989_v47 = vmax.f32 %v1957_v9, 0.0  ;;  %v2349_v61 = vsel %vm436_vm0, %v2346_v8, %v2348_v51  ;;  %v2103_v9 = vld [vmem:[#allocation2 + $0x60] sm:$0xff]  ;;  %v2358_v60 = vrot.slane %v2106_v1, 1 }
 0x203   : > { %2066 = vst.msk [vmem:[#allocation2 + $0x90] sm:$0xff] %vm1623_vm10, %v1991_v21  ;;  %v6313_v58 = vpack.i.bf16 %v2349_v61, %v2347_v59  ;;  %v2227_v36 = vrot.slane %v2103_v9, 7 }
 0x204   : > { %2064 = vst.msk [vmem:[#allocation2 + $0x70] sm:$0xff] %vm1623_vm10, %v1989_v47 }
 0x205   : > { %6289 = vrot.lane.b32.xlu0 %v6283_v32, %s7165_s23  ;;  %6279 = vrot.lane.b32.xlu1 %v6283_v32, %s7162_s28 }
 0x208   : > { %v2108_v13 = vld [vmem:[#allocation2 + $0x88] sm:$0xff] }
 0x209   : > { %6299 = vrot.lane.b32.xlu0 %v6298_v53, %s7165_s23  ;;  %6294 = vrot.lane.b32.xlu1 %v6293_v25, %s7164_s18  ;;  %v2104_v33 = vld [vmem:[#allocation2 + $0x68] sm:$0xff]  ;;  %v2360_v32 = vrot.slane %v2108_v13, 1  ;;  %v2233_v42 = vrot.slane %v2108_v13, 7 }
 0x20a   : > { %v5377_v55 = vpop.f32.mrb[8].mxu0  ;;  %v2109_v63 = vld [vmem:[#allocation2 + $0x90] sm:$0xff]  ;;  %v2228_v25 = vrot.slane %v2104_v33, 7  ;;  %v2355_v61 = vrot.slane %v2104_v33, 1 }
 0x20b   : > { %v1923_v52 = vmul.f32 %v5377_v55, %v8637_v54  ;;  %v1811_v39 = vpop.f32.mrb[9].mxu0  ;;  %v6328_v20 = vpack.i.bf16 %v2109_v63, %v2108_v13  ;;  %v2105_v56 = vld [vmem:[#allocation2 + $0x70] sm:$0xff]  ;;  %v2361_v43 = vrot.slane %v2109_v63, 1  ;;  %v2235_v4 = vrot.slane %v2109_v63, 7 }
 0x20c   : > { %v1921_v14 = vmul.f32 %v8637_v54, %v1811_v39  ;;  %v5378_v12 = vpop.f32.mrb[10].mxu0  ;;  %v6343_v26 = vpack.i.bf16 %v2105_v56, %v2104_v33  ;;  %v2230_v27 = vrot.slane %v2105_v56, 7  ;;  %v8807_v59 = vsel %vm2211_vm13, %v2227_v36, %v2228_v25 }
 0x20d   : > { %v1962_v57 = vadd.f32 %v8642_v23, %v1923_v52  ;;  %v1924_v11 = vmul.f32 %v5378_v12, %v8637_v54  ;;  %6304 = vrot.lane.b32.xlu1 %v6298_v53, %s7162_s28  ;;  %6309 = vrot.lane.b32.xlu0 %v6308_v2, %s7164_s18  ;;  %v1814_v45 = vpop.f32.mrb[11].mxu0  ;;  %v2362_v47 = vsel %vm436_vm0, %v2360_v32, %v2361_v43  ;;  %v2356_v2 = vrot.slane %v2105_v56, 1 }
 0x20e   : > { %v1960_v19 = vadd.f32 %v8642_v23, %v1921_v14  ;;  %v1922_v16 = vmul.f32 %v8637_v54, %v1814_v45  ;;  %v2364_v35 = vsel %vm436_vm0, %v2361_v43, %v2363_v49  ;;  %v8784_v22 = vsel %vm2211_vm13, %v2233_v42, %v2235_v4 }
 0x20f   : > { %v1994_v24 = vmax.f32 %v1962_v57, 0.0  ;;  %v1963_v62 = vadd.f32 %v8642_v23, %v1924_v11  ;;  %v8793_v53 = vsel %vm2211_vm13, %v2232_v29, %v2233_v42  ;;  %v6358_v15 = vpack.i.bf16 %v2364_v35, %v2362_v47  ;;  %v2111_v35 = vld [vmem:[#allocation2 + $0xa0] sm:$0xff] }
 0x210   : > { %v1992_v41 = vmax.f32 %v1960_v19, 0.0  ;;  %v1961_v34 = vadd.f32 %v8642_v23, %v1922_v16  ;;  %v6353_v55 = vpack.i.bf16 %v8784_v22, %v8793_v53  ;;  %v8800_v39 = vsel %vm2211_vm13, %v2228_v25, %v2230_v27 }
 0x211   : > { %2069 = vst.msk [vmem:[#allocation2 + $0xc8] sm:$0xff] %vm1623_vm10, %v1994_v24  ;;  %v1995_v6 = vmax.f32 %v1963_v62, 0.0  ;;  %6314 = vrot.lane.b32.xlu1 %v6313_v58, %s7162_s28  ;;  %6319 = vrot.lane.b32.xlu0 %v6313_v58, %s7165_s23  ;;  %v6368_v57 = vpack.i.bf16 %v8800_v39, %v8807_v59  ;;  %v2357_v11 = vsel %vm436_vm0, %v2355_v61, %v2356_v2  ;;  %v2118_v62 = vld [vmem:[#allocation2 + $0xd8] sm:$0xff] }
 0x212   : > { %2067 = vst.msk [vmem:[#allocation2 + $0xa8] sm:$0xff] %vm1623_vm10, %v1992_v41  ;;  %v1993_v17 = vmax.f32 %v1961_v34, 0.0  ;;  %v2359_v45 = vsel %vm436_vm0, %v2356_v2, %v2358_v60  ;;  %v2373_v33 = vrot.slane %v2118_v62, 1  ;;  %v2237_v60 = vrot.slane %v2111_v35, 7 }
 0x213   : > { %2070 = vst.msk [vmem:[#allocation2 + $0xd0] sm:$0xff] %vm1623_vm10, %v1995_v6  ;;  %v6373_v19 = vpack.i.bf16 %v2359_v45, %v2357_v11 }
 0x214   : > { %2068 = vst.msk [vmem:[#allocation2 + $0xb0] sm:$0xff] %vm1623_vm10, %v1993_v17 }
 0x215   : > { %6329 = vrot.lane.b32.xlu1 %v6328_v20, %s7164_s18  ;;  %6324 = vrot.lane.b32.xlu0 %v6328_v20, %s7162_s28 }
 0x218   : > { %v2116_v41 = vld [vmem:[#allocation2 + $0xc8] sm:$0xff] }
 0x219   : > { %6334 = vrot.lane.b32.xlu1 %v6328_v20, %s7165_s23  ;;  %6344 = vrot.lane.b32.xlu0 %v6343_v26, %s7164_s18  ;;  %v2112_v34 = vld [vmem:[#allocation2 + $0xa8] sm:$0xff]  ;;  %v2370_v32 = vrot.slane %v2116_v41, 1  ;;  %v2243_v36 = vrot.slane %v2116_v41, 7 }
 0x21a   : > { %v5381_v37 = vpop.f32.mrb[12].mxu0  ;;  %v2117_v16 = vld [vmem:[#allocation2 + $0xd0] sm:$0xff] }
 0x21b   : > { %v1927_v7 = vmul.f32 %v5381_v37, %v8637_v54  ;;  %v1827_v21 = vpop.f32.mrb[13].mxu0  ;;  %v8817_v24 = vld [vmem:[#allocation2 + $0xb0] sm:$0xff]  ;;  %v6383_v17 = vpack.i.bf16 %v2117_v16, %v2116_v41  ;;  %v2371_v50 = vrot.slane %v2117_v16, 1  ;;  %v2245_v27 = vrot.slane %v2117_v16, 7 }
 0x21c   : > { %v1925_v10 = vmul.f32 %v8637_v54, %v1827_v21  ;;  %v5382_v38 = vpop.f32.mrb[14].mxu0  ;;  %v6403_v13 = vpack.i.bf16 %v8817_v24, %v2112_v34 }
 0x21d   : > { %v1966_v18 = vadd.f32 %v8642_v23, %v1927_v7  ;;  %v1928_v31 = vmul.f32 %v5382_v38, %v8637_v54  ;;  %6349 = vrot.lane.b32.xlu0 %v6343_v26, %s7165_s23  ;;  %6339 = vrot.lane.b32.xlu1 %v6343_v26, %s7162_s28  ;;  %v1830_v48 = vpop.f32.mrb[15].mxu0  ;;  %v2372_v1 = vsel %vm436_vm0, %v2370_v32, %v2371_v50  ;;  %v2115_v38 = vld [vmem:[#allocation2 + $0xc0] sm:$0xff] }
 0x21e   : > { %v1964_v3 = vadd.f32 %v8642_v23, %v1925_v10  ;;  %v1926_v40 = vmul.f32 %v8637_v54, %v1830_v48  ;;  %v2374_v7 = vsel %vm436_vm0, %v2371_v50, %v2373_v33  ;;  %v2242_v48 = vrot.slane %v2115_v38, 7  ;;  %v2126_v50 = vld [vmem:[#allocation2 + $0x118] sm:$0xff] }
 0x21f   : > { %v1998_v8 = vmax.f32 %v1966_v18, 0.0  ;;  %v1967_v51 = vadd.f32 %v8642_v23, %v1928_v31  ;;  %v6418_v10 = vpack.i.bf16 %v2374_v7, %v2372_v1  ;;  %v2240_v18 = vrot.slane %v8817_v24, 7  ;;  %v2114_v31 = vld [vmem:[#allocation2 + $0xb8] sm:$0xff]  ;;  %v2123_v7 = vld [vmem:[#allocation2 + $0x100] sm:$0xff] }
 0x220   : > { %v1996_v28 = vmax.f32 %v1964_v3, 0.0  ;;  %v1965_v52 = vadd.f32 %v8642_v23, %v1926_v40  ;;  %v2238_v3 = vrot.slane %v2112_v34, 7  ;;  %v8844_v40 = vsel %vm2211_vm13, %v2243_v36, %v2245_v27  ;;  %v2122_v38 = vld [vmem:[#allocation2 + $0xf8] sm:$0xff] }
 0x221   : > { %2073 = vst.msk [vmem:[#allocation2 + $0x108] sm:$0xff] %vm1623_vm10, %v1998_v8  ;;  %v1999_v14 = vmax.f32 %v1967_v51, 0.0  ;;  %6359 = vrot.lane.b32.xlu0 %v6358_v15, %s7165_s23  ;;  %6354 = vrot.lane.b32.xlu1 %v6353_v55, %s7164_s18  ;;  %v2366_v8 = vrot.slane %v8817_v24, 1  ;;  %v2368_v51 = vrot.slane %v2114_v31, 1  ;;  %v2252_v35 = vrot.slane %v2123_v7, 7  ;;  %v2127_v7 = vld [vmem:[#allocation2 + $0x120] sm:$0xff] }
 0x222   : > { %2071 = vst.msk [vmem:[#allocation2 + $0xe8] sm:$0xff] %vm1623_vm10, %v1996_v28  ;;  %v1997_v12 = vmax.f32 %v1965_v52, 0.0  ;;  %v8847_v25 = vsel %vm2211_vm13, %v2238_v3, %v2240_v18  ;;  %v8856_v55 = vsel %vm2211_vm13, %v2237_v60, %v2238_v3  ;;  %v2365_v28 = vrot.slane %v2112_v34, 1 }
 0x223   : > { %2074 = vst.msk [vmem:[#allocation2 + $0x110] sm:$0xff] %vm1623_vm10, %v1999_v14  ;;  %v6428_v14 = vpack.i.bf16 %v8847_v25, %v8856_v55  ;;  %v2369_v11 = vsel %vm436_vm0, %v2366_v8, %v2368_v51 }
 0x224   : > { %2072 = vst.msk [vmem:[#allocation2 + $0xf0] sm:$0xff] %vm1623_vm10, %v1997_v12 }
 0x225   : > { %6364 = vrot.lane.b32.xlu1 %v6358_v15, %s7162_s28  ;;  %6369 = vrot.lane.b32.xlu0 %v6368_v57, %s7164_s18  ;;  %v8853_v15 = vsel %vm2211_vm13, %v2242_v48, %v2243_v36  ;;  %v2367_v57 = vsel %vm436_vm0, %v2365_v28, %v2366_v8  ;;  %v2378_v36 = vrot.slane %v2122_v38, 1 }
 0x226   : > { %v6413_v2 = vpack.i.bf16 %v8844_v40, %v8853_v15  ;;  %v6433_v34 = vpack.i.bf16 %v2369_v11, %v2367_v57 }
 0x229   : > { %6374 = vrot.lane.b32.xlu1 %v6373_v19, %s7162_s28  ;;  %6379 = vrot.lane.b32.xlu0 %v6373_v19, %s7165_s23 }
 0x22a   : > { %v5385_v58 = vpop.f32.mrb[16].mxu0 }
 0x22b   : > { %v1931_v63 = vmul.f32 %v5385_v58, %v8637_v54  ;;  %v1843_v6 = vpop.f32.mrb[17].mxu0 }
 0x22c   : > { %v1929_v20 = vmul.f32 %v8637_v54, %v1843_v6  ;;  %v5386_v56 = vpop.f32.mrb[18].mxu0 }
 0x22d   : > { %v1970_v26 = vadd.f32 %v8642_v23, %v1931_v63  ;;  %v1932_v43 = vmul.f32 %v5386_v56, %v8637_v54  ;;  %6384 = vrot.lane.b32.xlu0 %v6383_v17, %s7164_s18  ;;  %6404 = vrot.lane.b32.xlu1 %v6403_v13, %s7164_s18  ;;  %v1846_v46 = vpop.f32.mrb[19].mxu0 }
 0x22e   : > { %v1968_v49 = vadd.f32 %v8642_v23, %v1929_v20  ;;  %v1930_v4 = vmul.f32 %v8637_v54, %v1846_v46 }
 0x22f   : > { %v2002_v37 = vmax.f32 %v1970_v26, 0.0  ;;  %v1971_v29 = vadd.f32 %v8642_v23, %v1932_v43  ;;  %v2124_v26 = vld [vmem:[#allocation2 + $0x108] sm:$0xff] }
 0x230   : > { %v2000_v42 = vmax.f32 %v1968_v49, 0.0  ;;  %v1969_v9 = vadd.f32 %v8642_v23, %v1930_v4  ;;  %v2120_v43 = vld [vmem:[#allocation2 + $0xe8] sm:$0xff]  ;;  %v2253_v27 = vrot.slane %v2124_v26, 7 }
 0x231   : > { %2077 = vst.msk [vmem:[#allocation2 + $0x148] sm:$0xff] %vm1623_vm10, %v2002_v37  ;;  %v2003_v21 = vmax.f32 %v1971_v29, 0.0  ;;  %6389 = vrot.lane.b32.xlu0 %v6383_v17, %s7165_s23  ;;  %6409 = vrot.lane.b32.xlu1 %v6403_v13, %s7165_s23  ;;  %v2383_v37 = vrot.slane %v2126_v50, 1  ;;  %v2380_v29 = vrot.slane %v2124_v26, 1  ;;  %v2248_v31 = vrot.slane %v2120_v43, 7 }
 0x232   : > { %2075 = vst.msk [vmem:[#allocation2 + $0x128] sm:$0xff] %vm1623_vm10, %v2000_v42  ;;  %v2001_v47 = vmax.f32 %v1969_v9, 0.0  ;;  %v8906_v11 = vsel %vm2211_vm13, %v2252_v35, %v2253_v27 }
 0x233   : > { %2078 = vst.msk [vmem:[#allocation2 + $0x150] sm:$0xff] %vm1623_vm10, %v2003_v21  ;;  %v2119_v21 = vld [vmem:[#allocation2 + $0xe0] sm:$0xff] }
 0x234   : > { %2076 = vst.msk [vmem:[#allocation2 + $0x130] sm:$0xff] %vm1623_vm10, %v2001_v47  ;;  %v2247_v18 = vrot.slane %v2119_v21, 7  ;;  %v2130_v21 = vld [vmem:[#allocation2 + $0x138] sm:$0xff] }
 0x235   : > { %6394 = vrot.lane.b32.xlu0 %v6383_v17, %s7162_s28  ;;  %6419 = vrot.lane.b32.xlu1 %v6418_v10, %s7165_s23  ;;  %v2125_v17 = vld [vmem:[#allocation2 + $0x110] sm:$0xff] }
 0x236   : > { %v6443_v49 = vpack.i.bf16 %v2125_v17, %v2124_v26  ;;  %v2381_v32 = vrot.slane %v2125_v17, 1  ;;  %v2255_v47 = vrot.slane %v2125_v17, 7  ;;  %v2134_v26 = vld [vmem:[#allocation2 + $0x158] sm:$0xff] }
 0x238   : > { %v2382_v42 = vsel %vm436_vm0, %v2380_v29, %v2381_v32  ;;  %v2384_v9 = vsel %vm436_vm0, %v2381_v32, %v2383_v37  ;;  %v8894_v8 = vsel %vm2211_vm13, %v2253_v27, %v2255_v47  ;;  %v2393_v37 = vrot.slane %v2134_v26, 1 }
 0x239   : > { %6424 = vrot.lane.b32.xlu1 %v6418_v10, %s7162_s28  ;;  %6399 = vrot.lane.b32.xlu0 %v6403_v13, %s7162_s28  ;;  %v8873_v13 = vld [vmem:[#allocation2 + $0xf0] sm:$0xff]  ;;  %v6478_v1 = vpack.i.bf16 %v2384_v9, %v2382_v42 }
 0x23a   : > { %v6463_v4 = vpack.i.bf16 %v8873_v13, %v2120_v43  ;;  %v2250_v10 = vrot.slane %v8873_v13, 7  ;;  %v2376_v28 = vrot.slane %v8873_v13, 1  ;;  %v2133_v50 = vld [vmem:[#allocation2 + $0x150] sm:$0xff] }
 0x23b   : > { %v5389_v52 = vpop.f32.mrb[20].mxu0  ;;  %v2391_v32 = vrot.slane %v2133_v50, 1  ;;  %v2265_v38 = vrot.slane %v2133_v50, 7 }
 0x23c   : > { %v1935_v12 = vmul.f32 %v5389_v52, %v8637_v54  ;;  %v1859_v61 = vpop.f32.mrb[21].mxu0  ;;  %v8897_v51 = vsel %vm2211_vm13, %v2248_v31, %v2250_v10 }
 0x23d   : > { %v1933_v45 = vmul.f32 %v8637_v54, %v1859_v61  ;;  %6414 = vrot.lane.b32.xlu0 %v6413_v2, %s7164_s18  ;;  %6429 = vrot.lane.b32.xlu1 %v6428_v14, %s7164_s18  ;;  %v5390_v19 = vpop.f32.mrb[22].mxu0  ;;  %v2375_v14 = vrot.slane %v2120_v43, 1  ;;  %v2132_v43 = vld [vmem:[#allocation2 + $0x148] sm:$0xff]  ;;  %v2394_v9 = vsel %vm436_vm0, %v2391_v32, %v2393_v37 }
 0x23e   : > { %v1974_v16 = vadd.f32 %v8642_v23, %v1935_v12  ;;  %v1936_v24 = vmul.f32 %v5390_v19, %v8637_v54  ;;  %v1862_v62 = vpop.f32.mrb[23].mxu0  ;;  %v2390_v29 = vrot.slane %v2132_v43, 1 }
 0x23f   : > { %v1972_v58 = vadd.f32 %v8642_v23, %v1933_v45  ;;  %v1934_v41 = vmul.f32 %v8637_v54, %v1862_v62  ;;  %v8909_v45 = vsel %vm2211_vm13, %v2247_v18, %v2248_v31 }
 0x240   : > { %v2006_v63 = vmax.f32 %v1974_v16, 0.0  ;;  %v1975_v6 = vadd.f32 %v8642_v23, %v1936_v24  ;;  %v6473_v24 = vpack.i.bf16 %v8894_v8, %v8906_v11  ;;  %v6488_v62 = vpack.i.bf16 %v8897_v51, %v8909_v45 }
 0x241   : > { %v2004_v20 = vmax.f32 %v1972_v58, 0.0  ;;  %v1973_v56 = vadd.f32 %v8642_v23, %v1934_v41  ;;  %6434 = vrot.lane.b32.xlu0 %v6433_v34, %s7162_s28  ;;  %6439 = vrot.lane.b32.xlu1 %v6433_v34, %s7165_s23  ;;  %v2377_v34 = vsel %vm436_vm0, %v2375_v14, %v2376_v28  ;;  %v2392_v42 = vsel %vm436_vm0, %v2390_v29, %v2391_v32  ;;  %v2139_v29 = vld [vmem:[#allocation2 + $0x180] sm:$0xff] }
 0x242   : > { %2081 = vst.msk [vmem:[#allocation2 + $0x188] sm:$0xff] %vm1623_vm10, %v2006_v63  ;;  %v2007_v33 = vmax.f32 %v1975_v6, 0.0  ;;  %v2379_v63 = vsel %vm436_vm0, %v2376_v28, %v2378_v36  ;;  %v6538_v10 = vpack.i.bf16 %v2394_v9, %v2392_v42  ;;  %v2388_v28 = vrot.slane %v2130_v21, 1  ;;  %v2142_v42 = vld [vmem:[#allocation2 + $0x198] sm:$0xff]  ;;  %v2135_v9 = vld [vmem:[#allocation2 + $0x160] sm:$0xff] }
 0x243   : > { %2079 = vst.msk [vmem:[#allocation2 + $0x168] sm:$0xff] %vm1623_vm10, %v2004_v20  ;;  %v2005_v46 = vmax.f32 %v1973_v56, 0.0  ;;  %v6493_v56 = vpack.i.bf16 %v2379_v63, %v2377_v34  ;;  %v6260_v63 = vpop.permute.xlu1 %6259 }
 0x244   : > { %2082 = vst.msk [vmem:[#allocation2 + $0x190] sm:$0xff] %vm1623_vm10, %v2007_v33  ;;  %v8926_v33 = vld [vmem:[#allocation2 + $0x130] sm:$0xff] }
 0x245   : > { %2080 = vst.msk [vmem:[#allocation2 + $0x170] sm:$0xff] %vm1623_vm10, %v2005_v46  ;;  %6444 = vrot.lane.b32.xlu0 %v6443_v49, %s7164_s18  ;;  %6464 = vrot.lane.b32.xlu1 %v6463_v4, %s7164_s18  ;;  %v2128_v46 = vld [vmem:[#allocation2 + $0x128] sm:$0xff]  ;;  %v2260_v31 = vrot.slane %v8926_v33, 7 }
 0x249   : > { %6449 = vrot.lane.b32.xlu0 %v6443_v49, %s7165_s23  ;;  %6469 = vrot.lane.b32.xlu1 %v6463_v4, %s7165_s23 }
 0x24b   : > { %v2141_v32 = vld [vmem:[#allocation2 + $0x190] sm:$0xff] }
 0x24c   : > { %v8982_v37 = vld [vmem:[#allocation2 + $0x170] sm:$0xff] }
 0x24d   : > { %6454 = vrot.lane.b32.xlu0 %v6443_v49, %s7162_s28  ;;  %6479 = vrot.lane.b32.xlu1 %v6478_v1, %s7165_s23  ;;  %v6503_v49 = vpack.i.bf16 %v2133_v50, %v2132_v43 }
 0x24f   : > { %v5393_v48 = vpop.f32.mrb[24].mxu0 }
 0x250   : > { %v1939_v60 = vmul.f32 %v5393_v48, %v8637_v54  ;;  %v1875_v3 = vpop.f32.mrb[25].mxu0 }
 0x251   : > { %v1937_v52 = vmul.f32 %v8637_v54, %v1875_v3  ;;  %6484 = vrot.lane.b32.xlu1 %v6478_v1, %s7162_s28  ;;  %6459 = vrot.lane.b32.xlu0 %v6463_v4, %s7162_s28  ;;  %v5394_v2 = vpop.f32.mrb[26].mxu0  ;;  %v6523_v4 = vpack.i.bf16 %v8926_v33, %v2128_v46  ;;  %v2131_v1 = vld [vmem:[#allocation2 + $0x140] sm:$0xff]  ;;  %v2257_v3 = vrot.slane %v2127_v7, 7  ;;  %v2136_v7 = vld [vmem:[#allocation2 + $0x168] sm:$0xff] }
 0x252   : > { %v1978_v12 = vadd.f32 %v8642_v23, %v1939_v60  ;;  %v1940_v61 = vmul.f32 %v5394_v2, %v8637_v54  ;;  %v1878_v57 = vpop.f32.mrb[27].mxu0  ;;  %v2262_v18 = vrot.slane %v2131_v1, 7  ;;  %v2263_v60 = vrot.slane %v2132_v43, 7  ;;  %v2140_v1 = vld [vmem:[#allocation2 + $0x188] sm:$0xff] }
 0x253   : > { %v1976_v19 = vadd.f32 %v8642_v23, %v1937_v52  ;;  %v1938_v16 = vmul.f32 %v8637_v54, %v1878_v57 }
 0x254   : > { %v2010_v58 = vmax.f32 %v1978_v12, 0.0  ;;  %v1979_v41 = vadd.f32 %v8642_v23, %v1940_v61  ;;  %v2258_v12 = vrot.slane %v2128_v46, 7 }
 0x255   : > { %v2008_v6 = vmax.f32 %v1976_v19, 0.0  ;;  %v1977_v17 = vadd.f32 %v8642_v23, %v1938_v16  ;;  %6474 = vrot.lane.b32.xlu0 %v6473_v24, %s7164_s18  ;;  %6489 = vrot.lane.b32.xlu1 %v6488_v62, %s7164_s18  ;;  %v8948_v19 = vsel %vm2211_vm13, %v2263_v60, %v2265_v38  ;;  %v7112_v38 = vld [vmem:[#allocation2 + $0x10] sm:$0xff] }
 0x256   : > { %2085 = vst.msk [vmem:[#allocation2 + $0x1c8] sm:$0xff] %vm1623_vm10, %v2010_v58  ;;  %v2011_v13 = vmax.f32 %v1979_v41, 0.0  ;;  %v8952_v62 = vsel %vm2211_vm13, %v2258_v12, %v2260_v31  ;;  %v2386_v58 = vrot.slane %v8926_v33, 1 }
 0x257   : > { %2083 = vst.msk [vmem:[#allocation2 + $0x1a8] sm:$0xff] %vm1623_vm10, %v2008_v6  ;;  %v2009_v20 = vmax.f32 %v1977_v17, 0.0  ;;  %v8962_v17 = vsel %vm2211_vm13, %v2262_v18, %v2263_v60  ;;  %v6262_v18 = vunpack.i.h.bf16 %v6260_v63  ;;  %v8991_v60 = vpack.i.bf16 %v8982_v37, %v2136_v7 }
 0x258   : > { %2086 = vst.msk [vmem:[#allocation2 + $0x1d0] sm:$0xff] %vm1623_vm10, %v2011_v13  ;;  %v8965_v13 = vsel %vm2211_vm13, %v2257_v3, %v2258_v12  ;;  %v2389_v26 = vsel %vm436_vm0, %v2386_v58, %v2388_v28  ;;  %v2272_v3 = vrot.slane %v2139_v29, 7  ;;  %v6261_v28 = vunpack.i.l.bf16 %v6260_v63 }
 0x259   : > { %2084 = vst.msk [vmem:[#allocation2 + $0x1b0] sm:$0xff] %vm1623_vm10, %v2009_v20  ;;  %6494 = vrot.lane.b32.xlu0 %v6493_v56, %s7162_s28  ;;  %6499 = vrot.lane.b32.xlu1 %v6493_v56, %s7165_s23  ;;  %v2385_v20 = vrot.slane %v2128_v46, 1  ;;  %v6533_v56 = vpack.i.bf16 %v8948_v19, %v8962_v17  ;;  %v6548_v50 = vpack.i.bf16 %v8952_v62, %v8965_v13 }
 0x25a   : > { %v3476_v63 = vsel %vm1623_vm10, %v7112_v38, %v6262_v18 }
 0x25b   : > { %v2387_v33 = vsel %vm436_vm0, %v2385_v20, %v2386_v58  ;;  %v2270_v58 = vrot.slane %v8982_v37, 7 }
 0x25d   : > { %6504 = vrot.lane.b32.xlu0 %v6503_v49, %s7164_s18  ;;  %6524 = vrot.lane.b32.xlu1 %v6523_v4, %s7164_s18 }
 0x261   : > { %6509 = vrot.lane.b32.xlu0 %v6503_v49, %s7165_s23  ;;  %6529 = vrot.lane.b32.xlu1 %v6523_v4, %s7165_s23 }
 0x263   : > { %v5397_v47 = vpop.f32.mrb[28].mxu0 }
 0x264   : > { %v1943_v35 = vmul.f32 %v5397_v47, %v8637_v54  ;;  %v1891_v27 = vpop.f32.mrb[29].mxu0  ;;  %v7111_v47 = vld [vmem:[#allocation2 + $0x8] sm:$0xff] }
 0x265   : > { %v1941_v48 = vmul.f32 %v8637_v54, %v1891_v27  ;;  %6514 = vrot.lane.b32.xlu0 %v6503_v49, %s7162_s28  ;;  %6539 = vrot.lane.b32.xlu1 %v6538_v10, %s7165_s23  ;;  %v5398_v36 = vpop.f32.mrb[30].mxu0  ;;  %v6553_v49 = vpack.i.bf16 %v2389_v26, %v2387_v33  ;;  %v2138_v27 = vld [vmem:[#allocation2 + $0x178] sm:$0xff]  ;;  %v2268_v33 = vrot.slane %v2136_v7, 7 }
 0x266   : > { %v1982_v52 = vadd.f32 %v8642_v23, %v1943_v35  ;;  %v1944_v2 = vmul.f32 %v5398_v36, %v8637_v54  ;;  %v1894_v14 = vpop.f32.mrb[31].mxu0  ;;  %v2215_v35 = vrot.slane %v7112_v38, 7  ;;  %v6563_v36 = vpack.i.bf16 %v2141_v32, %v2140_v1 }
 0x267   : > { %v1980_v61 = vadd.f32 %v8642_v23, %v1941_v48  ;;  %v1942_v57 = vmul.f32 %v8637_v54, %v1894_v14  ;;  %v8958_v54 = vpop.permute.xlu0 %6254  ;;  %v2267_v14 = vrot.slane %v2135_v9, 7  ;;  %v2396_v9 = vrot.slane %v8982_v37, 1 }
 0x268   : > { %v2014_v16 = vmax.f32 %v1982_v52, 0.0  ;;  %v1983_v24 = vadd.f32 %v8642_v23, %v1944_v2  ;;  %v2401_v52 = vrot.slane %v2141_v32, 1  ;;  %v2403_v2 = vrot.slane %v2142_v42, 1 }
 0x269   : > { %v2012_v41 = vmax.f32 %v1980_v61, 0.0  ;;  %v1981_v34 = vadd.f32 %v8642_v23, %v1942_v57  ;;  %6544 = vrot.lane.b32.xlu1 %v6538_v10, %s7162_s28  ;;  %6519 = vrot.lane.b32.xlu0 %v6523_v4, %s7162_s28  ;;  %v2091_v4 = vld [vmem:[#allocation2] sm:$0xff]  ;;  %v2213_v10 = vrot.slane %v7111_v47, 7  ;;  %v6257_v12 = vunpack.i.h.bf16 %v8958_v54 }
 0x26a   : > { %2089 = vst.msk [vmem:[#allocation2 + $0x208] sm:$0xff] %vm1623_vm10, %v2014_v16  ;;  %v2015_v6 = vmax.f32 %v1983_v24, 0.0  ;;  %v2212_v21 = vrot.slane %v2091_v4, 7  ;;  %v6256_v61 = vunpack.i.l.bf16 %v8958_v54  ;;  %v2275_v57 = vrot.slane %v2141_v32, 7 }
 0x26b   : > { %2087 = vst.msk [vmem:[#allocation2 + $0x1e8] sm:$0xff] %vm1623_vm10, %v2012_v41  ;;  %v2013_v23 = vmax.f32 %v1981_v34, 0.0  ;;  %v2398_v16 = vrot.slane %v2138_v27, 1  ;;  %v2400_v24 = vrot.slane %v2140_v1, 1  ;;  %v2216_v34 = vsel %vm2211_vm13, %v2213_v10, %v2215_v35 }
 0x26c   : > { %2090 = vst.msk [vmem:[#allocation2 + $0x210] sm:$0xff] %vm1623_vm10, %v2015_v6  ;;  %v2214_v41 = vsel %vm2211_vm13, %v2212_v21, %v2213_v10  ;;  %v3475_v54 = vsel %vm1623_vm10, %v7111_v47, %v6261_v28  ;;  %v2741_v4 = vsel %vm1623_vm10, %v2216_v34, %v6257_v12  ;;  %v9014_v42 = vsel %vm2211_vm13, %v2268_v33, %v2270_v58 }
 0x26d   : > { %2088 = vst.msk [vmem:[#allocation2 + $0x1f0] sm:$0xff] %vm1623_vm10, %v2013_v23  ;;  %6534 = vrot.lane.b32.xlu0 %v6533_v56, %s7164_s18  ;;  %6549 = vrot.lane.b32.xlu1 %v6548_v50, %s7164_s18  ;;  %v2273_v23 = vrot.slane %v2140_v1, 7  ;;  %v2402_v56 = vsel %vm436_vm0, %v2400_v24, %v2401_v52  ;;  %v2404_v50 = vsel %vm436_vm0, %v2401_v52, %v2403_v2  ;;  %v2395_v10 = vrot.slane %v2136_v7, 1 }
 0x26e   : > { %v6598_v47 = vpack.i.bf16 %v2404_v50, %v2402_v56  ;;  %v9023_v18 = vsel %vm2211_vm13, %v2267_v14, %v2268_v33  ;;  %v2399_v2 = vsel %vm436_vm0, %v2396_v9, %v2398_v16 }
 0x26f   : > { %v8978_v43 = vpop.permute.xlu1 %6269  ;;  %v8980_v46 = vpop.permute.xlu0 %6264  ;;  %v9009_v26 = vsel %vm2211_vm13, %v2273_v23, %v2275_v57  ;;  %v9020_v27 = vsel %vm2211_vm13, %v2272_v3, %v2273_v23  ;;  %v6608_v28 = vpack.i.bf16 %v9014_v42, %v9023_v18  ;;  %v2397_v52 = vsel %vm436_vm0, %v2395_v10, %v2396_v9 }
 0x270   : > { %v6593_v37 = vpack.i.bf16 %v9009_v26, %v9020_v27  ;;  %v6272_v34 = vunpack.i.h.bf16 %v8978_v43  ;;  %v6271_v16 = vunpack.i.l.bf16 %v8978_v43 }
 0x271   : > { %6554 = vrot.lane.b32.xlu0 %v6553_v49, %s7162_s28  ;;  %6559 = vrot.lane.b32.xlu1 %v6553_v49, %s7165_s23  ;;  %v2740_v49 = vsel %vm1623_vm10, %v2214_v41, %v6256_v61 }
 0x273   : > { %v8986_v31 = vpop.permute.xlu1 %6274  ;;  %v8988_v48 = vpop.permute.xlu0 %6284 }
 0x274   : > { %v6286_v14 = vunpack.i.l.bf16 %v8988_v48  ;;  %v6276_v58 = vunpack.i.l.bf16 %v8986_v31 }
 0x275   : > { %6564 = vrot.lane.b32.xlu0 %v6563_v36, %s7164_s18  ;;  %6584 = vrot.lane.b32.xlu1 %v8991_v60, %s7164_s18 }
 0x277   : > { %v6290_v6 = vpop.permute.xlu0 %6289  ;;  %v6280_v20 = vpop.permute.xlu1 %6279 }
 0x278   : > { %v6282_v32 = vunpack.i.h.bf16 %v6280_v20  ;;  %v6281_v29 = vunpack.i.l.bf16 %v6280_v20  ;;  %v6292_v20 = vunpack.i.h.bf16 %v6290_v6  ;;  %v6291_v23 = vunpack.i.l.bf16 %v6290_v6 }
 0x279   : > { %6569 = vrot.lane.b32.xlu0 %v6563_v36, %s7165_s23  ;;  %6589 = vrot.lane.b32.xlu1 %v8991_v60, %s7165_s23 }
 0x27a   : > { %v2742_v7 = vsel %vm1623_vm10, %v8752_v30, %v6281_v29  ;;  %v2743_v3 = vsel %vm1623_vm10, %v8743_v44, %v6282_v32  ;;  %v6277_v30 = vunpack.i.h.bf16 %v8986_v31  ;;  %v3507_v32 = vsel %vm2772_vm14, %v3475_v54, %v6286_v14 }
 0x27b   : > { %v9017_v1 = vpop.permute.xlu0 %6299  ;;  %v6295_v21 = vpop.permute.xlu1 %6294 }
 0x27c   : > { %v6297_v38 = vunpack.i.h.bf16 %v6295_v21  ;;  %v6296_v35 = vunpack.i.l.bf16 %v6295_v21  ;;  %v6301_v10 = vunpack.i.l.bf16 %v9017_v1 }
 0x27d   : > { %6574 = vrot.lane.b32.xlu0 %v6563_v36, %s7162_s28  ;;  %6599 = vrot.lane.b32.xlu1 %v6598_v47, %s7165_s23  ;;  %v6287_v36 = vunpack.i.h.bf16 %v8988_v48 }
 0x27e   : > { %v2775_v12 = vsel %vm2772_vm14, %v2742_v7, %v6296_v35  ;;  %v2776_v61 = vsel %vm2772_vm14, %v2743_v3, %v6297_v38  ;;  %v7113_v38 = vld [vmem:[#allocation2 + $0x30] sm:$0xff]  ;;  %v7114_v7 = vld [vmem:[#allocation2 + $0x28] sm:$0xff] }
 0x27f   : > { %v9041_v57 = vpop.permute.xlu1 %6304  ;;  %v6310_v24 = vpop.permute.xlu0 %6309  ;;  %v2808_v50 = vsel %vm2805_vm15, %v2775_v12, %v6276_v58  ;;  %v2809_v31 = vsel %vm2805_vm15, %v2776_v61, %v6277_v30  ;;  %v3508_v33 = vsel %vm2772_vm14, %v3476_v63, %v6287_v36  ;;  %v2147_v30 = vld [vmem:[#allocation2 + $0x1c0] sm:$0xff] }
 0x280   : > { %v6312_v44 = vunpack.i.h.bf16 %v6310_v24  ;;  %v6311_v41 = vunpack.i.l.bf16 %v6310_v24  ;;  %v9062_v54 = vpack.c.bf16 %v2809_v31, %v2808_v50  ;;  %v6613_v24 = vpack.i.bf16 %v2399_v2, %v2397_v52  ;;  %v2143_v58 = vld [vmem:[#allocation2 + $0x1a0] sm:$0xff]  ;;  %v2146_v2 = vld [vmem:[#allocation2 + $0x1b8] sm:$0xff] }
 0x281   : > { %6604 = vrot.lane.b32.xlu1 %v6598_v47, %s7162_s28  ;;  %6579 = vrot.lane.b32.xlu0 %v8991_v60, %s7162_s28  ;;  %v2282_v52 = vrot.slane %v2147_v30, 7  ;;  %v6266_v30 = vunpack.i.l.bf16 %v8980_v46 }
 0x282   : > { %v2773_v48 = vsel %vm2772_vm14, %v2740_v49, %v6311_v41  ;;  %v2774_v56 = vsel %vm2772_vm14, %v2741_v4, %v6312_v44  ;;  %v6302_v4 = vunpack.i.h.bf16 %v9017_v1 }
 0x283   : > { %v6315_v43 = vpop.permute.xlu1 %6314  ;;  %v6320_v29 = vpop.permute.xlu0 %6319  ;;  %v2806_v6 = vsel %vm2805_vm15, %v2773_v48, %v6291_v23  ;;  %v2807_v9 = vsel %vm2805_vm15, %v2774_v56, %v6292_v20  ;;  %v2148_v20 = vld [vmem:[#allocation2 + $0x1c8] sm:$0xff]  ;;  %v2149_v23 = vld [vmem:[#allocation2 + $0x1d0] sm:$0xff] }
 0x284   : > { %v6317_v21 = vunpack.i.h.bf16 %v6315_v43  ;;  %v6316_v60 = vunpack.i.l.bf16 %v6315_v43  ;;  %v6322_v47 = vunpack.i.h.bf16 %v6320_v29  ;;  %v6321_v49 = vunpack.i.l.bf16 %v6320_v29  ;;  %v2150_v29 = vld [vmem:[#allocation2 + $0x1d8] sm:$0xff] }
 0x285   : > { %6594 = vrot.lane.b32.xlu0 %v6593_v37, %s7164_s18  ;;  %6609 = vrot.lane.b32.xlu1 %v6608_v28, %s7164_s18  ;;  %v2838_v63 = vpack.c.bf16 %v2807_v9, %v2806_v6  ;;  %v9086_v31 = vpack.i.bf16 %v2149_v23, %v2148_v20  ;;  %v9088_v6 = vld [vmem:[#allocation2 + $0x1e0] sm:$0xff] }
 0x286   : > { %v3478_v35 = vsel %vm1623_vm10, %v7113_v38, %v6317_v21  ;;  %v3477_v3 = vsel %vm1623_vm10, %v7114_v7, %v6316_v60  ;;  %v3539_v36 = vsel %vm2805_vm15, %v3507_v32, %v6321_v49  ;;  %v3540_v14 = vsel %vm2805_vm15, %v3508_v33, %v6322_v47 }
 0x287   : > { %v3510_v12 = vsel %vm2772_vm14, %v3478_v35, %v6272_v34  ;;  %v3509_v1 = vsel %vm2772_vm14, %v3477_v3, %v6271_v16  ;;  %5415 = vmatprep.mubr.bf16.mxu1 %v2838_v63  ;;  %v9070_v37 = vpop.permute.xlu1 %6329  ;;  %v9072_v28 = vpop.permute.xlu0 %6324  ;;  %v3571_v61 = vpack.c.bf16 %v3540_v14, %v3539_v36  ;;  %v2144_v34 = vld [vmem:[#allocation2 + $0x1a8] sm:$0xff]  ;;  %v2145_v16 = vld [vmem:[#allocation2 + $0x1b0] sm:$0xff]  ;;  %v2283_v33 = vrot.slane %v2148_v20, 7 }
 0x288   : > { %v3542_v44 = vsel %vm2805_vm15, %v3510_v12, %v6302_v4  ;;  %v3541_v41 = vsel %vm2805_vm15, %v3509_v1, %v6301_v10  ;;  %5416 = vmatmul.mubr.bf16.vlgmr.msra.gmra.mrb[0].mxu1 %v9062_v54  ;;  %v2277_v32 = vrot.slane %v2143_v58, 7  ;;  %v2278_v43 = vrot.slane %v2144_v34, 7 }
 0x289   : > { %v9077_v48 = vpack.c.bf16 %v3542_v44, %v3541_v41  ;;  %5463 = vmatprep.mubr.bf16.mxu0 %v3571_v61  ;;  %6614 = vrot.lane.b32.xlu0 %v6613_v24, %s7162_s28  ;;  %v6633_v9 = vpack.i.bf16 %v2145_v16, %v2144_v34  ;;  %v2285_v21 = vrot.slane %v2149_v23, 7  ;;  %v2280_v60 = vrot.slane %v2145_v16, 7 }
 0x28a   : > { %6619 = vrot.lane.b32.xlu1 %v6613_v24, %s7165_s23  ;;  %v2406_v47 = vrot.slane %v2145_v16, 1  ;;  %v2408_v49 = vrot.slane %v2146_v2, 1  ;;  %v2411_v4 = vrot.slane %v2149_v23, 1  ;;  %v2405_v10 = vrot.slane %v2144_v34, 1  ;;  %v9117_v16 = vld [vmem:[#allocation2 + $0x1e8] sm:$0xff] }
 0x28b   : > { %5464 = vmatmul.mubr.bf16.vlgmr.msra.gmra.mrb[32].mxu0 %v9077_v48  ;;  %v9082_v56 = vpop.permute.xlu1 %6334  ;;  %v9084_v50 = vpop.permute.xlu0 %6344  ;;  %v2410_v63 = vrot.slane %v2148_v20, 1  ;;  %v2413_v38 = vrot.slane %v2150_v29, 1  ;;  %v2287_v35 = vrot.slane %v9088_v6, 7  ;;  %v9097_v36 = vsel %vm2211_vm13, %v2282_v52, %v2283_v33 }
 0x28c   : > { %v9100_v14 = vsel %vm2211_vm13, %v2283_v33, %v2285_v21  ;;  %v9103_v12 = vsel %vm2211_vm13, %v2277_v32, %v2278_v43  ;;  %v9106_v1 = vsel %vm2211_vm13, %v2278_v43, %v2280_v60  ;;  %v2407_v61 = vsel %vm436_vm0, %v2405_v10, %v2406_v47  ;;  %v9126_v43 = vld [vmem:[#allocation2 + $0x1f0] sm:$0xff] }
 0x28d   : > { %6624 = vrot.lane.b32.xlu0 %v9086_v31, %s7164_s18  ;;  %v6267_v24 = vunpack.i.h.bf16 %v8980_v46  ;;  %v2409_v58 = vsel %vm436_vm0, %v2406_v47, %v2408_v49  ;;  %v2412_v44 = vsel %vm436_vm0, %v2410_v63, %v2411_v4  ;;  %v6307_v41 = vunpack.i.h.bf16 %v9041_v57 }
 0x28e   : > { %6634 = vrot.lane.b32.xlu1 %v6633_v9, %s7164_s18  ;;  %v2414_v34 = vsel %vm436_vm0, %v2411_v4, %v2413_v38  ;;  %v6306_v52 = vunpack.i.l.bf16 %v9041_v57  ;;  %v6643_v33 = vpack.i.bf16 %v9100_v14, %v9097_v36  ;;  %v6648_v32 = vpack.i.bf16 %v9106_v1, %v9103_v12  ;;  %v7115_v4 = vld [vmem:[#allocation2 + $0x50] sm:$0xff] }
 0x28f   : > { %v9094_v7 = vpop.permute.xlu0 %6349  ;;  %v6340_v3 = vpop.permute.xlu1 %6339  ;;  %v2744_v60 = vsel %vm1623_vm10, %v8737_v5, %v6266_v30  ;;  %v2745_v57 = vsel %vm1623_vm10, %v8731_v0, %v6267_v24  ;;  %v9133_v47 = vpack.i.bf16 %v2414_v34, %v2412_v44  ;;  %v2288_v49 = vrot.slane %v9117_v16, 7  ;;  %v7116_v0 = vld [vmem:[#allocation2 + $0x48] sm:$0xff] }
 0x290   : > { %v6342_v20 = vunpack.i.h.bf16 %v6340_v3  ;;  %v6341_v23 = vunpack.i.l.bf16 %v6340_v3  ;;  %v3480_v10 = vsel %vm1623_vm10, %v7115_v4, %v6307_v41  ;;  %v2290_v5 = vrot.slane %v9126_v43, 7 }
 0x291   : > { %6629 = vrot.lane.b32.xlu0 %v6633_v9, %s7162_s28  ;;  %v3479_v3 = vsel %vm1623_vm10, %v7116_v0, %v6306_v52  ;;  %v6337_v41 = vunpack.i.h.bf16 %v9082_v56  ;;  %v6332_v52 = vunpack.i.h.bf16 %v9070_v37 }
 0x292   : > { %6639 = vrot.lane.b32.xlu1 %v6633_v9, %s7165_s23  ;;  %v6653_v9 = vpack.i.bf16 %v2409_v58, %v2407_v61  ;;  %v2746_v63 = vsel %vm1623_vm10, %v8807_v59, %v6341_v23  ;;  %v2747_v38 = vsel %vm1623_vm10, %v8800_v39, %v6342_v20  ;;  %v6347_v61 = vunpack.i.h.bf16 %v9084_v50  ;;  %v7071_v39 = vld [vmem:[%s10203_s4 + $0x80] sm:$0xff]  }
 0x293   : > { %v9120_v2 = vpop.permute.xlu0 %6359  ;;  %v6355_v46 = vpop.permute.xlu1 %6354  ;;  %v7072_v59 = vld [vmem:[%s10203_s4 + $0xc0] sm:$0xff]   ;;  %v6336_v20 = vunpack.i.l.bf16 %v9082_v56  ;;  %5495 = vmatprep.subr.bf16.mxu1 %v7071_v39 }
 0x294   : > { %v6357_v29 = vunpack.i.h.bf16 %v6355_v46  ;;  %v6356_v21 = vunpack.i.l.bf16 %v6355_v46  ;;  %v6346_v46 = vunpack.i.l.bf16 %v9084_v50  ;;  %v3512_v50 = vsel %vm2772_vm14, %v3480_v10, %v6347_v61  ;;  %5543 = vmatprep.subr.bf16.mxu0 %v7072_v59  ;;  %5496 = vmatpush3.bf16.msra.mxu1 %v7071_v39 }
 0x295   : > { %6644 = vrot.lane.b32.xlu0 %v6643_v33, %s7164_s18  ;;  %v6352_v33 = vunpack.i.h.bf16 %v9094_v7  ;;  %5544 = vmatpush3.bf16.msra.mxu0 %v7072_v59 }
 0x296   : > { %6649 = vrot.lane.b32.xlu1 %v6648_v32, %s7164_s18  ;;  %v2779_v24 = vsel %vm2772_vm14, %v2746_v63, %v6356_v21  ;;  %v2780_v30 = vsel %vm2772_vm14, %v2747_v38, %v6357_v29  ;;  %v6351_v32 = vunpack.i.l.bf16 %v9094_v7  ;;  %v6331_v63 = vunpack.i.l.bf16 %v9070_v37 }
 0x297   : > { %v9147_v58 = vpop.permute.xlu1 %6364  ;;  %v6370_v44 = vpop.permute.xlu0 %6369  ;;  %v2812_v56 = vsel %vm2805_vm15, %v2779_v24, %v6336_v20  ;;  %v2813_v4 = vsel %vm2805_vm15, %v2780_v30, %v6337_v41  ;;  %v3511_v61 = vsel %vm2772_vm14, %v3479_v3, %v6346_v46  ;;  %v6362_v30 = vunpack.i.h.bf16 %v9120_v2  ;;  %v2154_v20 = vld [vmem:[#allocation2 + $0x1f8] sm:$0xff] }
 0x298   : > { %v6372_v23 = vunpack.i.h.bf16 %v6370_v44  ;;  %v6371_v34 = vunpack.i.l.bf16 %v6370_v44  ;;  %v9183_v41 = vpack.c.bf16 %v2813_v4, %v2812_v56  ;;  %v6361_v46 = vunpack.i.l.bf16 %v9120_v2  ;;  %v7076_v2 = vld [vmem:[%s10203_s4 + $0xd0] sm:$0xff]  }
 0x299   : > { %6654 = vrot.lane.b32.xlu0 %v6653_v9, %s7162_s28 }
 0x29a   : > { %v2778_v29 = vsel %vm2772_vm14, %v2745_v57, %v6372_v23  ;;  %v2777_v21 = vsel %vm2772_vm14, %v2744_v60, %v6371_v34  ;;  %6664 = vrot.lane.b32.xlu1 %v6653_v9, %s7165_s23  ;;  %v7073_v9 = vld [vmem:[%s10203_s4 + $0x88] sm:$0xff]   ;;  %10347 = vst [vmem:[#allocation20_spill] sm:$0xff] %v9183_v41  ;;  %v7117_v23 = vld [vmem:[#allocation2 + $0x70] sm:$0xff] }
 0x29b   : > { %v6375_v38 = vpop.permute.xlu1 %6374  ;;  %v6380_v0 = vpop.permute.xlu0 %6379  ;;  %v2810_v7 = vsel %vm2805_vm15, %v2777_v21, %v6351_v32  ;;  %v2811_v44 = vsel %vm2805_vm15, %v2778_v29, %v6352_v33  ;;  %v7074_v60 = vld [vmem:[%s10203_s4 + $0xc8] sm:$0xff]   ;;  %5497 = vmatprep.subr.bf16.mxu1 %v7073_v9 }
 0x29c   : > { %v6377_v57 = vunpack.i.h.bf16 %v6375_v38  ;;  %v6376_v37 = vunpack.i.l.bf16 %v6375_v38  ;;  %v6382_v24 = vunpack.i.h.bf16 %v6380_v0  ;;  %v6381_v10 = vunpack.i.l.bf16 %v6380_v0  ;;  %v7118_v33 = vld [vmem:[#allocation2 + $0x68] sm:$0xff]  ;;  %v2159_v0 = vld [vmem:[#allocation2 + $0x220] sm:$0xff]  ;;  %5545 = vmatprep.subr.bf16.mxu0 %v7074_v60  ;;  %5498 = vmatpush3.bf16.msra.mxu1 %v7073_v9 }
 0x29d   : > { %6659 = vrot.lane.b32.xlu0 %v9086_v31, %s7165_s23  ;;  %v9181_v39 = vpack.c.bf16 %v2811_v44, %v2810_v7  ;;  %v2416_v7 = vrot.slane %v9126_v43, 1  ;;  %v2418_v44 = vrot.slane %v2154_v20, 1  ;;  %5546 = vmatpush3.bf16.msra.mxu0 %v7074_v60  ;;  %v2158_v20 = vld [vmem:[#allocation2 + $0x218] sm:$0xff] }
 0x29e   : > { %v3482_v34 = vsel %vm1623_vm10, %v7117_v23, %v6377_v57  ;;  %v3481_v32 = vsel %vm1623_vm10, %v7118_v33, %v6376_v37  ;;  %6669 = vrot.lane.b32.xlu1 %v9133_v47, %s7165_s23  ;;  %v3543_v3 = vsel %vm2805_vm15, %v3511_v61, %v6381_v10  ;;  %v3544_v59 = vsel %vm2805_vm15, %v3512_v50, %v6382_v24  ;;  %v7075_v50 = vld [vmem:[%s10203_s4 + $0x90] sm:$0xff]   ;;  %v9209_v57 = vld [vmem:[#allocation2 + $0x228] sm:$0xff] }
 0x29f   : > { %10346 = vst [vmem:[#allocation21_spill] sm:$0xff] %v9181_v39  ;;  %5419 = vmatprep.mubr.bf16.mxu1 %v9181_v39  ;;  %v9193_v29 = vpop.permute.xlu0 %6384  ;;  %v9195_v21 = vpop.permute.xlu1 %6404  ;;  %v9197_v56 = vpack.c.bf16 %v3544_v59, %v3543_v3  ;;  %v3513_v4 = vsel %vm2772_vm14, %v3481_v32, %v6331_v63  ;;  %v3514_v38 = vsel %vm2772_vm14, %v3482_v34, %v6332_v52  ;;  %v9211_v63 = vld [vmem:[#allocation2 + $0x230] sm:$0xff]  ;;  %v2415_v61 = vrot.slane %v9117_v16, 1  ;;  %v2156_v33 = vld [vmem:[#allocation2 + $0x208] sm:$0xff]  ;;  %v7077_v3 = vld [vmem:[%s10203_s4 + $0x98] sm:$0xff]  }
 0x2a0   : > { %5420 = vmatmul.mubr.bf16.gmra.mrb[4].mxu1 %v9183_v41  ;;  %v3545_v52 = vsel %vm2805_vm15, %v3513_v4, %v6361_v46  ;;  %v3546_v37 = vsel %vm2805_vm15, %v3514_v38, %v6362_v30  ;;  %v9223_v24 = vsel %vm2211_vm13, %v2288_v49, %v2290_v5  ;;  %v2157_v10 = vld [vmem:[#allocation2 + $0x210] sm:$0xff]  ;;  %v2439_v23 = vrot.slane %v2159_v0, 7  ;;  %5499 = vmatprep.subr.bf16.mxu1 %v7075_v50 }
 0x2a1   : > { %10348 = vst [vmem:[#allocation14_spill] sm:$0xff] %v9197_v56  ;;  %5467 = vmatprep.mubr.bf16.mxu0 %v9197_v56  ;;  %6674 = vrot.lane.b32.xlu0 %v9086_v31, %s7162_s28  ;;  %v9227_v60 = vpack.c.bf16 %v3546_v37, %v3545_v52  ;;  %v2155_v31 = vld [vmem:[#allocation2 + $0x200] sm:$0xff]  ;;  %v9236_v5 = vpack.i.bf16 %v9126_v43, %v9117_v16  ;;  %v2440_v32 = vrot.slane %v9209_v57, 7  ;;  %v2442_v9 = vrot.slane %v9211_v63, 7  ;;  %v7078_v16 = vld [vmem:[%s10203_s4 + $0xd8] sm:$0xff]  }
 0x2a2   : > { %6679 = vrot.lane.b32.xlu1 %v9133_v47, %s7162_s28  ;;  %v9243_v47 = vsel %vm2211_vm13, %v2287_v35, %v2288_v49  ;;  %5547 = vmatprep.subr.bf16.mxu0 %v7076_v2  ;;  %v2417_v35 = vsel %vm436_vm0, %v2415_v61, %v2416_v7  ;;  %v2419_v43 = vsel %vm436_vm0, %v2416_v7, %v2418_v44  ;;  %v2426_v49 = vrot.slane %v2157_v10, 7 }
 0x2a3   : > { %10349 = vst [vmem:[#allocation16_spill] sm:$0xff] %v9227_v60  ;;  %v9230_v30 = vpop.permute.xlu0 %6389  ;;  %v9232_v34 = vpop.permute.xlu1 %6409  ;;  %5468 = vmatmul.mubr.bf16.gmra.mrb[36].mxu0 %v9227_v60  ;;  %v6688_v6 = vpack.i.bf16 %v9223_v24, %v9243_v47  ;;  %v2432_v59 = vrot.slane %v2157_v10, 1  ;;  %v2434_v46 = vrot.slane %v2158_v20, 1  ;;  %v2423_v4 = vrot.slane %v2155_v31, 7  ;;  %5500 = vmatpush3.bf16.msra.mxu1 %v7075_v50  ;;  %v9273_v20 = vld [vmem:[#allocation2 + $0x238] sm:$0xff]  ;;  %v7079_v50 = vld [vmem:[%s10203_s4 + $0xa0] sm:$0xff]  }
 0x2a4   : > { %5548 = vmatpush3.bf16.msra.mxu0 %v7076_v2  ;;  %v2424_v38 = vrot.slane %v2156_v33, 7  ;;  %v9265_v37 = vpack.i.bf16 %v2419_v43, %v2417_v35  ;;  %v2431_v61 = vrot.slane %v2156_v33, 1  ;;  %v9268_v7 = vsel %vm2211_vm13, %v2439_v23, %v2440_v32  ;;  %5501 = vmatprep.subr.bf16.mxu1 %v7077_v3  ;;  %v7080_v2 = vld [vmem:[%s10203_s4 + $0xe0] sm:$0xff]  }
 0x2a5   : > { %6684 = vrot.lane.b32.xlu0 %v9236_v5, %s7162_s28  ;;  %v9271_v44 = vsel %vm2211_vm13, %v2440_v32, %v2442_v9  ;;  %5549 = vmatprep.subr.bf16.mxu0 %v7078_v16  ;;  %v6327_v9 = vunpack.i.h.bf16 %v9072_v28  ;;  %v2435_v43 = vsel %vm436_vm0, %v2432_v59, %v2434_v46  ;;  %v6367_v60 = vunpack.i.h.bf16 %v9147_v58 }
 0x2a6   : > { %6689 = vrot.lane.b32.xlu1 %v6688_v6, %s7164_s18  ;;  %v9282_v31 = vsel %vm2211_vm13, %v2424_v38, %v2426_v49  ;;  %v6326_v6 = vunpack.i.l.bf16 %v9072_v28  ;;  %v2433_v35 = vsel %vm436_vm0, %v2431_v61, %v2432_v59  ;;  %v6366_v49 = vunpack.i.l.bf16 %v9147_v58  ;;  %v7082_v58 = vld [vmem:[%s10203_s4 + $0xe8] sm:$0xff]   ;;  %v7119_v28 = vld [vmem:[#allocation2 + $0x90] sm:$0xff] }
 0x2a7   : > { %v9261_v0 = vpop.permute.xlu0 %6394  ;;  %v9263_v52 = vpop.permute.xlu1 %6419  ;;  %10350 = vst [vmem:[#allocation10_spill] sm:$0xff] %v9282_v31  ;;  %v9297_v23 = vsel %vm2211_vm13, %v2423_v4, %v2424_v38  ;;  %5502 = vmatpush3.bf16.msra.mxu1 %v7077_v3  ;;  %v6407_v32 = vunpack.i.h.bf16 %v9195_v21  ;;  %v9305_v59 = vpack.i.bf16 %v2157_v10, %v2156_v33  ;;  %v9310_v46 = vpack.i.bf16 %v2435_v43, %v2433_v35  ;;  %v7081_v3 = vld [vmem:[%s10203_s4 + $0xa8] sm:$0xff]  }
 0x2a8   : > { %5550 = vmatpush3.bf16.msra.mxu0 %v7078_v16  ;;  %10351 = vst [vmem:[#allocation3_spill] sm:$0xff] %v9297_v23  ;;  %v6703_v16 = vpack.i.bf16 %v9282_v31, %v9297_v23  ;;  %5503 = vmatprep.subr.bf16.mxu1 %v7079_v50  ;;  %v2748_v4 = vsel %vm1623_vm10, %v8793_v53, %v6326_v6  ;;  %v7120_v35 = vld [vmem:[#allocation2 + $0x88] sm:$0xff]  ;;  %v6386_v56 = vunpack.i.l.bf16 %v9193_v29  ;;  %v6406_v53 = vunpack.i.l.bf16 %v9195_v21  ;;  %v7084_v21 = vld [vmem:[%s10203_s4 + $0xf0] sm:$0xff]  }
 0x2a9   : > { %6694 = vrot.lane.b32.xlu0 %v9265_v37, %s7162_s28  ;;  %5551 = vmatprep.subr.bf16.mxu0 %v7080_v2  ;;  %v2749_v38 = vsel %vm1623_vm10, %v8784_v22, %v6327_v9  ;;  %v3484_v23 = vsel %vm1623_vm10, %v7119_v28, %v6367_v60  ;;  %v3483_v43 = vsel %vm1623_vm10, %v7120_v35, %v6366_v49  ;;  %v6392_v9 = vunpack.i.h.bf16 %v9230_v30 }
 0x2aa   : > { %6699 = vrot.lane.b32.xlu1 %v9236_v5, %s7164_s18  ;;  %v3516_v22 = vsel %vm2772_vm14, %v3484_v23, %v6407_v32  ;;  %v6412_v23 = vunpack.i.h.bf16 %v9232_v34 }
 0x2ab   : > { %v9301_v41 = vpop.permute.xlu1 %6424  ;;  %v6400_v61 = vpop.permute.xlu0 %6399  ;;  %5504 = vmatpush3.bf16.msra.mxu1 %v7079_v50 }
 0x2ac   : > { %v6402_v10 = vunpack.i.h.bf16 %v6400_v61  ;;  %v6401_v33 = vunpack.i.l.bf16 %v6400_v61  ;;  %5552 = vmatpush3.bf16.msra.mxu0 %v7080_v2  ;;  %v6391_v2 = vunpack.i.l.bf16 %v9230_v30  ;;  %5505 = vmatprep.subr.bf16.mxu1 %v7081_v3  ;;  %v6411_v30 = vunpack.i.l.bf16 %v9232_v34 }
 0x2ad   : > { %6704 = vrot.lane.b32.xlu0 %v6703_v16, %s7164_s18  ;;  %5553 = vmatprep.subr.bf16.mxu0 %v7082_v58 }
 0x2ae   : > { %6709 = vrot.lane.b32.xlu1 %v9236_v5, %s7165_s23  ;;  %v7083_v5 = vld [vmem:[%s10203_s4 + $0xb0] sm:$0xff]   ;;  %v2750_v50 = vsel %vm1623_vm10, %v8856_v55, %v6401_v33  ;;  %v2751_v32 = vsel %vm1623_vm10, %v8847_v25, %v6402_v10 }
 0x2af   : > { %v6415_v6 = vpop.permute.xlu0 %6414  ;;  %v6430_v60 = vpop.permute.xlu1 %6429  ;;  %5506 = vmatpush3.bf16.msra.mxu1 %v7081_v3 }
 0x2b0   : > { %v6417_v49 = vunpack.i.h.bf16 %v6415_v6  ;;  %v6416_v28 = vunpack.i.l.bf16 %v6415_v6  ;;  %v6432_v61 = vunpack.i.h.bf16 %v6430_v60  ;;  %v6431_v16 = vunpack.i.l.bf16 %v6430_v60  ;;  %5554 = vmatpush3.bf16.msra.mxu0 %v7082_v58  ;;  %5507 = vmatprep.subr.bf16.mxu1 %v7083_v5 }
 0x2b1   : > { %6714 = vrot.lane.b32.xlu0 %v9305_v59, %s7164_s18  ;;  %5555 = vmatprep.subr.bf16.mxu0 %v7084_v21 }
 0x2b2   : > { %6719 = vrot.lane.b32.xlu1 %v9265_v37, %s7165_s23  ;;  %v2781_v35 = vsel %vm2772_vm14, %v2748_v4, %v6431_v16  ;;  %v2782_v6 = vsel %vm2772_vm14, %v2749_v38, %v6432_v61  ;;  %v2783_v60 = vsel %vm2772_vm14, %v2750_v50, %v6416_v28  ;;  %v2784_v34 = vsel %vm2772_vm14, %v2751_v32, %v6417_v49  ;;  %v7085_v38 = vld [vmem:[%s10203_s4 + $0xb8] sm:$0xff]   ;;  %v7122_v61 = vld [vmem:[#allocation2 + $0xa8] sm:$0xff] }
 0x2b3   : > { %v6435_v31 = vpop.permute.xlu0 %6434  ;;  %v6440_v55 = vpop.permute.xlu1 %6439  ;;  %v2814_v33 = vsel %vm2805_vm15, %v2781_v35, %v6411_v30  ;;  %v2815_v25 = vsel %vm2805_vm15, %v2782_v6, %v6412_v23  ;;  %v2816_v10 = vsel %vm2805_vm15, %v2783_v60, %v6391_v2  ;;  %v2817_v58 = vsel %vm2805_vm15, %v2784_v34, %v6392_v9  ;;  %v7086_v30 = vld [vmem:[%s10203_s4 + $0xf8] sm:$0xff]   ;;  %5508 = vmatpush3.bf16.msra.mxu1 %v7083_v5 }
 0x2b4   : > { %v6437_v37 = vunpack.i.h.bf16 %v6435_v31  ;;  %v6436_v39 = vunpack.i.l.bf16 %v6435_v31  ;;  %v6442_v4 = vunpack.i.h.bf16 %v6440_v55  ;;  %v6441_v16 = vunpack.i.l.bf16 %v6440_v55  ;;  %5556 = vmatpush3.bf16.msra.mxu0 %v7084_v21  ;;  %v7121_v31 = vld [vmem:[#allocation2 + $0xb0] sm:$0xff]  ;;  %5509 = vmatprep.subr.bf16.mxu1 %v7085_v38 }
 0x2b5   : > { %v3515_v49 = vsel %vm2772_vm14, %v3483_v43, %v6406_v53  ;;  %v6422_v28 = vunpack.i.h.bf16 %v9263_v52  ;;  %6724 = vrot.lane.b32.xlu0 %v9305_v59, %s7165_s23  ;;  %v9361_v2 = vpack.c.bf16 %v2815_v25, %v2814_v33  ;;  %v9363_v3 = vpack.c.bf16 %v2817_v58, %v2816_v10  ;;  %5557 = vmatprep.subr.bf16.mxu0 %v7086_v30 }
 0x2b6   : > { %v3486_v9 = vsel %vm1623_vm10, %v7121_v31, %v6437_v37  ;;  %v3485_v23 = vsel %vm1623_vm10, %v7122_v61, %v6436_v39  ;;  %6729 = vrot.lane.b32.xlu1 %v9310_v46, %s7165_s23  ;;  %v3547_v43 = vsel %vm2805_vm15, %v3515_v49, %v6441_v16  ;;  %v3548_v53 = vsel %vm2805_vm15, %v3516_v22, %v6442_v4  ;;  %v7123_v61 = vld [vmem:[#allocation2 + $0xd0] sm:$0xff] }
 0x2b7   : > { %v6421_v50 = vunpack.i.l.bf16 %v9263_v52  ;;  %5423 = vmatprep.mubr.bf16.mxu1 %v9361_v2  ;;  %v9376_v21 = vpop.permute.xlu0 %6444  ;;  %v9378_v32 = vpop.permute.xlu1 %6464  ;;  %v9380_v39 = vpack.c.bf16 %v3548_v53, %v3547_v43  ;;  %v3517_v35 = vsel %vm2772_vm14, %v3485_v23, %v6386_v56  ;;  %v10352_v6 = vunpack.i.h.bf16 %v9193_v29  ;;  %5510 = vmatpush3.bf16.msra.mxu1 %v7085_v38  ;;  %v7124_v43 = vld [vmem:[#allocation2 + $0xc8] sm:$0xff] }
 0x2b8   : > { %5424 = vmatmul.mubr.bf16.gmra.mrb[8].mxu1 %v9363_v3  ;;  %v6743_v56 = vpack.i.bf16 %v9271_v44, %v9268_v7  ;;  %v6748_v5 = vpack.i.bf16 %v9211_v63, %v9209_v57  ;;  %v10354_v33 = vrot.slane %v9209_v57, 1  ;;  %v10355_v10 = vrot.slane %v9273_v20, 1  ;;  %5558 = vmatpush3.bf16.msra.mxu0 %v7086_v30 }
 0x2b9   : > { %v3518_v22 = vsel %vm2772_vm14, %v3486_v9, %v10352_v6  ;;  %5471 = vmatprep.mubr.bf16.mxu0 %v9380_v39  ;;  %6734 = vrot.lane.b32.xlu0 %v9305_v59, %s7162_s28  ;;  %v3549_v52 = vsel %vm2805_vm15, %v3517_v35, %v6421_v50  ;;  %v10353_v59 = vrot.slane %v9211_v63, 1  ;;  %v6397_v37 = vunpack.i.h.bf16 %v9261_v0 }
 0x2ba   : > { %v3550_v60 = vsel %vm2805_vm15, %v3518_v22, %v6422_v28  ;;  %6739 = vrot.lane.b32.xlu1 %v9310_v46, %s7162_s28  ;;  %v6396_v20 = vunpack.i.l.bf16 %v9261_v0  ;;  %v6427_v63 = vunpack.i.h.bf16 %v9301_v41  ;;  %v6426_v4 = vunpack.i.l.bf16 %v9301_v41 }
 0x2bb   : > { %v9396_v29 = vpack.c.bf16 %v3550_v60, %v3549_v52  ;;  %v6450_v34 = vpop.permute.xlu0 %6449  ;;  %v6470_v55 = vpop.permute.xlu1 %6469  ;;  %v2447_v25 = vsel %vm436_vm0, %v10354_v33, %v10353_v59  ;;  %v10356_v7 = vmov %v10353_v59  ;;  %v6467_v16 = vunpack.i.h.bf16 %v9378_v32 }
 0x2bc   : > { %v2449_v44 = vsel %vm436_vm0, %v10356_v7, %v10355_v10  ;;  %v2752_v28 = vsel %vm1623_vm10, %v8853_v15, %v6396_v20  ;;  %v2753_v31 = vsel %vm1623_vm10, %v8844_v40, %v6397_v37  ;;  %v3488_v23 = vsel %vm1623_vm10, %v7123_v61, %v6427_v63 }
 0x2bd   : > { %5472 = vmatmul.mubr.bf16.gmra.mrb[40].mxu0 %v9396_v29  ;;  %6744 = vrot.lane.b32.xlu0 %v6743_v56, %s7164_s18  ;;  %v6758_v46 = vpack.i.bf16 %v2449_v44, %v2447_v25  ;;  %v3487_v41 = vsel %vm1623_vm10, %v7124_v43, %v6426_v4  ;;  %v6447_v53 = vunpack.i.h.bf16 %v9376_v21  ;;  %v6446_v30 = vunpack.i.l.bf16 %v9376_v21 }
 0x2be   : > { %6749 = vrot.lane.b32.xlu1 %v6748_v5, %s7164_s18  ;;  %v3520_v50 = vsel %vm2772_vm14, %v3488_v23, %v6467_v16  ;;  %v6466_v35 = vunpack.i.l.bf16 %v9378_v32  ;;  %v6452_v15 = vunpack.i.h.bf16 %v6450_v34  ;;  %v6451_v6 = vunpack.i.l.bf16 %v6450_v34  ;;  %v7126_v23 = vld [vmem:[#allocation2 + $0xe8] sm:$0xff] }
 0x2bf   : > { %v9413_v58 = vpop.permute.xlu0 %6454  ;;  %v9415_v57 = vpop.permute.xlu1 %6479  ;;  %v6472_v59 = vunpack.i.h.bf16 %v6470_v55  ;;  %v6471_v33 = vunpack.i.l.bf16 %v6470_v55 }
 0x2c1   : > { %6754 = vrot.lane.b32.xlu0 %v6748_v5, %s7165_s23 }
 0x2c2   : > { %6759 = vrot.lane.b32.xlu1 %v6758_v46, %s7165_s23 }
 0x2c3   : > { %v9424_v38 = vpop.permute.xlu1 %6484  ;;  %v6460_v49 = vpop.permute.xlu0 %6459 }
 0x2c4   : > { %v6462_v0 = vunpack.i.h.bf16 %v6460_v49  ;;  %v6461_v9 = vunpack.i.l.bf16 %v6460_v49  ;;  %v3519_v49 = vsel %vm2772_vm14, %v3487_v41, %v6466_v35 }
 0x2c6   : > { %v2754_v25 = vsel %vm1623_vm10, %v8909_v45, %v6461_v9  ;;  %v2755_v21 = vsel %vm1623_vm10, %v8897_v51, %v6462_v0  ;;  %v7125_v9 = vld [vmem:[#allocation2 + $0xf0] sm:$0xff] }
 0x2c7   : > { %v6475_v22 = vpop.permute.xlu0 %6474  ;;  %v6490_v40 = vpop.permute.xlu1 %6489 }
 0x2c8   : > { %v6477_v52 = vunpack.i.h.bf16 %v6475_v22  ;;  %v6476_v60 = vunpack.i.l.bf16 %v6475_v22  ;;  %v6492_v56 = vunpack.i.h.bf16 %v6490_v40  ;;  %v6491_v5 = vunpack.i.l.bf16 %v6490_v40 }
 0x2c9   : > { %v6481_v22 = vunpack.i.l.bf16 %v9415_v57 }
 0x2ca   : > { %v2787_v10 = vsel %vm2772_vm14, %v2754_v25, %v6476_v60  ;;  %v2788_v32 = vsel %vm2772_vm14, %v2755_v21, %v6477_v52  ;;  %v2786_v34 = vsel %vm2772_vm14, %v2753_v31, %v6492_v56  ;;  %v2785_v7 = vsel %vm2772_vm14, %v2752_v28, %v6491_v5 }
 0x2cb   : > { %v6495_v44 = vpop.permute.xlu0 %6494  ;;  %v6500_v46 = vpop.permute.xlu1 %6499  ;;  %v2818_v37 = vsel %vm2805_vm15, %v2785_v7, %v6471_v33  ;;  %v2819_v55 = vsel %vm2805_vm15, %v2786_v34, %v6472_v59  ;;  %v2820_v20 = vsel %vm2805_vm15, %v2787_v10, %v6451_v6  ;;  %v2821_v45 = vsel %vm2805_vm15, %v2788_v32, %v6452_v15 }
 0x2cc   : > { %v6497_v63 = vunpack.i.h.bf16 %v6495_v44  ;;  %v6496_v51 = vunpack.i.l.bf16 %v6495_v44  ;;  %v6502_v4 = vunpack.i.h.bf16 %v6500_v46  ;;  %v6501_v16 = vunpack.i.l.bf16 %v6500_v46 }
 0x2cd   : > { %v6482_v31 = vunpack.i.h.bf16 %v9415_v57  ;;  %v9450_v0 = vpack.c.bf16 %v2819_v55, %v2818_v37  ;;  %v9452_v28 = vpack.c.bf16 %v2821_v45, %v2820_v20  ;;  %v6487_v21 = vunpack.i.h.bf16 %v9424_v38  ;;  %v7127_v20 = vld [vmem:[#allocation2 + $0x110] sm:$0xff] }
 0x2ce   : > { %v3490_v61 = vsel %vm1623_vm10, %v7125_v9, %v6497_v63  ;;  %v3489_v43 = vsel %vm1623_vm10, %v7126_v23, %v6496_v51  ;;  %v3551_v15 = vsel %vm2805_vm15, %v3519_v49, %v6501_v16  ;;  %v3552_v6 = vsel %vm2805_vm15, %v3520_v50, %v6502_v4 }
 0x2cf   : > { %5427 = vmatprep.mubr.bf16.mxu1 %v9450_v0  ;;  %v9460_v41 = vpop.permute.xlu0 %6504  ;;  %v6525_v35 = vpop.permute.xlu1 %6524  ;;  %v9462_v40 = vpack.c.bf16 %v3552_v6, %v3551_v15  ;;  %v3521_v52 = vsel %vm2772_vm14, %v3489_v43, %v6446_v30  ;;  %v3522_v60 = vsel %vm2772_vm14, %v3490_v61, %v6447_v53  ;;  %v6457_v53 = vunpack.i.h.bf16 %v9413_v58 }
 0x2d0   : > { %5428 = vmatmul.mubr.bf16.gmra.mrb[12].mxu1 %v9452_v28  ;;  %v3553_v56 = vsel %vm2805_vm15, %v3521_v52, %v6481_v22  ;;  %v3554_v50 = vsel %vm2805_vm15, %v3522_v60, %v6482_v31  ;;  %v6456_v30 = vunpack.i.l.bf16 %v9413_v58  ;;  %v6486_v10 = vunpack.i.l.bf16 %v9424_v38  ;;  %v7128_v58 = vld [vmem:[#allocation2 + $0x108] sm:$0xff] }
 0x2d1   : > { %5475 = vmatprep.mubr.bf16.mxu0 %v9462_v40  ;;  %v9470_v57 = vpack.c.bf16 %v3554_v50, %v3553_v56  ;;  %v6527_v32 = vunpack.i.h.bf16 %v6525_v35  ;;  %v2757_v46 = vsel %vm1623_vm10, %v8894_v8, %v6457_v53  ;;  %v3492_v45 = vsel %vm1623_vm10, %v7127_v20, %v6487_v21 }
 0x2d2   : > { %v2756_v44 = vsel %vm1623_vm10, %v8906_v11, %v6456_v30  ;;  %v3491_v63 = vsel %vm1623_vm10, %v7128_v58, %v6486_v10  ;;  %v6507_v38 = vunpack.i.h.bf16 %v9460_v41  ;;  %v6506_v51 = vunpack.i.l.bf16 %v9460_v41 }
 0x2d3   : > { %v6510_v5 = vpop.permute.xlu0 %6509  ;;  %v6530_v59 = vpop.permute.xlu1 %6529  ;;  %5476 = vmatmul.mubr.bf16.gmra.mrb[44].mxu0 %v9470_v57  ;;  %v3524_v4 = vsel %vm2772_vm14, %v3492_v45, %v6527_v32  ;;  %v6526_v16 = vunpack.i.l.bf16 %v6525_v35  ;;  %v7130_v45 = vld [vmem:[#allocation2 + $0x128] sm:$0xff] }
 0x2d4   : > { %v6512_v49 = vunpack.i.h.bf16 %v6510_v5  ;;  %v6511_v11 = vunpack.i.l.bf16 %v6510_v5  ;;  %v6532_v15 = vunpack.i.h.bf16 %v6530_v59  ;;  %v6531_v6 = vunpack.i.l.bf16 %v6530_v59 }
 0x2d7   : > { %v9473_v33 = vpop.permute.xlu0 %6514  ;;  %v9475_v25 = vpop.permute.xlu1 %6539 }
 0x2db   : > { %v9481_v34 = vpop.permute.xlu1 %6544  ;;  %v6520_v7 = vpop.permute.xlu0 %6519 }
 0x2dc   : > { %v6522_v37 = vunpack.i.h.bf16 %v6520_v7  ;;  %v6521_v55 = vunpack.i.l.bf16 %v6520_v7  ;;  %v3523_v7 = vsel %vm2772_vm14, %v3491_v63, %v6526_v16 }
 0x2de   : > { %v2758_v22 = vsel %vm1623_vm10, %v8965_v13, %v6521_v55  ;;  %v2759_v52 = vsel %vm1623_vm10, %v8952_v62, %v6522_v37  ;;  %v7129_v55 = vld [vmem:[#allocation2 + $0x130] sm:$0xff] }
 0x2df   : > { %v6535_v31 = vpop.permute.xlu0 %6534  ;;  %v6550_v9 = vpop.permute.xlu1 %6549 }
 0x2e0   : > { %v6537_v8 = vunpack.i.h.bf16 %v6535_v31  ;;  %v6536_v61 = vunpack.i.l.bf16 %v6535_v31  ;;  %v6552_v23 = vunpack.i.h.bf16 %v6550_v9  ;;  %v6551_v43 = vunpack.i.l.bf16 %v6550_v9 }
 0x2e1   : > { %v6541_v31 = vunpack.i.l.bf16 %v9475_v25 }
 0x2e2   : > { %v2791_v41 = vsel %vm2772_vm14, %v2758_v22, %v6536_v61  ;;  %v2792_v35 = vsel %vm2772_vm14, %v2759_v52, %v6537_v8  ;;  %v2790_v60 = vsel %vm2772_vm14, %v2757_v46, %v6552_v23  ;;  %v2789_v56 = vsel %vm2772_vm14, %v2756_v44, %v6551_v43 }
 0x2e3   : > { %v6555_v50 = vpop.permute.xlu0 %6554  ;;  %v6560_v5 = vpop.permute.xlu1 %6559  ;;  %v2822_v53 = vsel %vm2805_vm15, %v2789_v56, %v6531_v6  ;;  %v2823_v59 = vsel %vm2805_vm15, %v2790_v60, %v6532_v15  ;;  %v2824_v30 = vsel %vm2805_vm15, %v2791_v41, %v6511_v11  ;;  %v2825_v13 = vsel %vm2805_vm15, %v2792_v35, %v6512_v49 }
 0x2e4   : > { %v6557_v21 = vunpack.i.h.bf16 %v6555_v50  ;;  %v6556_v62 = vunpack.i.l.bf16 %v6555_v50  ;;  %v6562_v10 = vunpack.i.h.bf16 %v6560_v5  ;;  %v6561_v32 = vunpack.i.l.bf16 %v6560_v5 }
 0x2e5   : > { %v6542_v46 = vunpack.i.h.bf16 %v9475_v25  ;;  %v9506_v37 = vpack.c.bf16 %v2823_v59, %v2822_v53  ;;  %v9508_v44 = vpack.c.bf16 %v2825_v13, %v2824_v30  ;;  %v6547_v52 = vunpack.i.h.bf16 %v9481_v34  ;;  %v7131_v59 = vld [vmem:[#allocation2 + $0x150] sm:$0xff]  ;;  %v7132_v13 = vld [vmem:[#allocation2 + $0x148] sm:$0xff] }
 0x2e6   : > { %v3494_v20 = vsel %vm1623_vm10, %v7129_v55, %v6557_v21  ;;  %v3493_v58 = vsel %vm1623_vm10, %v7130_v45, %v6556_v62  ;;  %v3555_v49 = vsel %vm2805_vm15, %v3523_v7, %v6561_v32  ;;  %v3556_v11 = vsel %vm2805_vm15, %v3524_v4, %v6562_v10 }
 0x2e7   : > { %5431 = vmatprep.mubr.bf16.mxu1 %v9506_v37  ;;  %v9516_v63 = vpop.permute.xlu0 %6564  ;;  %v6585_v16 = vpop.permute.xlu1 %6584  ;;  %v9518_v9 = vpack.c.bf16 %v3556_v11, %v3555_v49  ;;  %v3525_v8 = vsel %vm2772_vm14, %v3493_v58, %v6506_v51  ;;  %v3526_v61 = vsel %vm2772_vm14, %v3494_v20, %v6507_v38  ;;  %v6517_v38 = vunpack.i.h.bf16 %v9473_v33 }
 0x2e8   : > { %5432 = vmatmul.mubr.bf16.gmra.mrb[16].mxu1 %v9508_v44  ;;  %v3557_v23 = vsel %vm2805_vm15, %v3525_v8, %v6541_v31  ;;  %v3558_v4 = vsel %vm2805_vm15, %v3526_v61, %v6542_v46  ;;  %v6516_v51 = vunpack.i.l.bf16 %v9473_v33  ;;  %v6546_v41 = vunpack.i.l.bf16 %v9481_v34 }
 0x2e9   : > { %5479 = vmatprep.mubr.bf16.mxu0 %v9518_v9  ;;  %v9526_v25 = vpack.c.bf16 %v3558_v4, %v3557_v23  ;;  %v2761_v50 = vsel %vm1623_vm10, %v8948_v19, %v6517_v38  ;;  %v3496_v30 = vsel %vm1623_vm10, %v7131_v59, %v6547_v52  ;;  %v6567_v21 = vunpack.i.h.bf16 %v9516_v63 }
 0x2ea   : > { %v2760_v56 = vsel %vm1623_vm10, %v8962_v17, %v6516_v51  ;;  %v3495_v33 = vsel %vm1623_vm10, %v7132_v13, %v6546_v41  ;;  %v6566_v34 = vunpack.i.l.bf16 %v9516_v63  ;;  %v6587_v62 = vunpack.i.h.bf16 %v6585_v16  ;;  %v7133_v13 = vld [vmem:[#allocation2 + $0x170] sm:$0xff] }
 0x2eb   : > { %v6570_v43 = vpop.permute.xlu0 %6569  ;;  %v6590_v15 = vpop.permute.xlu1 %6589  ;;  %5480 = vmatmul.mubr.bf16.gmra.mrb[48].mxu0 %v9526_v25  ;;  %v6586_v10 = vunpack.i.l.bf16 %v6585_v16 }
 0x2ec   : > { %v6572_v32 = vunpack.i.h.bf16 %v6570_v43  ;;  %v6571_v7 = vunpack.i.l.bf16 %v6570_v43  ;;  %v6592_v58 = vunpack.i.h.bf16 %v6590_v15  ;;  %v6591_v49 = vunpack.i.l.bf16 %v6590_v15 }
 0x2ef   : > { %v9529_v6 = vpop.permute.xlu0 %6574  ;;  %v9531_v22 = vpop.permute.xlu1 %6599 }
 0x2f0   : > { %v6601_v59 = vunpack.i.l.bf16 %v9531_v22 }
 0x2f3   : > { %v9537_v35 = vpop.permute.xlu1 %6604  ;;  %v6580_v60 = vpop.permute.xlu0 %6579 }
 0x2f4   : > { %v6582_v5 = vunpack.i.h.bf16 %v6580_v60  ;;  %v6581_v53 = vunpack.i.l.bf16 %v6580_v60  ;;  %v3528_v60 = vsel %vm2772_vm14, %v3496_v30, %v6587_v62 }
 0x2f6   : > { %v2762_v11 = vsel %vm1623_vm10, %v9023_v18, %v6581_v53  ;;  %v2763_v31 = vsel %vm1623_vm10, %v9014_v42, %v6582_v5  ;;  %v6602_v53 = vunpack.i.h.bf16 %v9531_v22 }
 0x2f7   : > { %v6595_v17 = vpop.permute.xlu0 %6594  ;;  %v6610_v46 = vpop.permute.xlu1 %6609 }
 0x2f8   : > { %v6597_v55 = vunpack.i.h.bf16 %v6595_v17  ;;  %v6596_v19 = vunpack.i.l.bf16 %v6595_v17  ;;  %v6612_v20 = vunpack.i.h.bf16 %v6610_v46  ;;  %v6611_v45 = vunpack.i.l.bf16 %v6610_v46 }
 0x2fa   : > { %v2795_v63 = vsel %vm2772_vm14, %v2762_v11, %v6596_v19  ;;  %v2796_v16 = vsel %vm2772_vm14, %v2763_v31, %v6597_v55  ;;  %v2794_v8 = vsel %vm2772_vm14, %v2761_v50, %v6612_v20  ;;  %v2793_v61 = vsel %vm2772_vm14, %v2760_v56, %v6611_v45 }
 0x2fb   : > { %v6615_v23 = vpop.permute.xlu0 %6614  ;;  %v2826_v4 = vsel %vm2805_vm15, %v2793_v61, %v6591_v49  ;;  %v2827_v43 = vsel %vm2805_vm15, %v2794_v8, %v6592_v58  ;;  %v2828_v15 = vsel %vm2805_vm15, %v2795_v63, %v6571_v7  ;;  %v2829_v18 = vsel %vm2805_vm15, %v2796_v16, %v6572_v32  ;;  %v7134_v7 = vld [vmem:[#allocation2 + $0x168] sm:$0xff]  ;;  %v7135_v61 = vld [vmem:[#allocation2 + $0x190] sm:$0xff] }
 0x2fc   : > { %v6617_v38 = vunpack.i.h.bf16 %v6615_v23  ;;  %v6616_v51 = vunpack.i.l.bf16 %v6615_v23  ;;  %v6620_v42 = vpop.permute.xlu1 %6619  ;;  %v9559_v52 = vpack.c.bf16 %v2827_v43, %v2826_v4  ;;  %v9561_v41 = vpack.c.bf16 %v2829_v18, %v2828_v15  ;;  %v7136_v4 = vld [vmem:[#allocation2 + $0x188] sm:$0xff] }
 0x2fd   : > { %v3527_v56 = vsel %vm2772_vm14, %v3495_v33, %v6586_v10  ;;  %v6622_v50 = vunpack.i.h.bf16 %v6620_v42  ;;  %v6621_v5 = vunpack.i.l.bf16 %v6620_v42  ;;  %v6577_v49 = vunpack.i.h.bf16 %v9529_v6 }
 0x2fe   : > { %v3498_v32 = vsel %vm1623_vm10, %v7133_v13, %v6617_v38  ;;  %v3497_v17 = vsel %vm1623_vm10, %v7134_v7, %v6616_v51  ;;  %5435 = vmatprep.mubr.bf16.mxu1 %v9559_v52  ;;  %v6576_v11 = vunpack.i.l.bf16 %v9529_v6 }
 0x2ff   : > { %5436 = vmatmul.mubr.bf16.gmra.mrb[20].mxu1 %v9561_v41  ;;  %v9571_v46 = vpop.permute.xlu0 %6624  ;;  %v3559_v30 = vsel %vm2805_vm15, %v3527_v56, %v6621_v5  ;;  %v3560_v33 = vsel %vm2805_vm15, %v3528_v60, %v6622_v50  ;;  %v3529_v62 = vsel %vm2772_vm14, %v3497_v17, %v6566_v34  ;;  %v3530_v22 = vsel %vm2772_vm14, %v3498_v32, %v6567_v21 }
 0x300   : > { %v6635_v10 = vpop.permute.xlu1 %6634  ;;  %v9577_v55 = vpack.c.bf16 %v3560_v33, %v3559_v30  ;;  %v3561_v19 = vsel %vm2805_vm15, %v3529_v62, %v6601_v59  ;;  %v3562_v20 = vsel %vm2805_vm15, %v3530_v22, %v6602_v53  ;;  %v6607_v34 = vunpack.i.h.bf16 %v9537_v35 }
 0x301   : > { %v9582_v45 = vpack.c.bf16 %v3562_v20, %v3561_v19  ;;  %v6606_v21 = vunpack.i.l.bf16 %v9537_v35  ;;  %v2764_v16 = vsel %vm1623_vm10, %v9020_v27, %v6576_v11  ;;  %v2765_v8 = vsel %vm1623_vm10, %v9009_v26, %v6577_v49  ;;  %v7137_v49 = vld [vmem:[#allocation2 + $0x1b0] sm:$0xff] }
 0x302   : > { %5483 = vmatprep.mubr.bf16.mxu0 %v9577_v55  ;;  %v3500_v23 = vsel %vm1623_vm10, %v7135_v61, %v6607_v34  ;;  %v6627_v15 = vunpack.i.h.bf16 %v9571_v46  ;;  %v6637_v35 = vunpack.i.h.bf16 %v6635_v10  ;;  %v6636_v51 = vunpack.i.l.bf16 %v6635_v10  ;;  %v7138_v34 = vld [vmem:[#allocation2 + $0x1a8] sm:$0xff] }
 0x303   : > { %v6630_v58 = vpop.permute.xlu0 %6629  ;;  %5484 = vmatmul.mubr.bf16.gmra.mrb[52].mxu0 %v9582_v45  ;;  %v3499_v6 = vsel %vm1623_vm10, %v7136_v4, %v6606_v21  ;;  %v6626_v10 = vunpack.i.l.bf16 %v9571_v46 }
 0x304   : > { %v6640_v31 = vpop.permute.xlu1 %6639  ;;  %v6631_v56 = vunpack.i.l.bf16 %v6630_v58  ;;  %v6632_v27 = vunpack.i.h.bf16 %v6630_v58  ;;  %v3532_v19 = vsel %vm2772_vm14, %v3500_v23, %v6637_v35  ;;  %v3531_v20 = vsel %vm2772_vm14, %v3499_v6, %v6636_v51 }
 0x305   : > { %v6642_v42 = vunpack.i.h.bf16 %v6640_v31  ;;  %v6641_v60 = vunpack.i.l.bf16 %v6640_v31 }
 0x306   : > { %v2766_v58 = vsel %vm1623_vm10, %v9103_v12, %v6631_v56 }
 0x307   : > { %v6645_v63 = vpop.permute.xlu0 %6644 }
 0x308   : > { %v6650_v43 = vpop.permute.xlu1 %6649  ;;  %v6647_v50 = vunpack.i.h.bf16 %v6645_v63  ;;  %v6646_v30 = vunpack.i.l.bf16 %v6645_v63 }
 0x309   : > { %v6652_v18 = vunpack.i.h.bf16 %v6650_v43  ;;  %v6651_v38 = vunpack.i.l.bf16 %v6650_v43 }
 0x30a   : > { %v2799_v4 = vsel %vm2772_vm14, %v2766_v58, %v6646_v30 }
 0x30b   : > { %v2798_v26 = vsel %vm2772_vm14, %v2765_v8, %v6652_v18  ;;  %v2797_v5 = vsel %vm2772_vm14, %v2764_v16, %v6651_v38  ;;  %v6655_v53 = vpop.permute.xlu0 %6654  ;;  %v2767_v16 = vsel %vm1623_vm10, %v9106_v1, %v6632_v27 }
 0x30c   : > { %v6657_v59 = vunpack.i.h.bf16 %v6655_v53  ;;  %v6656_v13 = vunpack.i.l.bf16 %v6655_v53  ;;  %v6665_v32 = vpop.permute.xlu1 %6664  ;;  %v2830_v7 = vsel %vm2805_vm15, %v2797_v5, %v6641_v60  ;;  %v2831_v17 = vsel %vm2805_vm15, %v2798_v26, %v6642_v42 }
 0x30d   : > { %v6667_v33 = vunpack.i.h.bf16 %v6665_v32  ;;  %v6666_v62 = vunpack.i.l.bf16 %v6665_v32  ;;  %v9600_v22 = vpack.c.bf16 %v2831_v17, %v2830_v7  ;;  %v2800_v6 = vsel %vm2772_vm14, %v2767_v16, %v6647_v50 }
 0x30e   : > { %v3502_v11 = vsel %vm1623_vm10, %v7137_v49, %v6657_v59  ;;  %v3501_v21 = vsel %vm1623_vm10, %v7138_v34, %v6656_v13  ;;  %v7139_v49 = vld [vmem:[#allocation2 + $0x1d0] sm:$0xff] }
 0x30f   : > { %5439 = vmatprep.mubr.bf16.mxu1 %v9600_v22  ;;  %v6660_v31 = vpop.permute.xlu0 %6659  ;;  %v3563_v63 = vsel %vm2805_vm15, %v3531_v20, %v6666_v62  ;;  %v3564_v46 = vsel %vm2805_vm15, %v3532_v19, %v6667_v33  ;;  %v3533_v51 = vsel %vm2772_vm14, %v3501_v21, %v6626_v10  ;;  %v3534_v1 = vsel %vm2772_vm14, %v3502_v11, %v6627_v15 }
 0x310   : > { %v6662_v8 = vunpack.i.h.bf16 %v6660_v31  ;;  %v6661_v61 = vunpack.i.l.bf16 %v6660_v31  ;;  %v6670_v23 = vpop.permute.xlu1 %6669  ;;  %v9614_v12 = vpack.c.bf16 %v3564_v46, %v3563_v63 }
 0x311   : > { %v6672_v43 = vunpack.i.h.bf16 %v6670_v23  ;;  %v6671_v35 = vunpack.i.l.bf16 %v6670_v23 }
 0x312   : > { %5487 = vmatprep.mubr.bf16.mxu0 %v9614_v12  ;;  %v2832_v18 = vsel %vm2805_vm15, %v2799_v4, %v6661_v61  ;;  %v2833_v38 = vsel %vm2805_vm15, %v2800_v6, %v6662_v8  ;;  %v7140_v6 = vld [vmem:[#allocation2 + $0x1c8] sm:$0xff] }
 0x313   : > { %v6675_v42 = vpop.permute.xlu0 %6674  ;;  %v9623_v60 = vpack.c.bf16 %v2833_v38, %v2832_v18  ;;  %v3565_v56 = vsel %vm2805_vm15, %v3533_v51, %v6671_v35  ;;  %v3566_v27 = vsel %vm2805_vm15, %v3534_v1, %v6672_v43 }
 0x314   : > { %v6680_v50 = vpop.permute.xlu1 %6679  ;;  %v9627_v26 = vpack.c.bf16 %v3566_v27, %v3565_v56  ;;  %v6677_v13 = vunpack.i.h.bf16 %v6675_v42  ;;  %v6676_v15 = vunpack.i.l.bf16 %v6675_v42 }
 0x315   : > { %5440 = vmatmul.mubr.bf16.gmra.mrb[24].mxu1 %v9623_v60  ;;  %v6682_v7 = vunpack.i.h.bf16 %v6680_v50  ;;  %v6681_v10 = vunpack.i.l.bf16 %v6680_v50 }
 0x316   : > { %5488 = vmatmul.mubr.bf16.gmra.mrb[56].mxu0 %v9627_v26  ;;  %v2769_v62 = vsel %vm1623_vm10, %v9100_v14, %v6677_v13  ;;  %v2768_v58 = vsel %vm1623_vm10, %v9097_v36, %v6676_v15 }
 0x317   : > { %v6685_v5 = vpop.permute.xlu0 %6684  ;;  %v3504_v11 = vsel %vm1623_vm10, %v7139_v49, %v6682_v7  ;;  %v3503_v36 = vsel %vm1623_vm10, %v7140_v6, %v6681_v10 }
 0x318   : > { %v6690_v53 = vpop.permute.xlu1 %6689  ;;  %v6686_v19 = vunpack.i.l.bf16 %v6685_v5  ;;  %v6687_v8 = vunpack.i.h.bf16 %v6685_v5 }
 0x319   : > { %v6692_v17 = vunpack.i.h.bf16 %v6690_v53  ;;  %v6691_v30 = vunpack.i.l.bf16 %v6690_v53 }
 0x31a   : > { %v2770_v43 = vsel %vm1623_vm10, %v9243_v47, %v6686_v19  ;;  %v2771_v13 = vsel %vm1623_vm10, %v9223_v24, %v6687_v8  ;;  %v7141_v47 = vld [vmem:[#allocation2 + $0x1f0] sm:$0xff] }
 0x31b   : > { %v6695_v59 = vpop.permute.xlu0 %6694  ;;  %v2802_v31 = vsel %vm2772_vm14, %v2769_v62, %v6692_v17  ;;  %v2801_v63 = vsel %vm2772_vm14, %v2768_v58, %v6691_v30  ;;  %v7142_v17 = vld [vmem:[#allocation2 + $0x1e8] sm:$0xff] }
 0x31c   : > { %v6700_v32 = vpop.permute.xlu1 %6699  ;;  %v6697_v61 = vunpack.i.h.bf16 %v6695_v59  ;;  %v6696_v35 = vunpack.i.l.bf16 %v6695_v59 }
 0x31d   : > { %v6702_v46 = vunpack.i.h.bf16 %v6700_v32  ;;  %v6701_v16 = vunpack.i.l.bf16 %v6700_v32 }
 0x31e   : > { %v3506_v59 = vsel %vm1623_vm10, %v7141_v47, %v6697_v61  ;;  %v3505_v30 = vsel %vm1623_vm10, %v7142_v17, %v6696_v35  ;;  %v10357_v61 = vld [vmem:[#allocation21_spill] sm:$0xff] }
 0x31f   : > { %v6705_v33 = vpop.permute.xlu0 %6704  ;;  %v3536_v27 = vsel %vm2772_vm14, %v3504_v11, %v6702_v46  ;;  %v3535_v50 = vsel %vm2772_vm14, %v3503_v36, %v6701_v16 }
 0x320   : > { %v6710_v20 = vpop.permute.xlu1 %6709  ;;  %v6707_v51 = vunpack.i.h.bf16 %v6705_v33  ;;  %v6706_v1 = vunpack.i.l.bf16 %v6705_v33 }
 0x321   : > { %v6712_v34 = vunpack.i.h.bf16 %v6710_v20  ;;  %v6711_v21 = vunpack.i.l.bf16 %v6710_v20 }
 0x322   : > { %v2803_v20 = vsel %vm2772_vm14, %v2770_v43, %v6706_v1  ;;  %v2804_v24 = vsel %vm2772_vm14, %v2771_v13, %v6707_v51  ;;  %v10362_v1 = vld [vmem:[#allocation3_spill] sm:$0xff] }
 0x323   : > { %v6715_v14 = vpop.permute.xlu0 %6714  ;;  %v2834_v23 = vsel %vm2805_vm15, %v2801_v63, %v6711_v21  ;;  %v2835_v4 = vsel %vm2805_vm15, %v2802_v31, %v6712_v34 }
 0x324   : > { %v6720_v18 = vpop.permute.xlu1 %6719  ;;  %v9643_v38 = vpack.c.bf16 %v2835_v4, %v2834_v23  ;;  %v6717_v5 = vunpack.i.h.bf16 %v6715_v14  ;;  %v6716_v53 = vunpack.i.l.bf16 %v6715_v14  ;;  %v10358_v14 = vld [vmem:[#allocation14_spill] sm:$0xff]  ;;  %v10359_v23 = vld [vmem:[#allocation20_spill] sm:$0xff] }
 0x325   : > { %v6722_v42 = vunpack.i.h.bf16 %v6720_v18  ;;  %v6721_v56 = vunpack.i.l.bf16 %v6720_v18  ;;  %v10360_v4 = vld [vmem:[#allocation16_spill] sm:$0xff]  ;;  %v10361_v18 = vld [vmem:[#allocation10_spill] sm:$0xff] }
 0x326   : > { %5443 = vmatprep.mubr.bf16.mxu1 %v9643_v38  ;;  %v3537_v11 = vsel %vm2772_vm14, %v3505_v30, %v6716_v53  ;;  %v3538_v34 = vsel %vm2772_vm14, %v3506_v59, %v6717_v5 }
 0x327   : > { %v6725_v32 = vpop.permute.xlu0 %6724  ;;  %v3567_v15 = vsel %vm2805_vm15, %v3535_v50, %v6721_v56  ;;  %v3568_v7 = vsel %vm2805_vm15, %v3536_v27, %v6722_v42  ;;  %v7143_v56 = vld [vmem:[#allocation2 + $0x210] sm:$0xff]  ;;  %v7144_v50 = vld [vmem:[#allocation2 + $0x208] sm:$0xff] }
 0x328   : > { %v6727_v33 = vunpack.i.h.bf16 %v6725_v32  ;;  %v6726_v62 = vunpack.i.l.bf16 %v6725_v32  ;;  %v6730_v10 = vpop.permute.xlu1 %6729  ;;  %v9654_v19 = vpack.c.bf16 %v3568_v7, %v3567_v15 }
 0x329   : > { %v6732_v58 = vunpack.i.h.bf16 %v6730_v10  ;;  %v6731_v49 = vunpack.i.l.bf16 %v6730_v10 }
 0x32a   : > { %5491 = vmatprep.mubr.bf16.mxu0 %v9654_v19  ;;  %v2836_v21 = vsel %vm2805_vm15, %v2803_v20, %v6726_v62  ;;  %v2837_v31 = vsel %vm2805_vm15, %v2804_v24, %v6727_v33 }
 0x32b   : > { %v2853_v63 = vpack.c.bf16 %v2837_v31, %v2836_v21  ;;  %v3569_v46 = vsel %vm2805_vm15, %v3537_v11, %v6731_v49  ;;  %v3570_v16 = vsel %vm2805_vm15, %v3538_v34, %v6732_v58 }
 0x32c   : > { %v9665_v8 = vpack.c.bf16 %v3570_v16, %v3569_v46 }
 0x32d   : > { %5444 = vmatmul.mubr.bf16.gmra.mrb[28].mxu1 %v2853_v63 }
 0x32e   : > { %5492 = vmatmul.mubr.bf16.gmra.mrb[60].mxu0 %v9665_v8  ;;  %5511 = vmatprep.mubr.bf16.mxu1 %v9062_v54  ;;  %v6735_v54 = vpop.permute.xlu0 %6734 }
 0x32f   : > { %5559 = vmatprep.mubr.bf16.mxu0 %v9077_v48  ;;  %v6740_v48 = vpop.permute.xlu1 %6739 }
 0x335   : > { %5512 = vmatmul.mubr.bf16.vlgmr.msra.gmra.mrb[32].mxu1 %v10357_v61 }
 0x336   : > { %5560 = vmatmul.mubr.bf16.vlgmr.msra.gmra.mrb[64].mxu0 %v10358_v14  ;;  %5515 = vmatprep.mubr.bf16.mxu1 %v10359_v23 }
 0x337   : > { %5563 = vmatprep.mubr.bf16.mxu0 %v10360_v4 }
 0x33d   : > { %5516 = vmatmul.mubr.bf16.gmra.mrb[36].mxu1 %v9361_v2  ;;  %v6745_v2 = vpop.permute.xlu0 %6744 }
 0x33e   : > { %5564 = vmatmul.mubr.bf16.gmra.mrb[68].mxu0 %v9380_v39  ;;  %5519 = vmatprep.mubr.bf16.mxu1 %v9363_v3  ;;  %v6750_v39 = vpop.permute.xlu1 %6749 }
 0x33f   : > { %5567 = vmatprep.mubr.bf16.mxu0 %v9396_v29  ;;  %v6752_v6 = vunpack.i.h.bf16 %v6750_v39  ;;  %v6751_v36 = vunpack.i.l.bf16 %v6750_v39 }
 0x345   : > { %5520 = vmatmul.mubr.bf16.gmra.mrb[40].mxu1 %v9450_v0 }
 0x346   : > { %5568 = vmatmul.mubr.bf16.gmra.mrb[72].mxu0 %v9462_v40  ;;  %5523 = vmatprep.mubr.bf16.mxu1 %v9452_v28 }
 0x347   : > { %5571 = vmatprep.mubr.bf16.mxu0 %v9470_v57 }
 0x34d   : > { %5524 = vmatmul.mubr.bf16.gmra.mrb[44].mxu1 %v9506_v37 }
 0x34e   : > { %5572 = vmatmul.mubr.bf16.gmra.mrb[76].mxu0 %v9518_v9  ;;  %5527 = vmatprep.mubr.bf16.mxu1 %v9508_v44  ;;  %v6755_v44 = vpop.permute.xlu0 %6754 }
 0x34f   : > { %5575 = vmatprep.mubr.bf16.mxu0 %v9526_v25  ;;  %v6737_v25 = vunpack.i.h.bf16 %v6735_v54  ;;  %v6757_v43 = vunpack.i.h.bf16 %v6755_v44 }
 0x351   : > { %v3928_v51 = vsel %vm1623_vm10, %v10361_v18, %v6737_v25 }
 0x355   : > { %5528 = vmatmul.mubr.bf16.gmra.mrb[48].mxu1 %v9559_v52  ;;  %v6736_v52 = vunpack.i.l.bf16 %v6735_v54 }
 0x356   : > { %5576 = vmatmul.mubr.bf16.gmra.mrb[80].mxu0 %v9577_v55  ;;  %5531 = vmatprep.mubr.bf16.mxu1 %v9561_v41  ;;  %v6760_v41 = vpop.permute.xlu1 %6759  ;;  %v6742_v55 = vunpack.i.h.bf16 %v6740_v48 }
 0x357   : > { %5579 = vmatprep.mubr.bf16.mxu0 %v9582_v45  ;;  %v6741_v45 = vunpack.i.l.bf16 %v6740_v48  ;;  %v6762_v35 = vunpack.i.h.bf16 %v6760_v41  ;;  %v3927_v42 = vsel %vm1623_vm10, %v10362_v1, %v6736_v52 }
 0x358   : > { %v4275_v27 = vsel %vm1623_vm10, %v7143_v56, %v6742_v55 }
 0x359   : > { %v4274_v5 = vsel %vm1623_vm10, %v7144_v50, %v6741_v45  ;;  %v4277_v47 = vsel %vm2772_vm14, %v4275_v27, %v6752_v6 }
 0x35a   : > { %v4279_v7 = vsel %vm2805_vm15, %v4277_v47, %v6762_v35 }
 0x35b   : > { %v9690_v3 = vpop.f32.mrb[0].mxu1 }
 0x35c   : > { %v9692_v29 = vpop.f32.mrb[1].mxu1 }
 0x35d   : > { %v9694_v0 = vpop.f32.mrb[2].mxu1  ;;  %5532 = vmatmul.mubr.bf16.gmra.mrb[52].mxu1 %v9600_v22  ;;  %v6747_v22 = vunpack.i.h.bf16 %v6745_v2 }
 0x35e   : > { %v9697_v28 = vpop.f32.mrb[3].mxu1  ;;  %5580 = vmatmul.mubr.bf16.gmra.mrb[84].mxu0 %v9614_v12  ;;  %v9700_v40 = vpop.f32.mrb[32].mxu0  ;;  %5535 = vmatprep.mubr.bf16.mxu1 %v9623_v60  ;;  %v6746_v12 = vunpack.i.l.bf16 %v6745_v2  ;;  %v6756_v60 = vunpack.i.l.bf16 %v6755_v44  ;;  %v9778_v44 = vld [vmem:[%s10204_s5] ss:$0 sm:$0xff] }
 0x35f   : > { %5583 = vmatprep.mubr.bf16.mxu0 %v9627_v26  ;;  %v9704_v57 = vpop.f32.mrb[33].mxu0  ;;  %v6761_v26 = vunpack.i.l.bf16 %v6760_v41  ;;  %v3930_v13 = vsel %vm2772_vm14, %v3928_v51, %v6747_v22  ;;  %v3087_v25 = vmul.f32 %v9690_v3, %v9778_v44  ;;  %v3085_v52 = vmul.f32 %v9778_v44, %v9692_v29  ;;  %v9787_v41 = vld [vmem:[%s10205_s6] ss:$0 sm:$0xff] }
 0x360   : > { %v9706_v37 = vpop.f32.mrb[34].mxu0  ;;  %v3929_v53 = vsel %vm2772_vm14, %v3927_v42, %v6746_v12  ;;  %v3932_v32 = vsel %vm2805_vm15, %v3930_v13, %v6757_v43  ;;  %v3088_v55 = vmul.f32 %v9694_v0, %v9778_v44  ;;  %v3086_v45 = vmul.f32 %v9778_v44, %v9697_v28 }
 0x361   : > { %v9708_v9 = vpop.f32.mrb[35].mxu0  ;;  %v3931_v59 = vsel %vm2805_vm15, %v3929_v53, %v6756_v60  ;;  %v3125_v22 = vadd.f32 %v9787_v41, %v3087_v25  ;;  %v3123_v12 = vadd.f32 %v9787_v41, %v3085_v52  ;;  %v3815_v29 = vmul.f32 %v9700_v40, %v9778_v44 }
 0x362   : > { %v3933_v17 = vpack.c.bf16 %v3932_v32, %v3931_v59  ;;  %v3126_v3 = vadd.f32 %v9787_v41, %v3088_v55  ;;  %v3124_v6 = vadd.f32 %v9787_v41, %v3086_v45  ;;  %v3816_v0 = vmul.f32 %v9706_v37, %v9778_v44 }
 0x363   : > { %v3157_v35 = vmax.f32 %v3125_v22, 0.0  ;;  %v3814_v18 = vmul.f32 %v9778_v44, %v9708_v9  ;;  %v3847_v42 = vadd.f32 %v9787_v41, %v3815_v29 }
 0x364   : > { %v3158_v1 = vmax.f32 %v3126_v3, 0.0  ;;  %v3156_v37 = vmax.f32 %v3124_v6, 0.0  ;;  %v3848_v9 = vadd.f32 %v9787_v41, %v3816_v0 }
 0x365   : > { %5536 = vmatmul.mubr.bf16.gmra.mrb[56].mxu1 %v9643_v38  ;;  %v4276_v38 = vsel %vm2772_vm14, %v4274_v5, %v6751_v36  ;;  %v3813_v36 = vmul.f32 %v9778_v44, %v9704_v57 }
 0x366   : > { %5584 = vmatmul.mubr.bf16.gmra.mrb[88].mxu0 %v9654_v19  ;;  %5539 = vmatprep.mubr.bf16.mxu1 %v2853_v63  ;;  %v4278_v15 = vsel %vm2805_vm15, %v4276_v38, %v6761_v26  ;;  %v3155_v26 = vmax.f32 %v3123_v12, 0.0 }
 0x367   : > { %5587 = vmatprep.mubr.bf16.mxu0 %v9665_v8  ;;  %v4280_v30 = vpack.c.bf16 %v4279_v7, %v4278_v15  ;;  %v3845_v50 = vadd.f32 %v9787_v41, %v3813_v36  ;;  %v3846_v15 = vadd.f32 %v9787_v41, %v3814_v18 }
 0x369   : > { %v3877_v18 = vmax.f32 %v3845_v50, 0.0 }
 0x36d   : > { %5540 = vmatmul.mubr.bf16.gmra.mrb[60].mxu1 %v3933_v17 }
 0x36e   : > { %5588 = vmatmul.mubr.bf16.gmra.mrb[92].mxu0 %v4280_v30 }
 0x373   : > { %v9727_v33 = vpop.f32.mrb[4].mxu1 }
 0x374   : > { %v9729_v62 = vpop.f32.mrb[5].mxu1 }
 0x375   : > { %v9731_v10 = vpop.f32.mrb[6].mxu1 }
 0x376   : > { %v9733_v19 = vpop.f32.mrb[7].mxu1  ;;  %v9735_v20 = vpop.f32.mrb[36].mxu0 }
 0x377   : > { %v9737_v24 = vpop.f32.mrb[37].mxu0  ;;  %v3090_v50 = vmul.f32 %v9778_v44, %v9733_v19 }
 0x378   : > { %v9739_v58 = vpop.f32.mrb[38].mxu0  ;;  %v3817_v19 = vmul.f32 %v9778_v44, %v9737_v24 }
 0x379   : > { %v9741_v49 = vpop.f32.mrb[39].mxu0 }
 0x38b   : > { %v9743_v11 = vpop.f32.mrb[8].mxu1 }
 0x38c   : > { %v9745_v34 = vpop.f32.mrb[9].mxu1 }
 0x38d   : > { %v9747_v21 = vpop.f32.mrb[10].mxu1 }
 0x38e   : > { %v9749_v31 = vpop.f32.mrb[11].mxu1 }
 0x390   : > { %v9751_v63 = vpop.f32.mrb[40].mxu0 }
 0x391   : > { %v9753_v46 = vpop.f32.mrb[41].mxu0 }
 0x392   : > { %v9755_v16 = vpop.f32.mrb[42].mxu0 }
 0x393   : > { %v9757_v8 = vpop.f32.mrb[43].mxu0 }
 0x3a3   : > { %v9759_v61 = vpop.f32.mrb[12].mxu1 }
 0x3a4   : > { %v9761_v14 = vpop.f32.mrb[13].mxu1 }
 0x3a5   : > { %v9763_v23 = vpop.f32.mrb[14].mxu1 }
 0x3a6   : > { %v9765_v4 = vpop.f32.mrb[15].mxu1  ;;  %v9767_v54 = vpop.f32.mrb[44].mxu0 }
 0x3a7   : > { %v9769_v48 = vpop.f32.mrb[45].mxu0 }
 0x3a8   : > { %v9771_v2 = vpop.f32.mrb[46].mxu0 }
 0x3a9   : > { %v9773_v39 = vpop.f32.mrb[47].mxu0 }
 0x3bb   : > { %v5433_v43 = vpop.f32.mrb[16].mxu1 }
 0x3bc   : > { %v3103_v28 = vmul.f32 %v5433_v43, %v9778_v44  ;;  %v3016_v60 = vpop.f32.mrb[17].mxu1  ;;  %v3879_v43 = vmax.f32 %v3847_v42, 0.0  ;;  %v3091_v42 = vmul.f32 %v9727_v33, %v9778_v44  ;;  %v3819_v33 = vmul.f32 %v9735_v20, %v9778_v44 }
 0x3bd   : > { %v3101_v51 = vmul.f32 %v9778_v44, %v3016_v60  ;;  %v5434_v40 = vpop.f32.mrb[18].mxu1 }
 0x3be   : > { %v3141_v57 = vadd.f32 %v9787_v41, %v3103_v28  ;;  %v3104_v56 = vmul.f32 %v5434_v40, %v9778_v44  ;;  %v3019_v27 = vpop.f32.mrb[19].mxu1  ;;  %v5481_v13 = vpop.f32.mrb[48].mxu0 }
 0x3bf   : > { %v3139_v5 = vadd.f32 %v9787_v41, %v3101_v51  ;;  %v3102_v53 = vmul.f32 %v9778_v44, %v3019_v27  ;;  %v3831_v59 = vmul.f32 %v5481_v13, %v9778_v44  ;;  %v3750_v32 = vpop.f32.mrb[49].mxu0 }
 0x3c0   : > { %v3173_v38 = vmax.f32 %v3141_v57, 0.0  ;;  %v3142_v47 = vadd.f32 %v9787_v41, %v3104_v56  ;;  %v3829_v30 = vmul.f32 %v9778_v44, %v3750_v32  ;;  %v5482_v25 = vpop.f32.mrb[50].mxu0  ;;  %v3880_v56 = vmax.f32 %v3848_v9, 0.0 }
 0x3c1   : > { %v3171_v7 = vmax.f32 %v3139_v5, 0.0  ;;  %v3140_v17 = vadd.f32 %v9787_v41, %v3102_v53  ;;  %v3863_v55 = vadd.f32 %v9787_v41, %v3831_v59  ;;  %v3832_v45 = vmul.f32 %v5482_v25, %v9778_v44  ;;  %v3753_v22 = vpop.f32.mrb[51].mxu0 }
 0x3c2   : > { %v3174_v52 = vmax.f32 %v3142_v47, 0.0  ;;  %v6767_v12 = vpack.i.bf16 %v3157_v35, %v3173_v38  ;;  %v3861_v29 = vadd.f32 %v9787_v41, %v3829_v30  ;;  %v3830_v6 = vmul.f32 %v9778_v44, %v3753_v22 }
 0x3c3   : > { %v3172_v3 = vmax.f32 %v3140_v17, 0.0  ;;  %v6763_v36 = vpack.i.bf16 %v3155_v26, %v3171_v7  ;;  %v3895_v0 = vmax.f32 %v3863_v55, 0.0  ;;  %v3864_v28 = vadd.f32 %v9787_v41, %v3832_v45 }
 0x3c4   : > { %v6769_v60 = vpack.i.bf16 %v3158_v1, %v3174_v52  ;;  %v3893_v51 = vmax.f32 %v3861_v29, 0.0  ;;  %v3862_v40 = vadd.f32 %v9787_v41, %v3830_v6  ;;  %v3878_v5 = vmax.f32 %v3846_v15, 0.0 }
 0x3c5   : > { %6764 = vxpose.xlu0.b32.start [1/16] (narrow) %v6763_v36, 64  ;;  %v6765_v57 = vpack.i.bf16 %v3156_v37, %v3172_v3  ;;  %v3896_v27 = vmax.f32 %v3864_v28, 0.0  ;;  %v6839_v35 = vpack.i.bf16 %v3879_v43, %v3895_v0  ;;  %v3089_v1 = vmul.f32 %v9778_v44, %v9729_v62 }
 0x3c6   : > { %v3894_v53 = vmax.f32 %v3862_v40, 0.0  ;;  %v6835_v13 = vpack.i.bf16 %v3877_v18, %v3893_v51  ;;  %v3092_v37 = vmul.f32 %v9731_v10, %v9778_v44  ;;  %v3129_v9 = vadd.f32 %v9787_v41, %v3091_v42 }
 0x3c7   : > { %v6841_v38 = vpack.i.bf16 %v3880_v56, %v3896_v27  ;;  %v3127_v47 = vadd.f32 %v9787_v41, %v3089_v1  ;;  %v3128_v32 = vadd.f32 %v9787_v41, %v3090_v50  ;;  %v3820_v52 = vmul.f32 %v9739_v58, %v9778_v44 }
 0x3c8   : > { %6836 = vxpose.xlu1.b32.start [1/16] (narrow) %v6835_v13, 64  ;;  %v6837_v26 = vpack.i.bf16 %v3878_v5, %v3894_v53  ;;  %v3130_v59 = vadd.f32 %v9787_v41, %v3092_v37  ;;  %v3161_v7 = vmax.f32 %v3129_v9, 0.0  ;;  %v3818_v6 = vmul.f32 %v9778_v44, %v9741_v49 }
 0x3c9   : > { %6766 = vxpose.xlu0.b32.cont [2/16] (narrow) %v6765_v57, 64  ;;  %v3159_v25 = vmax.f32 %v3127_v47, 0.0  ;;  %v3160_v29 = vmax.f32 %v3128_v32, 0.0  ;;  %v3849_v0 = vadd.f32 %v9787_v41, %v3817_v19  ;;  %v3852_v40 = vadd.f32 %v9787_v41, %v3820_v52 }
 0x3ca   : > { %v3162_v22 = vmax.f32 %v3130_v59, 0.0  ;;  %v3093_v52 = vmul.f32 %v9778_v44, %v9745_v34 }
 0x3cc   : > { %6838 = vxpose.xlu1.b32.cont [2/16] (narrow) %v6837_v26, 64  ;;  %v3850_v26 = vadd.f32 %v9787_v41, %v3818_v6 }
 0x3cd   : > { %6768 = vxpose.xlu0.b32.cont [3/16] (narrow) %v6767_v12, 64  ;;  %v3851_v12 = vadd.f32 %v9787_v41, %v3819_v33  ;;  %v3881_v33 = vmax.f32 %v3849_v0, 0.0 }
 0x3ce   : > { %v3882_v19 = vmax.f32 %v3850_v26, 0.0 }
 0x3cf   : > { %v3883_v50 = vmax.f32 %v3851_v12, 0.0 }
 0x3d0   : > { %6840 = vxpose.xlu1.b32.cont [3/16] (narrow) %v6839_v35, 64 }
 0x3d1   : > { %6770 = vxpose.xlu0.b32.cont [4/16] (narrow) %v6769_v60, 64 }
 0x3d2   : > { %v5437_v62 = vpop.f32.mrb[20].mxu1 }
 0x3d3   : > { %v3107_v15 = vmul.f32 %v5437_v62, %v9778_v44  ;;  %v3032_v10 = vpop.f32.mrb[21].mxu1 }
 0x3d4   : > { %v3105_v17 = vmul.f32 %v9778_v44, %v3032_v10  ;;  %v5438_v30 = vpop.f32.mrb[22].mxu1  ;;  %6842 = vxpose.xlu1.b32.cont [4/16] (narrow) %v6841_v38, 64 }
 0x3d5   : > { %v3145_v55 = vadd.f32 %v9787_v41, %v3107_v15  ;;  %v3108_v20 = vmul.f32 %v5438_v30, %v9778_v44  ;;  %v3035_v45 = vpop.f32.mrb[23].mxu1  ;;  %v3884_v15 = vmax.f32 %v3852_v40, 0.0 }
 0x3d6   : > { %v3143_v3 = vadd.f32 %v9787_v41, %v3105_v17  ;;  %v3106_v24 = vmul.f32 %v9778_v44, %v3035_v45  ;;  %v5485_v43 = vpop.f32.mrb[52].mxu0  ;;  %v3094_v45 = vmul.f32 %v9778_v44, %v9749_v31 }
 0x3d7   : > { %v3177_v36 = vmax.f32 %v3145_v55, 0.0  ;;  %v3146_v58 = vadd.f32 %v9787_v41, %v3108_v20  ;;  %v3835_v18 = vmul.f32 %v5485_v43, %v9778_v44  ;;  %v3766_v51 = vpop.f32.mrb[53].mxu0  ;;  %v3096_v20 = vmul.f32 %v9747_v21, %v9778_v44 }
 0x3d8   : > { %v3175_v28 = vmax.f32 %v3143_v3, 0.0  ;;  %v3144_v60 = vadd.f32 %v9787_v41, %v3106_v24  ;;  %v3833_v56 = vmul.f32 %v9778_v44, %v3766_v51  ;;  %v5486_v27 = vpop.f32.mrb[54].mxu0  ;;  %v3821_v3 = vmul.f32 %v9778_v44, %v9753_v46 }
 0x3d9   : > { %v3178_v57 = vmax.f32 %v3146_v58, 0.0  ;;  %v6775_v35 = vpack.i.bf16 %v3161_v7, %v3177_v36  ;;  %v3867_v5 = vadd.f32 %v9787_v41, %v3835_v18  ;;  %v3836_v53 = vmul.f32 %v5486_v27, %v9778_v44  ;;  %v3769_v13 = vpop.f32.mrb[55].mxu0 }
 0x3da   : > { %v3176_v49 = vmax.f32 %v3144_v60, 0.0  ;;  %v6771_v38 = vpack.i.bf16 %v3159_v25, %v3175_v28  ;;  %v3865_v42 = vadd.f32 %v9787_v41, %v3833_v56  ;;  %v3834_v1 = vmul.f32 %v9778_v44, %v3769_v13 }
 0x3db   : > { %v6777_v37 = vpack.i.bf16 %v3162_v22, %v3178_v57  ;;  %v3899_v9 = vmax.f32 %v3867_v5, 0.0  ;;  %v3868_v47 = vadd.f32 %v9787_v41, %v3836_v53  ;;  %v3095_v25 = vmul.f32 %v9743_v11, %v9778_v44 }
 0x3dc   : > { %6772 = vxpose.xlu0.b32.cont [5/16] (narrow) %v6771_v38, 64  ;;  %v6773_v59 = vpack.i.bf16 %v3160_v29, %v3176_v49  ;;  %v3897_v62 = vmax.f32 %v3865_v42, 0.0  ;;  %v3866_v32 = vadd.f32 %v9787_v41, %v3834_v1  ;;  %v3823_v22 = vmul.f32 %v9751_v63, %v9778_v44 }
 0x3dd   : > { %v3900_v10 = vmax.f32 %v3868_v47, 0.0  ;;  %v6847_v7 = vpack.i.bf16 %v3883_v50, %v3899_v9  ;;  %v3824_v11 = vmul.f32 %v9755_v16, %v9778_v44  ;;  %v3133_v34 = vadd.f32 %v9787_v41, %v3095_v25 }
 0x3de   : > { %v3898_v17 = vmax.f32 %v3866_v32, 0.0  ;;  %v6843_v30 = vpack.i.bf16 %v3881_v33, %v3897_v62  ;;  %v3131_v24 = vadd.f32 %v9787_v41, %v3093_v52  ;;  %v3134_v21 = vadd.f32 %v9787_v41, %v3096_v20 }
 0x3df   : > { %v6849_v55 = vpack.i.bf16 %v3884_v15, %v3900_v10  ;;  %v3132_v31 = vadd.f32 %v9787_v41, %v3094_v45  ;;  %v3855_v29 = vadd.f32 %v9787_v41, %v3823_v22  ;;  %v3853_v63 = vadd.f32 %v9787_v41, %v3821_v3 }
 0x3e0   : > { %6774 = vxpose.xlu0.b32.cont [6/16] (narrow) %v6773_v59, 64  ;;  %6844 = vxpose.xlu1.b32.cont [5/16] (narrow) %v6843_v30, 64  ;;  %v6845_v12 = vpack.i.bf16 %v3882_v19, %v3898_v17  ;;  %v3822_v46 = vmul.f32 %v9778_v44, %v9757_v8  ;;  %v3856_v6 = vadd.f32 %v9787_v41, %v3824_v11  ;;  %v3165_v16 = vmax.f32 %v3133_v34, 0.0 }
 0x3e1   : > { %v3163_v36 = vmax.f32 %v3131_v24, 0.0  ;;  %v3166_v43 = vmax.f32 %v3134_v21, 0.0  ;;  %v3164_v0 = vmax.f32 %v3132_v31, 0.0  ;;  %v3887_v28 = vmax.f32 %v3855_v29, 0.0 }
 0x3e2   : > { %v3885_v40 = vmax.f32 %v3853_v63, 0.0  ;;  %v3854_v57 = vadd.f32 %v9787_v41, %v3822_v46  ;;  %v3888_v49 = vmax.f32 %v3856_v6, 0.0  ;;  %v3099_v31 = vmul.f32 %v9759_v61, %v9778_v44 }
 0x3e3   : > { %v3097_v29 = vmul.f32 %v9778_v44, %v9761_v14  ;;  %v3100_v63 = vmul.f32 %v9763_v23, %v9778_v44  ;;  %v3098_v46 = vmul.f32 %v9778_v44, %v9765_v4  ;;  %v3827_v6 = vmul.f32 %v9767_v54, %v9778_v44 }
 0x3e4   : > { %6776 = vxpose.xlu0.b32.cont [7/16] (narrow) %v6775_v35, 64  ;;  %6846 = vxpose.xlu1.b32.cont [6/16] (narrow) %v6845_v12, 64  ;;  %v3886_v12 = vmax.f32 %v3854_v57, 0.0  ;;  %v3826_v61 = vmul.f32 %v9778_v44, %v9773_v39  ;;  %v3137_v14 = vadd.f32 %v9787_v41, %v3099_v31 }
 0x3e5   : > { %v3135_v23 = vadd.f32 %v9787_v41, %v3097_v29  ;;  %v3138_v4 = vadd.f32 %v9787_v41, %v3100_v63  ;;  %v3859_v54 = vadd.f32 %v9787_v41, %v3827_v6 }
 0x3e8   : > { %v5441_v58 = vpop.f32.mrb[24].mxu1  ;;  %6778 = vxpose.xlu0.b32.cont [8/16] (narrow) %v6777_v37, 64  ;;  %6848 = vxpose.xlu1.b32.cont [7/16] (narrow) %v6847_v7, 64 }
 0x3e9   : > { %v3111_v60 = vmul.f32 %v5441_v58, %v9778_v44  ;;  %v5489_v18 = vpop.f32.mrb[56].mxu0  ;;  %v3048_v51 = vpop.f32.mrb[25].mxu1  ;;  %v9925_v58 = vadd.f32 %v9787_v41, %v3098_v46 }
 0x3ea   : > { %v3839_v56 = vmul.f32 %v5489_v18, %v9778_v44  ;;  %v3109_v8 = vmul.f32 %v9778_v44, %v3048_v51  ;;  %v3782_v27 = vpop.f32.mrb[57].mxu0  ;;  %v5442_v35 = vpop.f32.mrb[26].mxu1  ;;  %v3170_v18 = vmax.f32 %v3138_v4, 0.0 }
 0x3eb   : > { %v3149_v5 = vadd.f32 %v9787_v41, %v3111_v60  ;;  %v3837_v53 = vmul.f32 %v9778_v44, %v3782_v27  ;;  %v3112_v13 = vmul.f32 %v5442_v35, %v9778_v44  ;;  %v5490_v38 = vpop.f32.mrb[58].mxu0  ;;  %v3051_v26 = vpop.f32.mrb[27].mxu1  ;;  %v3168_v51 = vmax.f32 %v9925_v58, 0.0 }
 0x3ec   : > { %v3871_v42 = vadd.f32 %v9787_v41, %v3839_v56  ;;  %v3147_v1 = vadd.f32 %v9787_v41, %v3109_v8  ;;  %v3840_v37 = vmul.f32 %v5490_v38, %v9778_v44  ;;  %v3110_v50 = vmul.f32 %v9778_v44, %v3051_v26  ;;  %v3785_v9 = vpop.f32.mrb[59].mxu0  ;;  %6850 = vxpose.xlu1.b32.cont [8/16] (narrow) %v6849_v55, 64 }
 0x3ed   : > { %v3181_v47 = vmax.f32 %v3149_v5, 0.0  ;;  %v3869_v59 = vadd.f32 %v9787_v41, %v3837_v53  ;;  %v3150_v33 = vadd.f32 %v9787_v41, %v3112_v13  ;;  %v3838_v62 = vmul.f32 %v9778_v44, %v3785_v9 }
 0x3ee   : > { %v3903_v32 = vmax.f32 %v3871_v42, 0.0  ;;  %v3179_v15 = vmax.f32 %v3147_v1, 0.0  ;;  %v3872_v10 = vadd.f32 %v9787_v41, %v3840_v37  ;;  %v3148_v7 = vadd.f32 %v9787_v41, %v3110_v50 }
 0x3ef   : > { %v3901_v19 = vmax.f32 %v3869_v59, 0.0  ;;  %v3182_v17 = vmax.f32 %v3150_v33, 0.0  ;;  %v3870_v30 = vadd.f32 %v9787_v41, %v3838_v62  ;;  %v6783_v25 = vpack.i.bf16 %v3165_v16, %v3181_v47 }
 0x3f0   : > { %v3904_v52 = vmax.f32 %v3872_v10, 0.0  ;;  %v3180_v20 = vmax.f32 %v3148_v7, 0.0  ;;  %v6779_v45 = vpack.i.bf16 %v3163_v36, %v3179_v15  ;;  %v6855_v22 = vpack.i.bf16 %v3887_v28, %v3903_v32 }
 0x3f1   : > { %v3902_v3 = vmax.f32 %v3870_v30, 0.0  ;;  %v6851_v11 = vpack.i.bf16 %v3885_v40, %v3901_v19  ;;  %v6785_v34 = vpack.i.bf16 %v3166_v43, %v3182_v17  ;;  %v3825_v16 = vmul.f32 %v9778_v44, %v9769_v48 }
 0x3f2   : > { %6780 = vxpose.xlu0.b32.cont [9/16] (narrow) %v6779_v45, 64  ;;  %v6781_v55 = vpack.i.bf16 %v3164_v0, %v3180_v20  ;;  %v6857_v24 = vpack.i.bf16 %v3888_v49, %v3904_v52  ;;  %v3828_v36 = vmul.f32 %v9771_v2, %v9778_v44  ;;  %v7166_v48 = vmov 0  }
 0x3f3   : > { %6852 = vxpose.xlu1.b32.cont [9/16] (narrow) %v6851_v11, 64  ;;  %v6853_v21 = vpack.i.bf16 %v3886_v12, %v3902_v3  ;;  %4933 = vmatprep.mubr.bf16.mxu1 %v7166_v48  ;;  %v3857_v2 = vadd.f32 %v9787_v41, %v3825_v16  ;;  %v9933_v43 = vadd.f32 %v9787_v41, %v3826_v61  ;;  %v3169_v0 = vmax.f32 %v3137_v14, 0.0 }
 0x3f4   : > { %5056 = vmatprep.mubr.bf16.mxu0 %v7166_v48  ;;  %v3860_v39 = vadd.f32 %v9787_v41, %v3828_v36  ;;  %v3167_v28 = vmax.f32 %v3135_v23, 0.0  ;;  %v3891_v40 = vmax.f32 %v3859_v54, 0.0 }
 0x3f5   : > { %v3889_v27 = vmax.f32 %v3857_v2, 0.0  ;;  %v3890_v38 = vmax.f32 %v9933_v43, 0.0 }
 0x3f6   : > { %6782 = vxpose.xlu0.b32.cont [10/16] (narrow) %v6781_v55, 64  ;;  %v3892_v35 = vmax.f32 %v3860_v39, 0.0 }
 0x3f7   : > { %6854 = vxpose.xlu1.b32.cont [10/16] (narrow) %v6853_v21, 64 }
 0x3fa   : > { %6784 = vxpose.xlu0.b32.cont [11/16] (narrow) %v6783_v25, 64 }
 0x3fb   : > { %6856 = vxpose.xlu1.b32.cont [11/16] (narrow) %v6855_v22, 64 }
 0x3fe   : > { %6786 = vxpose.xlu0.b32.cont [12/16] (narrow) %v6785_v34, 64 }
 0x3ff   : > { %6858 = vxpose.xlu1.b32.cont [12/16] (narrow) %v6857_v24, 64 }
 0x400   : > { %v5445_v60 = vpop.f32.mrb[28].mxu1 }
 0x401   : > { %v3115_v57 = vmul.f32 %v5445_v60, %v9778_v44  ;;  %v5493_v56 = vpop.f32.mrb[60].mxu0  ;;  %v3064_v8 = vpop.f32.mrb[29].mxu1 }
 0x402   : > { %v3843_v49 = vmul.f32 %v5493_v56, %v9778_v44  ;;  %v3113_v5 = vmul.f32 %v9778_v44, %v3064_v8  ;;  %v3798_v53 = vpop.f32.mrb[61].mxu0  ;;  %v5446_v13 = vpop.f32.mrb[30].mxu1 }
 0x403   : > { %v3153_v26 = vadd.f32 %v9787_v41, %v3115_v57  ;;  %v3841_v42 = vmul.f32 %v9778_v44, %v3798_v53  ;;  %v3116_v1 = vmul.f32 %v5446_v13, %v9778_v44  ;;  %v5494_v37 = vpop.f32.mrb[62].mxu0  ;;  %v3067_v50 = vpop.f32.mrb[31].mxu1 }
 0x404   : > { %v3875_v9 = vadd.f32 %v9787_v41, %v3843_v49  ;;  %v3151_v47 = vadd.f32 %v9787_v41, %v3113_v5  ;;  %v3844_v59 = vmul.f32 %v5494_v37, %v9778_v44  ;;  %v3114_v33 = vmul.f32 %v9778_v44, %v3067_v50  ;;  %v3801_v62 = vpop.f32.mrb[63].mxu0 }
 0x405   : > { %v3185_v32 = vmax.f32 %v3153_v26, 0.0  ;;  %v3873_v15 = vadd.f32 %v9787_v41, %v3841_v42  ;;  %v3154_v10 = vadd.f32 %v9787_v41, %v3116_v1  ;;  %v3842_v7 = vmul.f32 %v9778_v44, %v3801_v62 }
 0x406   : > { %v3907_v19 = vmax.f32 %v3875_v9, 0.0  ;;  %v3183_v17 = vmax.f32 %v3151_v47, 0.0  ;;  %v3876_v30 = vadd.f32 %v9787_v41, %v3844_v59  ;;  %v3152_v25 = vadd.f32 %v9787_v41, %v3114_v33 }
 0x407   : > { %v3905_v52 = vmax.f32 %v3873_v15, 0.0  ;;  %v3186_v20 = vmax.f32 %v3154_v10, 0.0  ;;  %v3874_v45 = vadd.f32 %v9787_v41, %v3842_v7  ;;  %v6791_v22 = vpack.i.bf16 %v3169_v0, %v3185_v32 }
 0x408   : > { %v3908_v12 = vmax.f32 %v3876_v30, 0.0  ;;  %v3184_v3 = vmax.f32 %v3152_v25, 0.0  ;;  %v5513_v11 = vpop.f32.mrb[32].mxu1  ;;  %v6787_v34 = vpack.i.bf16 %v3167_v28, %v3183_v17  ;;  %v6863_v55 = vpack.i.bf16 %v3891_v40, %v3907_v19 }
 0x409   : > { %v3906_v24 = vmax.f32 %v3874_v45, 0.0  ;;  %v4162_v21 = vmul.f32 %v5513_v11, %v9778_v44  ;;  %v5561_v31 = vpop.f32.mrb[64].mxu0  ;;  %v4033_v29 = vpop.f32.mrb[33].mxu1  ;;  %v6859_v63 = vpack.i.bf16 %v3889_v27, %v3905_v52  ;;  %v9954_v46 = vpack.i.bf16 %v3170_v18, %v3186_v20 }
 0x40a   : > { %v4509_v6 = vmul.f32 %v5561_v31, %v9778_v44  ;;  %v4160_v16 = vmul.f32 %v9778_v44, %v4033_v29  ;;  %v4380_v36 = vpop.f32.mrb[65].mxu0  ;;  %6788 = vxpose.xlu0.b32.cont [13/16] (narrow) %v6787_v34, 64  ;;  %v5514_v61 = vpop.f32.mrb[34].mxu1  ;;  %v6789_v14 = vpack.i.bf16 %v3168_v51, %v3184_v3  ;;  %v9958_v23 = vpack.i.bf16 %v3892_v35, %v3908_v12 }
 0x40b   : > { %v4194_v4 = vadd.f32 %v9787_v41, %v4162_v21  ;;  %v4507_v58 = vmul.f32 %v9778_v44, %v4380_v36  ;;  %6860 = vxpose.xlu1.b32.cont [13/16] (narrow) %v6859_v63, 64  ;;  %v5562_v54 = vpop.f32.mrb[66].mxu0  ;;  %v4163_v2 = vmul.f32 %v5514_v61, %v9778_v44  ;;  %v4036_v39 = vpop.f32.mrb[35].mxu1  ;;  %v6861_v43 = vpack.i.bf16 %v3890_v38, %v3906_v24 }
 0x40c   : > { %v4541_v0 = vadd.f32 %v9787_v41, %v4509_v6  ;;  %v4192_v28 = vadd.f32 %v9787_v41, %v4160_v16  ;;  %v4510_v60 = vmul.f32 %v5562_v54, %v9778_v44  ;;  %v4161_v18 = vmul.f32 %v9778_v44, %v4036_v39  ;;  %v4383_v51 = vpop.f32.mrb[67].mxu0 }
 0x40d   : > { %v4226_v40 = vmax.f32 %v4194_v4, 0.0  ;;  %v4539_v57 = vadd.f32 %v9787_v41, %v4507_v58  ;;  %v4195_v56 = vadd.f32 %v9787_v41, %v4163_v2  ;;  %v4508_v8 = vmul.f32 %v9778_v44, %v4383_v51 }
 0x40e   : > { %v4573_v27 = vmax.f32 %v4541_v0, 0.0  ;;  %v4224_v35 = vmax.f32 %v4192_v28, 0.0  ;;  %v4542_v49 = vadd.f32 %v9787_v41, %v4510_v60  ;;  %v4193_v5 = vadd.f32 %v9787_v41, %v4161_v18  ;;  %6790 = vxpose.xlu0.b32.cont [14/16] (narrow) %v6789_v14, 64 }
 0x40f   : > { %v4571_v53 = vmax.f32 %v4539_v57, 0.0  ;;  %v4227_v13 = vmax.f32 %v4195_v56, 0.0  ;;  %v4540_v38 = vadd.f32 %v9787_v41, %v4508_v8  ;;  %6862 = vxpose.xlu1.b32.cont [14/16] (narrow) %v6861_v43, 64 }
 0x410   : > { %v4574_v26 = vmax.f32 %v4542_v49, 0.0  ;;  %v4225_v42 = vmax.f32 %v4193_v5, 0.0  ;;  %v5517_v1 = vpop.f32.mrb[36].mxu1  ;;  %v9973_v37 = vpack.i.bf16 %v4573_v27, %v4226_v40 }
 0x411   : > { %v4572_v50 = vmax.f32 %v4540_v38, 0.0  ;;  %v4166_v9 = vmul.f32 %v5517_v1, %v9778_v44  ;;  %v5565_v47 = vpop.f32.mrb[68].mxu0  ;;  %v4049_v59 = vpop.f32.mrb[37].mxu1  ;;  %v6979_v33 = vpack.i.bf16 %v4571_v53, %v4224_v35 }
 0x412   : > { %v4513_v62 = vmul.f32 %v5565_v47, %v9778_v44  ;;  %v4164_v32 = vmul.f32 %v9778_v44, %v4049_v59  ;;  %v4396_v15 = vpop.f32.mrb[69].mxu0  ;;  %v5518_v10 = vpop.f32.mrb[38].mxu1  ;;  %6792 = vxpose.xlu0.b32.cont [15/16] (narrow) %v6791_v22, 64  ;;  %v9978_v7 = vpack.i.bf16 %v4574_v26, %v4227_v13 }
 0x413   : > { %v4198_v19 = vadd.f32 %v9787_v41, %v4166_v9  ;;  %v4511_v17 = vmul.f32 %v9778_v44, %v4396_v15  ;;  %v5566_v30 = vpop.f32.mrb[70].mxu0  ;;  %6864 = vxpose.xlu1.b32.cont [15/16] (narrow) %v6863_v55, 64  ;;  %v4167_v25 = vmul.f32 %v5518_v10, %v9778_v44  ;;  %v4052_v52 = vpop.f32.mrb[39].mxu1  ;;  %v6981_v20 = vpack.i.bf16 %v4572_v50, %v4225_v42 }
 0x414   : > { %v4545_v45 = vadd.f32 %v9787_v41, %v4513_v62  ;;  %v4196_v12 = vadd.f32 %v9787_v41, %v4164_v32  ;;  %v4514_v3 = vmul.f32 %v5566_v30, %v9778_v44  ;;  %v4165_v22 = vmul.f32 %v9778_v44, %v4052_v52  ;;  %v4399_v11 = vpop.f32.mrb[71].mxu0 }
 0x415   : > { %v4230_v34 = vmax.f32 %v4198_v19, 0.0  ;;  %v4543_v24 = vadd.f32 %v9787_v41, %v4511_v17  ;;  %v4199_v21 = vadd.f32 %v9787_v41, %v4167_v25  ;;  %v4512_v55 = vmul.f32 %v9778_v44, %v4399_v11 }
 0x416   : > { %v4577_v31 = vmax.f32 %v4545_v45, 0.0  ;;  %v4228_v29 = vmax.f32 %v4196_v12, 0.0  ;;  %v4546_v63 = vadd.f32 %v9787_v41, %v4514_v3  ;;  %v4197_v6 = vadd.f32 %v9787_v41, %v4165_v22  ;;  %6794 = vxpose.xlu0.b32.end [16/16] (narrow) %v9954_v46, 64 }
 0x417   : > { %v4575_v16 = vmax.f32 %v4543_v24, 0.0  ;;  %v4231_v36 = vmax.f32 %v4199_v21, 0.0  ;;  %v4544_v61 = vadd.f32 %v9787_v41, %v4512_v55  ;;  %6866 = vxpose.xlu1.b32.end [16/16] (narrow) %v9958_v23, 64 }
 0x418   : > { %v4578_v14 = vmax.f32 %v4546_v63, 0.0  ;;  %v4229_v4 = vmax.f32 %v4197_v6, 0.0  ;;  %v5521_v58 = vpop.f32.mrb[40].mxu1  ;;  %v9995_v54 = vpack.i.bf16 %v4577_v31, %v4230_v34 }
 0x419   : > { %v4576_v2 = vmax.f32 %v4544_v61, 0.0  ;;  %v4170_v39 = vmul.f32 %v5521_v58, %v9778_v44  ;;  %v5569_v43 = vpop.f32.mrb[72].mxu0  ;;  %v4065_v0 = vpop.f32.mrb[41].mxu1  ;;  %v9998_v28 = vpack.i.bf16 %v4575_v16, %v4228_v29 }
 0x41a   : > { %v4517_v46 = vmul.f32 %v5569_v43, %v9778_v44  ;;  %v4168_v60 = vmul.f32 %v9778_v44, %v4065_v0  ;;  %v4412_v18 = vpop.f32.mrb[73].mxu0  ;;  %v5522_v51 = vpop.f32.mrb[42].mxu1  ;;  %v10002_v40 = vpack.i.bf16 %v4578_v14, %v4231_v36 }
 0x41b   : > { %v4202_v23 = vadd.f32 %v9787_v41, %v4170_v39  ;;  %v4515_v57 = vmul.f32 %v9778_v44, %v4412_v18  ;;  %v5570_v56 = vpop.f32.mrb[74].mxu0  ;;  %6980 = vxpose.xlu1.b32.start [1/16] (narrow) %v6979_v33, 64  ;;  %v4171_v8 = vmul.f32 %v5522_v51, %v9778_v44  ;;  %v4068_v27 = vpop.f32.mrb[43].mxu1  ;;  %v10007_v35 = vpack.i.bf16 %v4576_v2, %v4229_v4 }
 0x41c   : > { %v4549_v49 = vadd.f32 %v9787_v41, %v4517_v46  ;;  %v4200_v5 = vadd.f32 %v9787_v41, %v4168_v60  ;;  %v4518_v53 = vmul.f32 %v5570_v56, %v9778_v44  ;;  %v4169_v13 = vmul.f32 %v9778_v44, %v4068_v27  ;;  %v4415_v38 = vpop.f32.mrb[75].mxu0 }
 0x41d   : > { %v4234_v26 = vmax.f32 %v4202_v23, 0.0  ;;  %v4547_v42 = vadd.f32 %v9787_v41, %v4515_v57  ;;  %v4203_v1 = vadd.f32 %v9787_v41, %v4171_v8  ;;  %v4516_v50 = vmul.f32 %v9778_v44, %v4415_v38 }
 0x41e   : > { %v4581_v9 = vmax.f32 %v4549_v49, 0.0  ;;  %v4232_v47 = vmax.f32 %v4200_v5, 0.0  ;;  %v4550_v59 = vadd.f32 %v9787_v41, %v4518_v53  ;;  %v4201_v33 = vadd.f32 %v9787_v41, %v4169_v13 }
 0x41f   : > { %v4579_v62 = vmax.f32 %v4547_v42, 0.0  ;;  %v4235_v32 = vmax.f32 %v4203_v1, 0.0  ;;  %v4548_v15 = vadd.f32 %v9787_v41, %v4516_v50  ;;  %6982 = vxpose.xlu1.b32.cont [2/16] (narrow) %v6981_v20, 64 }
 0x420   : > { %v4582_v10 = vmax.f32 %v4550_v59, 0.0  ;;  %v4233_v19 = vmax.f32 %v4201_v33, 0.0  ;;  %v5525_v17 = vpop.f32.mrb[44].mxu1  ;;  %v10019_v30 = vpack.i.bf16 %v4581_v9, %v4234_v26 }
 0x421   : > { %v4580_v25 = vmax.f32 %v4548_v15, 0.0  ;;  %v4174_v52 = vmul.f32 %v5525_v17, %v9778_v44  ;;  %v5573_v45 = vpop.f32.mrb[76].mxu0  ;;  %v4081_v12 = vpop.f32.mrb[45].mxu1  ;;  %v10022_v3 = vpack.i.bf16 %v4579_v62, %v4232_v47 }
 0x422   : > { %v4521_v22 = vmul.f32 %v5573_v45, %v9778_v44  ;;  %v4172_v11 = vmul.f32 %v9778_v44, %v4081_v12  ;;  %v4428_v34 = vpop.f32.mrb[77].mxu0  ;;  %v5526_v24 = vpop.f32.mrb[46].mxu1  ;;  %v10026_v21 = vpack.i.bf16 %v4582_v10, %v4235_v32 }
 0x423   : > { %v4206_v20 = vadd.f32 %v9787_v41, %v4174_v52  ;;  %v4519_v55 = vmul.f32 %v9778_v44, %v4428_v34  ;;  %v5574_v31 = vpop.f32.mrb[78].mxu0  ;;  %6984 = vxpose.xlu1.b32.cont [3/16] (narrow) %v9973_v37, 64  ;;  %v4175_v29 = vmul.f32 %v5526_v24, %v9778_v44  ;;  %v4084_v63 = vpop.f32.mrb[47].mxu1  ;;  %v10032_v6 = vpack.i.bf16 %v4580_v25, %v4233_v19 }
 0x424   : > { %v4553_v16 = vadd.f32 %v9787_v41, %v4521_v22  ;;  %v4204_v36 = vadd.f32 %v9787_v41, %v4172_v11  ;;  %v4522_v61 = vmul.f32 %v5574_v31, %v9778_v44  ;;  %v4173_v14 = vmul.f32 %v9778_v44, %v4084_v63  ;;  %v4431_v4 = vpop.f32.mrb[79].mxu0 }
 0x425   : > { %v4238_v58 = vmax.f32 %v4206_v20, 0.0  ;;  %v4551_v2 = vadd.f32 %v9787_v41, %v4519_v55  ;;  %v4207_v39 = vadd.f32 %v9787_v41, %v4175_v29  ;;  %v4520_v37 = vmul.f32 %v9778_v44, %v4431_v4 }
 0x426   : > { %v4585_v43 = vmax.f32 %v4553_v16, 0.0  ;;  %v4236_v0 = vmax.f32 %v4204_v36, 0.0  ;;  %v4554_v46 = vadd.f32 %v9787_v41, %v4522_v61  ;;  %v4205_v60 = vadd.f32 %v9787_v41, %v4173_v14 }
 0x427   : > { %v4583_v18 = vmax.f32 %v4551_v2, 0.0  ;;  %v4239_v51 = vmax.f32 %v4207_v39, 0.0  ;;  %v4552_v23 = vadd.f32 %v9787_v41, %v4520_v37  ;;  %6986 = vxpose.xlu1.b32.cont [4/16] (narrow) %v9978_v7, 64 }
 0x428   : > { %v4586_v57 = vmax.f32 %v4554_v46, 0.0  ;;  %v4237_v56 = vmax.f32 %v4205_v60, 0.0  ;;  %v5529_v8 = vpop.f32.mrb[48].mxu1  ;;  %v10045_v27 = vpack.i.bf16 %v4585_v43, %v4238_v58 }
 0x429   : > { %v4584_v49 = vmax.f32 %v4552_v23, 0.0  ;;  %v4178_v5 = vmul.f32 %v5529_v8, %v9778_v44  ;;  %v5577_v53 = vpop.f32.mrb[80].mxu0  ;;  %v4097_v13 = vpop.f32.mrb[49].mxu1  ;;  %v10048_v38 = vpack.i.bf16 %v4583_v18, %v4236_v0 }
 0x42a   : > { %v4525_v26 = vmul.f32 %v5577_v53, %v9778_v44  ;;  %v4176_v42 = vmul.f32 %v9778_v44, %v4097_v13  ;;  %v4444_v1 = vpop.f32.mrb[81].mxu0  ;;  %v5530_v50 = vpop.f32.mrb[50].mxu1  ;;  %v10052_v9 = vpack.i.bf16 %v4586_v57, %v4239_v51 }
 0x42b   : > { %v4210_v7 = vadd.f32 %v9787_v41, %v4178_v5  ;;  %v4523_v47 = vmul.f32 %v9778_v44, %v4444_v1  ;;  %v5578_v59 = vpop.f32.mrb[82].mxu0  ;;  %6988 = vxpose.xlu1.b32.cont [5/16] (narrow) %v9998_v28, 64  ;;  %v4179_v33 = vmul.f32 %v5530_v50, %v9778_v44  ;;  %v4100_v62 = vpop.f32.mrb[51].mxu1  ;;  %v10058_v32 = vpack.i.bf16 %v4584_v49, %v4237_v56 }
 0x42c   : > { %v4557_v15 = vadd.f32 %v9787_v41, %v4525_v26  ;;  %v4208_v10 = vadd.f32 %v9787_v41, %v4176_v42  ;;  %v4526_v19 = vmul.f32 %v5578_v59, %v9778_v44  ;;  %v4177_v17 = vmul.f32 %v9778_v44, %v4100_v62  ;;  %v4447_v25 = vpop.f32.mrb[83].mxu0 }
 0x42d   : > { %v4242_v52 = vmax.f32 %v4210_v7, 0.0  ;;  %v4555_v45 = vadd.f32 %v9787_v41, %v4523_v47  ;;  %v4211_v12 = vadd.f32 %v9787_v41, %v4179_v33  ;;  %v4524_v28 = vmul.f32 %v9778_v44, %v4447_v25 }
 0x42e   : > { %v4589_v22 = vmax.f32 %v4557_v15, 0.0  ;;  %v4240_v11 = vmax.f32 %v4208_v10, 0.0  ;;  %v4558_v34 = vadd.f32 %v9787_v41, %v4526_v19  ;;  %v4209_v24 = vadd.f32 %v9787_v41, %v4177_v17 }
 0x42f   : > { %v4587_v20 = vmax.f32 %v4555_v45, 0.0  ;;  %v4243_v55 = vmax.f32 %v4211_v12, 0.0  ;;  %v4556_v31 = vadd.f32 %v9787_v41, %v4524_v28  ;;  %6990 = vxpose.xlu1.b32.cont [6/16] (narrow) %v10007_v35, 64 }
 0x430   : > { %v4590_v29 = vmax.f32 %v4558_v34, 0.0  ;;  %v5533_v63 = vpop.f32.mrb[52].mxu1  ;;  %v10071_v16 = vpack.i.bf16 %v4589_v22, %v4242_v52  ;;  %v4241_v58 = vmax.f32 %v4209_v24, 0.0  ;;  %v10108_v24 = vld [vmem:[%s10205_s6] ss:$0 sm:$0xff] }
 0x431   : > { %v4182_v36 = vmul.f32 %v5533_v63, %v9778_v44  ;;  %v5581_v61 = vpop.f32.mrb[84].mxu0  ;;  %v4113_v14 = vpop.f32.mrb[53].mxu1  ;;  %v6907_v4 = vpack.i.bf16 %v4587_v20, %v4240_v11  ;;  %v4588_v46 = vmax.f32 %v4556_v31, 0.0 }
 0x432   : > { %v4529_v2 = vmul.f32 %v5581_v61, %v9778_v44  ;;  %v4180_v39 = vmul.f32 %v9778_v44, %v4113_v14  ;;  %v4460_v37 = vpop.f32.mrb[85].mxu0  ;;  %v5534_v43 = vpop.f32.mrb[54].mxu1  ;;  %v10076_v0 = vpack.i.bf16 %v4590_v29, %v4243_v55 }
 0x433   : > { %v4214_v35 = vadd.f32 %v9787_v41, %v4182_v36  ;;  %v4527_v60 = vmul.f32 %v9778_v44, %v4460_v37  ;;  %v5582_v18 = vpop.f32.mrb[86].mxu0  ;;  %6992 = vxpose.xlu1.b32.cont [7/16] (narrow) %v9995_v54, 64  ;;  %v4183_v51 = vmul.f32 %v5534_v43, %v9778_v44  ;;  %6908 = vxpose.xlu0.b32.start [1/16] (narrow) %v6907_v4, 64  ;;  %v4116_v23 = vpop.f32.mrb[55].mxu1 }
 0x434   : > { %v4561_v57 = vadd.f32 %v9787_v41, %v4529_v2  ;;  %v4212_v56 = vadd.f32 %v9787_v41, %v4180_v39  ;;  %v4530_v8 = vmul.f32 %v5582_v18, %v9778_v44  ;;  %v4181_v49 = vmul.f32 %v9778_v44, %v4116_v23  ;;  %v4463_v5 = vpop.f32.mrb[87].mxu0 }
 0x435   : > { %v4246_v53 = vmax.f32 %v4214_v35, 0.0  ;;  %v4559_v13 = vadd.f32 %v9787_v41, %v4527_v60  ;;  %v4215_v26 = vadd.f32 %v9787_v41, %v4183_v51  ;;  %v4528_v54 = vmul.f32 %v9778_v44, %v4463_v5  ;;  %v10098_v44 = vld [vmem:[%s10204_s5] ss:$0 sm:$0xff] }
 0x436   : > { %v4593_v42 = vmax.f32 %v4561_v57, 0.0  ;;  %v4244_v1 = vmax.f32 %v4212_v56, 0.0  ;;  %v4562_v50 = vadd.f32 %v9787_v41, %v4530_v8  ;;  %v4213_v7 = vadd.f32 %v9787_v41, %v4181_v49 }
 0x437   : > { %v4591_v47 = vmax.f32 %v4559_v13, 0.0  ;;  %v4247_v59 = vmax.f32 %v4215_v26, 0.0  ;;  %v4560_v33 = vadd.f32 %v9787_v41, %v4528_v54  ;;  %6994 = vxpose.xlu1.b32.cont [8/16] (narrow) %v10002_v40, 64  ;;  %v6909_v62 = vpack.i.bf16 %v4588_v46, %v4241_v58 }
 0x438   : > { %v4594_v15 = vmax.f32 %v4562_v50, 0.0  ;;  %v4245_v10 = vmax.f32 %v4213_v7, 0.0  ;;  %v5537_v19 = vpop.f32.mrb[56].mxu1  ;;  %v10093_v17 = vpack.i.bf16 %v4593_v42, %v4246_v53 }
 0x439   : > { %v4592_v25 = vmax.f32 %v4560_v33, 0.0  ;;  %6910 = vxpose.xlu0.b32.cont [2/16] (narrow) %v6909_v62, 64  ;;  %v4186_v52 = vmul.f32 %v10098_v44, %v5537_v19  ;;  %v5585_v45 = vpop.f32.mrb[88].mxu0  ;;  %v4129_v12 = vpop.f32.mrb[57].mxu1  ;;  %v6915_v41 = vpack.i.bf16 %v4591_v47, %v4244_v1 }
 0x43a   : > { %v4533_v40 = vmul.f32 %v10098_v44, %v5585_v45  ;;  %v4184_v28 = vmul.f32 %v10098_v44, %v4129_v12  ;;  %v4476_v22 = vpop.f32.mrb[89].mxu0  ;;  %v5538_v11 = vpop.f32.mrb[58].mxu1  ;;  %v10103_v34 = vpack.i.bf16 %v4594_v15, %v4247_v59 }
 0x43b   : > { %v4218_v20 = vadd.f32 %v10108_v24, %v4186_v52  ;;  %v4531_v55 = vmul.f32 %v10098_v44, %v4476_v22  ;;  %v5586_v31 = vpop.f32.mrb[90].mxu0  ;;  %6996 = vxpose.xlu1.b32.cont [9/16] (narrow) %v10022_v3, 64  ;;  %v4187_v29 = vmul.f32 %v10098_v44, %v5538_v11  ;;  %v4132_v63 = vpop.f32.mrb[59].mxu1  ;;  %v6917_v36 = vpack.i.bf16 %v4592_v25, %v4245_v10 }
 0x43c   : > { %v4565_v61 = vadd.f32 %v10108_v24, %v4533_v40  ;;  %v4216_v14 = vadd.f32 %v10108_v24, %v4184_v28  ;;  %v4534_v4 = vmul.f32 %v10098_v44, %v5586_v31  ;;  %v4185_v58 = vmul.f32 %v10098_v44, %v4132_v63  ;;  %v4479_v2 = vpop.f32.mrb[91].mxu0 }
 0x43d   : > { %v4250_v39 = vmax.f32 %v4218_v20, 0.0  ;;  %v4563_v37 = vadd.f32 %v10108_v24, %v4531_v55  ;;  %v4219_v43 = vadd.f32 %v10108_v24, %v4187_v29  ;;  %6912 = vxpose.xlu0.b32.cont [3/16] (narrow) %v10071_v16, 64  ;;  %v4532_v3 = vmul.f32 %v10098_v44, %v4479_v2 }
 0x43e   : > { %v4597_v46 = vmax.f32 %v4565_v61, 0.0  ;;  %v4248_v35 = vmax.f32 %v4216_v14, 0.0  ;;  %v4566_v60 = vadd.f32 %v10108_v24, %v4534_v4  ;;  %v4217_v18 = vadd.f32 %v10108_v24, %v4185_v58 }
 0x43f   : > { %v4595_v51 = vmax.f32 %v4563_v37, 0.0  ;;  %v4251_v23 = vmax.f32 %v4219_v43, 0.0  ;;  %v4564_v57 = vadd.f32 %v10108_v24, %v4532_v3  ;;  %6998 = vxpose.xlu1.b32.cont [10/16] (narrow) %v10032_v6, 64 }
 0x440   : > { %v4598_v56 = vmax.f32 %v4566_v60, 0.0  ;;  %v4249_v8 = vmax.f32 %v4217_v18, 0.0  ;;  %v5541_v49 = vpop.f32.mrb[60].mxu1  ;;  %v6927_v5 = vpack.i.bf16 %v4597_v46, %v4250_v39 }
 0x441   : > { %v4596_v53 = vmax.f32 %v4564_v57, 0.0  ;;  %6914 = vxpose.xlu0.b32.cont [4/16] (narrow) %v10076_v0, 64  ;;  %v4190_v16 = vmul.f32 %v10098_v44, %v5541_v49  ;;  %v5589_v13 = vpop.f32.mrb[92].mxu0  ;;  %v4145_v26 = vpop.f32.mrb[61].mxu1  ;;  %v6923_v54 = vpack.i.bf16 %v4595_v51, %v4248_v35 }
 0x442   : > { %v4537_v42 = vmul.f32 %v10098_v44, %v5589_v13  ;;  %v4188_v1 = vmul.f32 %v10098_v44, %v4145_v26  ;;  %v4492_v50 = vpop.f32.mrb[93].mxu0  ;;  %v5542_v7 = vpop.f32.mrb[62].mxu1  ;;  %v6929_v47 = vpack.i.bf16 %v4598_v56, %v4251_v23 }
 0x443   : > { %v4222_v6 = vadd.f32 %v10108_v24, %v4190_v16  ;;  %v4535_v59 = vmul.f32 %v10098_v44, %v4492_v50  ;;  %v5590_v33 = vpop.f32.mrb[94].mxu0  ;;  %7000 = vxpose.xlu1.b32.cont [11/16] (narrow) %v10019_v30, 64  ;;  %v4191_v0 = vmul.f32 %v10098_v44, %v5542_v7  ;;  %v4148_v62 = vpop.f32.mrb[63].mxu1  ;;  %v6925_v15 = vpack.i.bf16 %v4596_v53, %v4249_v8 }
 0x444   : > { %v4569_v10 = vadd.f32 %v10108_v24, %v4537_v42  ;;  %v4220_v19 = vadd.f32 %v10108_v24, %v4188_v1  ;;  %v4538_v25 = vmul.f32 %v10098_v44, %v5590_v33  ;;  %v4189_v52 = vmul.f32 %v10098_v44, %v4148_v62  ;;  %v4495_v45 = vpop.f32.mrb[95].mxu0 }
 0x445   : > { %v4254_v12 = vmax.f32 %v4222_v6, 0.0  ;;  %v4567_v40 = vadd.f32 %v10108_v24, %v4535_v59  ;;  %v4223_v28 = vadd.f32 %v10108_v24, %v4191_v0  ;;  %6916 = vxpose.xlu0.b32.cont [5/16] (narrow) %v6915_v41, 64  ;;  %v4536_v30 = vmul.f32 %v10098_v44, %v4495_v45 }
 0x446   : > { %v4601_v22 = vmax.f32 %v4569_v10, 0.0  ;;  %v4252_v11 = vmax.f32 %v4220_v19, 0.0  ;;  %v4570_v20 = vadd.f32 %v10108_v24, %v4538_v25  ;;  %v4221_v55 = vadd.f32 %v10108_v24, %v4189_v52 }
 0x447   : > { %v4599_v31 = vmax.f32 %v4567_v40, 0.0  ;;  %v4255_v29 = vmax.f32 %v4223_v28, 0.0  ;;  %v4568_v63 = vadd.f32 %v10108_v24, %v4536_v30  ;;  %7002 = vxpose.xlu1.b32.cont [12/16] (narrow) %v10026_v21, 64  ;;  %v10158_v30 = vld [vmem:[%s10206_s7] sm:$0x7] }
 0x448   : > { %v4602_v61 = vmax.f32 %v4570_v20, 0.0  ;;  %v4253_v14 = vmax.f32 %v4221_v55, 0.0  ;;  %v6935_v4 = vpack.i.bf16 %v4601_v22, %v4254_v12 }
 0x449   : > { %v4600_v58 = vmax.f32 %v4568_v63, 0.0  ;;  %6918 = vxpose.xlu0.b32.cont [6/16] (narrow) %v6917_v36, 64  ;;  %v6931_v41 = vpack.i.bf16 %v4599_v31, %v4252_v11 }
 0x44a   : > { %v6937_v2 = vpack.i.bf16 %v4602_v61, %v4255_v29 }
 0x44b   : > { %7004 = vxpose.xlu1.b32.cont [13/16] (narrow) %v10048_v38, 64  ;;  %v6933_v44 = vpack.i.bf16 %v4600_v58, %v4253_v14 }
 0x44d   : > { %6920 = vxpose.xlu0.b32.cont [7/16] (narrow) %v10093_v17, 64 }
 0x44f   : > { %7006 = vxpose.xlu1.b32.cont [14/16] (narrow) %v10058_v32, 64 }
 0x451   : > { %6922 = vxpose.xlu0.b32.cont [8/16] (narrow) %v10103_v34, 64 }
 0x453   : > { %7008 = vxpose.xlu1.b32.cont [15/16] (narrow) %v10045_v27, 64 }
 0x455   : > { %6924 = vxpose.xlu0.b32.cont [9/16] (narrow) %v6923_v54, 64 }
 0x457   : > { %7010 = vxpose.xlu1.b32.end [16/16] (narrow) %v10052_v9, 64 }
 0x459   : > { %6926 = vxpose.xlu0.b32.cont [10/16] (narrow) %v6925_v15, 64 }
 0x45a   : > { %v6795_v21 = vpop.trf.xlu0 }
 0x45b   : > { %v10151_v24 = vpop.trf.xlu1  ;;  %v6799_v36 = vunpack.i.h.bf16 %v6795_v21  ;;  %v6796_v39 = vunpack.i.l.bf16 %v6795_v21 }
 0x45c   : > { %v6868_v7 = vunpack.i.l.bf16 %v10151_v24  ;;  %v6871_v33 = vunpack.i.h.bf16 %v10151_v24 }
 0x45d   : > { %6928 = vxpose.xlu0.b32.cont [11/16] (narrow) %v6927_v5, 64 }
 0x45e   : > { %v6800_v38 = vpop.trf.xlu0 }
 0x45f   : > { %v6804_v37 = vunpack.i.h.bf16 %v6800_v38  ;;  %v6801_v43 = vunpack.i.l.bf16 %v6800_v38  ;;  %v6872_v17 = vpop.trf.xlu1 }
 0x460   : > { %v6876_v19 = vunpack.i.h.bf16 %v6872_v17 }
 0x461   : > { %6930 = vxpose.xlu0.b32.cont [12/16] (narrow) %v6929_v47, 64  ;;  %v4860_v32 = vpack.c.bf16 %v6801_v43, %v6796_v39  ;;  %v4859_v3 = vpack.c.bf16 %v6804_v37, %v6799_v36  ;;  %v6873_v47 = vunpack.i.l.bf16 %v6872_v17  ;;  %v4892_v36 = vld [vmem:[%s10207_s8] sm:$0x1f] }
 0x462   : > { %v6805_v34 = vpop.trf.xlu0  ;;  %v4861_v22 = vpack.c.bf16 %v6876_v19, %v6871_v33 }
 0x463   : > { %4901 = vmatprep.subr.bf16.mxu1 %v4860_v32  ;;  %v6877_v27 = vpop.trf.xlu1  ;;  %v6809_v9 = vunpack.i.h.bf16 %v6805_v34  ;;  %v6806_v46 = vunpack.i.l.bf16 %v6805_v34  ;;  %v4862_v25 = vpack.c.bf16 %v6873_v47, %v6868_v7 }
 0x464   : > { %4902 = vmatpush1.bf16.msra.mxu1 %v4859_v3  ;;  %v6878_v12 = vunpack.i.l.bf16 %v6877_v27  ;;  %v6881_v28 = vunpack.i.h.bf16 %v6877_v27 }
 0x465   : > { %6932 = vxpose.xlu0.b32.cont [13/16] (narrow) %v6931_v41, 64 }
 0x466   : > { %v6810_v35 = vpop.trf.xlu0 }
 0x467   : > { %v6814_v60 = vunpack.i.h.bf16 %v6810_v35  ;;  %v6811_v18 = vunpack.i.l.bf16 %v6810_v35  ;;  %v6882_v51 = vpop.trf.xlu1 }
 0x468   : > { %v6883_v40 = vunpack.i.l.bf16 %v6882_v51  ;;  %v6886_v11 = vunpack.i.h.bf16 %v6882_v51 }
 0x469   : > { %6934 = vxpose.xlu0.b32.cont [14/16] (narrow) %v6933_v44, 64  ;;  %v4868_v23 = vpack.c.bf16 %v6811_v18, %v6806_v46  ;;  %v4867_v57 = vpack.c.bf16 %v6814_v60, %v6809_v9 }
 0x46a   : > { %v6815_v56 = vpop.trf.xlu0  ;;  %v4870_v55 = vpack.c.bf16 %v6883_v40, %v6878_v12  ;;  %v4869_v63 = vpack.c.bf16 %v6886_v11, %v6881_v28 }
 0x46b   : > { %4903 = vmatprep.subr.bf16.mxu1 %v4868_v23  ;;  %v6887_v8 = vpop.trf.xlu1  ;;  %v6819_v49 = vunpack.i.h.bf16 %v6815_v56  ;;  %v6816_v5 = vunpack.i.l.bf16 %v6815_v56 }
 0x46c   : > { %4904 = vmatpush1.bf16.msra.mxu1 %v4867_v57  ;;  %v6888_v20 = vunpack.i.l.bf16 %v6887_v8  ;;  %v6891_v29 = vunpack.i.h.bf16 %v6887_v8 }
 0x46d   : > { %6936 = vxpose.xlu0.b32.cont [15/16] (narrow) %v6935_v4, 64 }
 0x46e   : > { %v6820_v53 = vpop.trf.xlu0 }
 0x46f   : > { %v6824_v16 = vunpack.i.h.bf16 %v6820_v53  ;;  %v6821_v13 = vunpack.i.l.bf16 %v6820_v53  ;;  %v6892_v26 = vpop.trf.xlu1 }
 0x470   : > { %v6893_v31 = vunpack.i.l.bf16 %v6892_v26  ;;  %v6896_v61 = vunpack.i.h.bf16 %v6892_v26 }
 0x471   : > { %6938 = vxpose.xlu0.b32.end [16/16] (narrow) %v6937_v2, 64  ;;  %v4876_v54 = vpack.c.bf16 %v6821_v13, %v6816_v5  ;;  %v4875_v42 = vpack.c.bf16 %v6824_v16, %v6819_v49 }
 0x472   : > { %v6825_v1 = vpop.trf.xlu0  ;;  %v4878_v4 = vpack.c.bf16 %v6893_v31, %v6888_v20  ;;  %v4877_v2 = vpack.c.bf16 %v6896_v61, %v6891_v29 }
 0x473   : > { %4905 = vmatprep.subr.bf16.mxu1 %v4876_v54  ;;  %v6897_v50 = vpop.trf.xlu1  ;;  %v6829_v6 = vunpack.i.h.bf16 %v6825_v1  ;;  %v6826_v59 = vunpack.i.l.bf16 %v6825_v1 }
 0x474   : > { %4906 = vmatpush1.bf16.msra.mxu1 %v4875_v42  ;;  %v6898_v14 = vunpack.i.l.bf16 %v6897_v50  ;;  %v6901_v41 = vunpack.i.h.bf16 %v6897_v50 }
 0x476   : > { %v6830_v0 = vpop.trf.xlu0 }
 0x477   : > { %v6834_v62 = vunpack.i.h.bf16 %v6830_v0  ;;  %v6831_v15 = vunpack.i.l.bf16 %v6830_v0  ;;  %v6902_v10 = vpop.trf.xlu1 }
 0x478   : > { %v6903_v58 = vunpack.i.l.bf16 %v6902_v10  ;;  %v6906_v44 = vunpack.i.h.bf16 %v6902_v10 }
 0x479   : > { %v4884_v52 = vpack.c.bf16 %v6831_v15, %v6826_v59  ;;  %v4883_v45 = vpack.c.bf16 %v6834_v62, %v6829_v6 }
 0x47a   : > { %v4886_v21 = vpack.c.bf16 %v6903_v58, %v6898_v14  ;;  %v4885_v24 = vpack.c.bf16 %v6906_v44, %v6901_v41 }
 0x47b   : > { %4907 = vmatprep.subr.bf16.mxu1 %v4884_v52 }
 0x47c   : > { %4908 = vmatpush1.bf16.msra.mxu1 %v4883_v45 }
 0x47d   : > { %4942 = vmatprep.subr.bf16.mxu1 %v4862_v25 }
 0x47f   : > { %5239 = vmatmul.mubr.msk.bf16.vlgmr.msra.gmra.mrb[64].mxu1 %vm2772_vm14, %v10158_v30 }
 0x480   : > { %4943 = vmatpush1.bf16.msra.mxu1 %v4861_v22  ;;  %4974 = vmatprep.mubr.bf16.mxu1 %v7166_v48 }
 0x481   : > { %4944 = vmatprep.subr.bf16.mxu1 %v4870_v55 }
 0x484   : > { %4945 = vmatpush1.bf16.msra.mxu1 %v4869_v63 }
 0x485   : > { %4946 = vmatprep.subr.bf16.mxu1 %v4878_v4 }
 0x488   : > { %4947 = vmatpush1.bf16.msra.mxu1 %v4877_v2 }
 0x489   : > { %4948 = vmatprep.subr.bf16.mxu1 %v4886_v21 }
 0x48c   : > { %4949 = vmatpush1.bf16.msra.mxu1 %v4885_v24 }
 0x48f   : > { %5240 = vmatmul.mubr.msk.bf16.vlgmr.msra.gmra.mrb[68].mxu1 %vm2772_vm14, %v10158_v30 }
 0x490   : > { %5015 = vmatprep.mubr.bf16.mxu1 %v7166_v48 }
 0x49a   : > { %7051 = vset.pattern.permute.xlu0 %v7166_v48 }
 0x49b   : > { %v7011_v39 = vpop.trf.xlu1  ;;  %4895 = vperm.xlu0 %7051, %v4892_v36  }
 0x49c   : > { %v7015_v9 = vunpack.i.h.bf16 %v7011_v39  ;;  %v7012_v46 = vunpack.i.l.bf16 %v7011_v39 }
 0x49f   : > { %v7016_v38 = vpop.trf.xlu1 }
 0x4a0   : > { %v7020_v18 = vunpack.i.h.bf16 %v7016_v38  ;;  %v7017_v51 = vunpack.i.l.bf16 %v7016_v38 }
 0x4a2   : > { %v4863_v49 = vpack.c.bf16 %v7017_v51, %v7012_v46  ;;  %v4865_v5 = vpack.c.bf16 %v7020_v18, %v7015_v9 }
 0x4a3   : > { %v7021_v37 = vpop.trf.xlu1 }
 0x4a4   : > { %v7025_v16 = vunpack.i.h.bf16 %v7021_v37  ;;  %v7022_v13 = vunpack.i.l.bf16 %v7021_v37 }
 0x4a7   : > { %v7026_v43 = vpop.trf.xlu1 }
 0x4a8   : > { %v7030_v1 = vunpack.i.h.bf16 %v7026_v43  ;;  %v7027_v50 = vunpack.i.l.bf16 %v7026_v43 }
 0x4aa   : > { %v4871_v33 = vpack.c.bf16 %v7027_v50, %v7022_v13  ;;  %v4873_v0 = vpack.c.bf16 %v7030_v1, %v7025_v16 }
 0x4ab   : > { %v7031_v17 = vpop.trf.xlu1 }
 0x4ac   : > { %v7035_v15 = vunpack.i.h.bf16 %v7031_v17  ;;  %v7032_v10 = vunpack.i.l.bf16 %v7031_v17 }
 0x4af   : > { %v7036_v32 = vpop.trf.xlu1 }
 0x4b0   : > { %v7040_v45 = vunpack.i.h.bf16 %v7036_v32  ;;  %v7037_v12 = vunpack.i.l.bf16 %v7036_v32 }
 0x4b2   : > { %v4879_v20 = vpack.c.bf16 %v7037_v12, %v7032_v10  ;;  %v4881_v55 = vpack.c.bf16 %v7040_v45, %v7035_v15 }
 0x4b3   : > { %v10170_v3 = vpop.trf.xlu1 }
 0x4b4   : > { %v7045_v29 = vunpack.i.h.bf16 %v10170_v3  ;;  %v7042_v63 = vunpack.i.l.bf16 %v10170_v3 }
 0x4b5   : > { %v6939_v34 = vpop.trf.xlu0 }
 0x4b6   : > { %v6943_v35 = vunpack.i.h.bf16 %v6939_v34  ;;  %v6940_v60 = vunpack.i.l.bf16 %v6939_v34 }
 0x4b7   : > { %v10172_v27 = vpop.trf.xlu1 }
 0x4b8   : > { %v7050_v58 = vunpack.i.h.bf16 %v10172_v27  ;;  %v7047_v41 = vunpack.i.l.bf16 %v10172_v27 }
 0x4b9   : > { %v6944_v23 = vpop.trf.xlu0 }
 0x4ba   : > { %v6948_v48 = vunpack.i.h.bf16 %v6944_v23  ;;  %v6945_v57 = vunpack.i.l.bf16 %v6944_v23  ;;  %v4887_v36 = vpack.c.bf16 %v7047_v41, %v7042_v63  ;;  %v4889_v39 = vpack.c.bf16 %v7050_v58, %v7045_v29 }
 0x4bc   : > { %v4864_v56 = vpack.c.bf16 %v6945_v57, %v6940_v60  ;;  %v4866_v8 = vpack.c.bf16 %v6948_v48, %v6943_v35 }
 0x4bd   : > { %v6949_v53 = vpop.trf.xlu0 }
 0x4be   : > { %4983 = vmatprep.subr.bf16.mxu1 %v4864_v56  ;;  %5024 = vmatprep.subr.bf16.mxu0 %v4866_v8  ;;  %v6953_v26 = vunpack.i.h.bf16 %v6949_v53  ;;  %v6950_v54 = vunpack.i.l.bf16 %v6949_v53 }
 0x4bf   : > { %4984 = vmatpush1.bf16.msra.mxu1 %v4863_v49  ;;  %5025 = vmatpush1.bf16.msra.mxu0 %v4865_v5 }
 0x4c1   : > { %v6954_v42 = vpop.trf.xlu0 }
 0x4c2   : > { %v6958_v7 = vunpack.i.h.bf16 %v6954_v42  ;;  %v6955_v47 = vunpack.i.l.bf16 %v6954_v42 }
 0x4c4   : > { %v4872_v6 = vpack.c.bf16 %v6955_v47, %v6950_v54  ;;  %v4874_v59 = vpack.c.bf16 %v6958_v7, %v6953_v26 }
 0x4c5   : > { %v6959_v62 = vpop.trf.xlu0 }
 0x4c6   : > { %4985 = vmatprep.subr.bf16.mxu1 %v4872_v6  ;;  %5026 = vmatprep.subr.bf16.mxu0 %v4874_v59  ;;  %v6963_v19 = vunpack.i.h.bf16 %v6959_v62  ;;  %v6960_v25 = vunpack.i.l.bf16 %v6959_v62 }
 0x4c7   : > { %4986 = vmatpush1.bf16.msra.mxu1 %v4871_v33  ;;  %5027 = vmatpush1.bf16.msra.mxu0 %v4873_v0 }
 0x4c9   : > { %v6964_v52 = vpop.trf.xlu0 }
 0x4ca   : > { %v6968_v40 = vunpack.i.h.bf16 %v6964_v52  ;;  %v6965_v28 = vunpack.i.l.bf16 %v6964_v52 }
 0x4cc   : > { %v4880_v22 = vpack.c.bf16 %v6965_v28, %v6960_v25  ;;  %v4882_v11 = vpack.c.bf16 %v6968_v40, %v6963_v19 }
 0x4cd   : > { %v6969_v31 = vpop.trf.xlu0 }
 0x4ce   : > { %4987 = vmatprep.subr.bf16.mxu1 %v4880_v22  ;;  %5028 = vmatprep.subr.bf16.mxu0 %v4882_v11  ;;  %v6973_v61 = vunpack.i.h.bf16 %v6969_v31  ;;  %v6970_v14 = vunpack.i.l.bf16 %v6969_v31 }
 0x4cf   : > { %4988 = vmatpush1.bf16.msra.mxu1 %v4879_v20  ;;  %5029 = vmatpush1.bf16.msra.mxu0 %v4881_v55 }
 0x4d1   : > { %v6974_v4 = vpop.trf.xlu0 }
 0x4d2   : > { %v6978_v2 = vunpack.i.h.bf16 %v6974_v4  ;;  %v6975_v44 = vunpack.i.l.bf16 %v6974_v4 }
 0x4d4   : > { %v4888_v21 = vpack.c.bf16 %v6975_v44, %v6970_v14  ;;  %v4890_v24 = vpack.c.bf16 %v6978_v2, %v6973_v61 }
 0x4d6   : > { %4989 = vmatprep.subr.bf16.mxu1 %v4888_v21  ;;  %5030 = vmatprep.subr.bf16.mxu0 %v4890_v24 }
 0x4d7   : > { %4990 = vmatpush1.bf16.msra.mxu1 %v4887_v36  ;;  %5031 = vmatpush1.bf16.msra.mxu0 %v4889_v39 }
 0x4da   : > { %5241 = vmatmul.mubr.msk.bf16.vlgmr.msra.gmra.mrb[72].mxu1 %vm2772_vm14, %v10158_v30  ;;  %5242 = vmatmul.mubr.msk.bf16.vlgmr.msra.gmra.mrb[96].mxu0 %vm2772_vm14, %v10158_v30 }
 0x51a   : > { %v4896_v38 = vpop.permute.xlu0 %4895 }
 0x552   : > { %v4935_v37 = vpop.f32.mrb[64].mxu1 }
 0x553   : > { %v4937_v43 = vpop.f32.mrb[65].mxu1  ;;  %v4936_v17 = vadd.f32 %v4935_v37, %v4896_v38 }
 0x554   : > { %v4939_v32 = vpop.f32.mrb[66].mxu1  ;;  %v4938_v3 = vadd.f32 %v4937_v43, %v4896_v38 }
 0x555   : > { %5065 = vst [vmem:[%s10186_s26] sm:$0x1f] %v4936_v17  ;;  %v4940_v34 = vpop.f32.mrb[67].mxu1 }
 0x556   : > { %5066 = vst [vmem:[%s10186_s26 + $0x8] sm:$0x1f] %v4938_v3 }
 0x562   : > { %v4976_v30 = vpop.f32.mrb[68].mxu1 }
 0x563   : > { %v4977_v27 = vadd.f32 %v4976_v30, %v4896_v38  ;;  %v4978_v9 = vpop.f32.mrb[69].mxu1 }
 0x564   : > { %v4979_v46 = vadd.f32 %v4978_v9, %v4896_v38  ;;  %v4980_v35 = vpop.f32.mrb[70].mxu1 }
 0x565   : > { %5067 = vst [vmem:[%s10186_s26 + $0x10] sm:$0x1f] %v4977_v27  ;;  %v4981_v60 = vpop.f32.mrb[71].mxu1 }
 0x566   : > { %5068 = vst [vmem:[%s10186_s26 + $0x18] sm:$0x1f] %v4979_v46 }
 0x5ad   : > { %v5017_v18 = vpop.f32.mrb[72].mxu1  ;;  %v5058_v51 = vpop.f32.mrb[96].mxu0 }
 0x5ae   : > { %v5018_v23 = vadd.f32 %v5017_v18, %v4896_v38  ;;  %v5059_v48 = vadd.f32 %v5058_v51, %v4896_v38  ;;  %v5019_v57 = vpop.f32.mrb[73].mxu1  ;;  %v5060_v56 = vpop.f32.mrb[97].mxu0 }
 0x5af   : > { %v5020_v8 = vadd.f32 %v5019_v57, %v4896_v38  ;;  %v5061_v49 = vadd.f32 %v5060_v56, %v4896_v38  ;;  %v5021_v5 = vpop.f32.mrb[74].mxu1  ;;  %v5062_v53 = vpop.f32.mrb[98].mxu0 }
 0x5b0   : > { %5069 = vst [vmem:[%s10186_s26 + $0x20] sm:$0x1f] %v5018_v23  ;;  %5071 = vst [vmem:[%s10186_s26 + $0x30] sm:$0x1f] %v5059_v48  ;;  %v5022_v16 = vpop.f32.mrb[75].mxu1  ;;  %v5063_v13 = vpop.f32.mrb[99].mxu0 }
 0x5b1   : > { %5070 = vst [vmem:[%s10186_s26 + $0x28] sm:$0x1f] %v5020_v8  ;;  %5072 = vst [vmem:[%s10186_s26 + $0x38] sm:$0x1f] %v5061_v49 }
 0x5b2 PF: > { %s19_s30 = sadd.s32 1, %s7153_s30  }
 0x5b3   : > { %p16_p4 = scmp.ge.s32.totalorder %s19_s30, 4  }
 0x5b5   :  { %18 = sbr.rel (!%p16_p4) target bundleno = 1 (0x1), region = 91 }

</bundles_post_ra>
